<compile_context>
chip_gen: v6e
topology: v6e:2x2x1
jax: 0.10.0
libtpu: 0.0.40
codegen_flags: <defaults>
</compile_context>

<pallas_src>
import jax
import jax.numpy as jnp
from jax import lax
from jax.experimental import pallas as pl
from jax.experimental.pallas import tpu as pltpu

K = 3  # conv kernel size (3x3, padding=1, stride=1)


def _resblock_kernel(x_ref, w1_ref, b1_ref, w2_ref, b2_ref, out_ref, pad_ref):
    # x_ref   : (1, H, W, C)   unpadded input tile (one batch element)
    # w1_ref  : (3, 3, C, C)   conv1 weights, layout (kh, kw, Cin, Cout)
    # b1_ref  : (1, 1, C)      conv1 bias
    # w2_ref  : (3, 3, C, C)   conv2 weights
    # b2_ref  : (1, 1, C)      conv2 bias
    # out_ref : (1, H, W, C)   output tile
    # pad_ref : (H+2, W+2, C)  VMEM scratch, reused for padded input AND padded hidden
    _, H, W, C = out_ref.shape

    # Zero only the 1-wide border of the scratch; the interior is fully overwritten
    # below before every use.  (Megacore-safe: no reliance on program_id == 0.)
    pad_ref[0:1, :, :] = jnp.zeros((1, W + 2, C), jnp.float32)
    pad_ref[H + 1:H + 2, :, :] = jnp.zeros((1, W + 2, C), jnp.float32)
    pad_ref[:, 0:1, :] = jnp.zeros((H + 2, 1, C), jnp.float32)
    pad_ref[:, W + 1:W + 2, :] = jnp.zeros((H + 2, 1, C), jnp.float32)

    def conv3x3(w_ref, bias):
        """3x3 'same' conv of the current zero-padded scratch contents (MXU dots)."""
        p = pad_ref[...]                                  # (H+2, W+2, C)
        # Hoist the 3 kw-shifted (sublane-misaligned) views once; reuse across kh.
        pw = [p[:, kw:kw + W, :] for kw in range(K)]      # 3 x (H+2, W, C)
        acc = None
        for kh in range(K):
            for kw in range(K):
                part = jnp.dot(pw[kw][kh:kh + H], w_ref[kh, kw],
                               preferred_element_type=jnp.float32)
                # Fold the bias into the first-tap init (no zeros slab).
                acc = (part + bias) if acc is None else (acc + part)
        return acc                                        # (H, W, C) float32

    x = x_ref[0]                                          # (H, W, C)

    # ---- conv1 -> bias -> ReLU ----
    pad_ref[1:1 + H, 1:1 + W, :] = x.astype(jnp.float32)
    h = jnp.maximum(conv3x3(w1_ref, b1_ref[...]), 0.0)

    # ---- conv2 -> bias (same scratch reused for the padded intermediate) ----
    pad_ref[1:1 + H, 1:1 + W, :] = h
    y = conv3x3(w2_ref, b2_ref[...])

    # ---- residual add straight from the unpadded input block ----
    out_ref[0] = (y + x.astype(jnp.float32)).astype(out_ref.dtype)


def residual_block_nhwc(x_nhwc, w1, b1, w2, b2):
    """x_nhwc: (B, H, W, C) float32; w*: (3, 3, Cin, Cout); b*: (C,)."""
    B, H, W, C = x_nhwc.shape
    b1r = b1.reshape(1, 1, C).astype(jnp.float32)
    b2r = b2.reshape(1, 1, C).astype(jnp.float32)

    # Advisory cost hint so XLA schedules the surrounding layout ops sensibly.
    flops = B * 2 * 2 * H * W * K * K * C * C             # 2 convs, 2 flops per MAC
    bytes_accessed = 4 * (2 * x_nhwc.size + w1.size + w2.size + b1.size + b2.size)
    cost = pl.CostEstimate(flops=flops, transcendentals=0,
                           bytes_accessed=bytes_accessed)

    grid_spec = pltpu.PrefetchScalarGridSpec(
        num_scalar_prefetch=0,
        grid=(B,),                                        # batch-parallel (megacore)
        in_specs=[
            pl.BlockSpec((1, H, W, C), lambda b: (b, 0, 0, 0)),
            pl.BlockSpec((K, K, C, C), lambda b: (0, 0, 0, 0)),
            pl.BlockSpec((1, 1, C), lambda b: (0, 0, 0)),
            pl.BlockSpec((K, K, C, C), lambda b: (0, 0, 0, 0)),
            pl.BlockSpec((1, 1, C), lambda b: (0, 0, 0)),
        ],
        out_specs=pl.BlockSpec((1, H, W, C), lambda b: (b, 0, 0, 0)),
        scratch_shapes=[pltpu.VMEM((H + 2, W + 2, C), jnp.float32)],
    )
    return pl.pallas_call(
        _resblock_kernel,
        out_shape=jax.ShapeDtypeStruct((B, H, W, C), x_nhwc.dtype),
        grid_spec=grid_spec,
        compiler_params=pltpu.CompilerParams(
            dimension_semantics=("parallel",),
            vmem_limit_bytes=32 * 1024 * 1024,
        ),
        cost_estimate=cost,
    )(x_nhwc, w1, b1r, w2, b2r)


@jax.jit
def residual_block_nchw(x_nchw, w1_oihw, b1, w2_oihw, b2):
    """Matches PyTorch ResidualBlock.forward semantics on NCHW input."""
    # Note: if the surrounding model can stay NHWC end-to-end these two activation
    # transposes (a full HBM read+write each) disappear; kept here to honor the
    # NCHW module contract.  jit lets XLA fuse them with adjacent ops.
    x_nhwc = jnp.transpose(x_nchw, (0, 2, 3, 1))
    w1 = jnp.transpose(w1_oihw, (2, 3, 1, 0))   # OIHW -> (kh, kw, Cin, Cout)
    w2 = jnp.transpose(w2_oihw, (2, 3, 1, 0))
    y_nhwc = residual_block_nhwc(x_nhwc, w1, b1, w2, b2)
    return jnp.transpose(y_nhwc, (0, 3, 1, 2))


def _reference_nchw(x, w1, b1, w2, b2):
    """Pure-JAX reference (equivalent to the PyTorch module)."""
    dn = lax.conv_dimension_numbers(x.shape, w1.shape, ("NCHW", "OIHW", "NCHW"))
    h = lax.conv_general_dilated(x, w1, (1, 1), ((1, 1), (1, 1)), dimension_numbers=dn)
    h = jnp.maximum(h + b1.reshape(1, -1, 1, 1), 0.0)
    o = lax.conv_general_dilated(h, w2, (1, 1), ((1, 1), (1, 1)), dimension_numbers=dn)
    o = o + b2.reshape(1, -1, 1, 1)
    return x + o


if __name__ == "__main__":
    B, C, H, W = 2, 4, 16, 16

    key = jax.random.PRNGKey(0)
    kx, k1, k2, kb1, kb2 = jax.random.split(key, 5)

    x = jax.random.normal(kx, (B, C, H, W), dtype=jnp.float32)

    # Deterministic parameter init (PyTorch Conv2d-style uniform bound 1/sqrt(fan_in)).
    fan_in = C * K * K
    bound = 1.0 / (fan_in ** 0.5)
    w1 = jax.random.uniform(k1, (C, C, K, K), jnp.float32, -bound, bound)
    w2 = jax.random.uniform(k2, (C, C, K, K), jnp.float32, -bound, bound)
    b1 = jax.random.uniform(kb1, (C,), jnp.float32, -bound, bound)
    b2 = jax.random.uniform(kb2, (C,), jnp.float32, -bound, bound)

    y = jax.block_until_ready(residual_block_nchw(x, w1, b1, w2, b2))

    y_ref = _reference_nchw(x, w1, b1, w2, b2)
    assert y.shape == (B, C, H, W)
    assert jnp.allclose(y, y_ref, atol=1e-4, rtol=1e-4), "mismatch vs. reference conv"

    print("KERNEL_OK")
</pallas_src>

<mosaic_0001>
module attributes {stable_mosaic.version = 11 : i64} {
  func.func @_resblock_kernel(%arg0: i32, %arg1: memref<1x16x16x4xf32, #tpu.memory_space<vmem>>, %arg2: memref<3x3x4x4xf32, #tpu.memory_space<vmem>>, %arg3: memref<1x1x4xf32, #tpu.memory_space<vmem>>, %arg4: memref<3x3x4x4xf32, #tpu.memory_space<vmem>>, %arg5: memref<1x1x4xf32, #tpu.memory_space<vmem>>, %arg6: memref<1x16x16x4xf32, #tpu.memory_space<vmem>>, %arg7: memref<18x18x4xf32, #tpu.memory_space<vmem>>) attributes {dimension_semantics = [#tpu.dimension_semantics<parallel>], iteration_bounds = array<i64: 2>, scalar_prefetch = 0 : i64, scratch_operands = 1 : i64, tpu.core_type = #tpu.core_type<tc>, window_params = [{transform_indices = @transform_0, window_bounds = array<i64: 1, 16, 16, 4>}, {pipeline_mode = #tpu.pipeline_mode<synchronous>, transform_indices = @transform_1, window_bounds = array<i64: 3, 3, 4, 4>}, {pipeline_mode = #tpu.pipeline_mode<synchronous>, transform_indices = @transform_2, window_bounds = array<i64: 1, 1, 4>}, {pipeline_mode = #tpu.pipeline_mode<synchronous>, transform_indices = @transform_3, window_bounds = array<i64: 3, 3, 4, 4>}, {pipeline_mode = #tpu.pipeline_mode<synchronous>, transform_indices = @transform_4, window_bounds = array<i64: 1, 1, 4>}, {transform_indices = @transform_5, window_bounds = array<i64: 1, 16, 16, 4>}]} {
    %cst = arith.constant 0.000000e+00 : f32
    %0 = vector.broadcast %cst : f32 to vector<1x18x4xf32>
    %c0 = arith.constant 0 : index
    %c0_0 = arith.constant 0 : index
    %c0_1 = arith.constant 0 : index
    %1 = vector.load %arg7[%c0, %c0_0, %c0_1] : memref<18x18x4xf32, #tpu.memory_space<vmem>>, vector<1x18x4xf32>
    tpu.vector_store %arg7[%c0, %c0_0, %c0_1], %0 {strides = array<i32>} : memref<18x18x4xf32, #tpu.memory_space<vmem>>, vector<1x18x4xf32>,
    %cst_2 = arith.constant 0.000000e+00 : f32
    %2 = vector.broadcast %cst_2 : f32 to vector<1x18x4xf32>
    %c17 = arith.constant 17 : index
    %c0_3 = arith.constant 0 : index
    %c0_4 = arith.constant 0 : index
    %3 = vector.load %arg7[%c17, %c0_3, %c0_4] : memref<18x18x4xf32, #tpu.memory_space<vmem>>, vector<1x18x4xf32>
    tpu.vector_store %arg7[%c17, %c0_3, %c0_4], %2 {strides = array<i32>} : memref<18x18x4xf32, #tpu.memory_space<vmem>>, vector<1x18x4xf32>,
    %cst_5 = arith.constant 0.000000e+00 : f32
    %4 = vector.broadcast %cst_5 : f32 to vector<18x1x4xf32>
    %c0_6 = arith.constant 0 : index
    %c0_7 = arith.constant 0 : index
    %c0_8 = arith.constant 0 : index
    %5 = vector.load %arg7[%c0_6, %c0_7, %c0_8] : memref<18x18x4xf32, #tpu.memory_space<vmem>>, vector<18x1x4xf32>
    tpu.vector_store %arg7[%c0_6, %c0_7, %c0_8], %4 {strides = array<i32>} : memref<18x18x4xf32, #tpu.memory_space<vmem>>, vector<18x1x4xf32>,
    %cst_9 = arith.constant 0.000000e+00 : f32
    %6 = vector.broadcast %cst_9 : f32 to vector<18x1x4xf32>
    %c0_10 = arith.constant 0 : index
    %c17_11 = arith.constant 17 : index
    %c0_12 = arith.constant 0 : index
    %7 = vector.load %arg7[%c0_10, %c17_11, %c0_12] : memref<18x18x4xf32, #tpu.memory_space<vmem>>, vector<18x1x4xf32>
    tpu.vector_store %arg7[%c0_10, %c17_11, %c0_12], %6 {strides = array<i32>} : memref<18x18x4xf32, #tpu.memory_space<vmem>>, vector<18x1x4xf32>,
    %c0_13 = arith.constant 0 : index
    %c0_14 = arith.constant 0 : index
    %c0_15 = arith.constant 0 : index
    %c0_16 = arith.constant 0 : index
    %8 = vector.load %arg1[%c0_13, %c0_14, %c0_15, %c0_16] : memref<1x16x16x4xf32, #tpu.memory_space<vmem>>, vector<1x16x16x4xf32>
    %9 = vector.shape_cast %8 : vector<1x16x16x4xf32> to vector<16x16x4xf32>
    %c1 = arith.constant 1 : index
    %c1_17 = arith.constant 1 : index
    %c0_18 = arith.constant 0 : index
    %10 = vector.load %arg7[%c1, %c1_17, %c0_18] : memref<18x18x4xf32, #tpu.memory_space<vmem>>, vector<16x16x4xf32>
    tpu.vector_store %arg7[%c1, %c1_17, %c0_18], %9 {strides = array<i32>} : memref<18x18x4xf32, #tpu.memory_space<vmem>>, vector<16x16x4xf32>,
    %c0_19 = arith.constant 0 : index
    %c0_20 = arith.constant 0 : index
    %c0_21 = arith.constant 0 : index
    %11 = vector.load %arg3[%c0_19, %c0_20, %c0_21] : memref<1x1x4xf32, #tpu.memory_space<vmem>>, vector<1x1x4xf32>
    %c0_22 = arith.constant 0 : index
    %c0_23 = arith.constant 0 : index
    %c0_24 = arith.constant 0 : index
    %12 = vector.load %arg7[%c0_22, %c0_23, %c0_24] : memref<18x18x4xf32, #tpu.memory_space<vmem>>, vector<18x18x4xf32>
    %13 = vector.extract_strided_slice %12 {offsets = [0, 0, 0], sizes = [18, 16, 4], strides = [1, 1, 1]} : vector<18x18x4xf32> to vector<18x16x4xf32>
    %14 = vector.extract_strided_slice %12 {offsets = [0, 1, 0], sizes = [18, 16, 4], strides = [1, 1, 1]} : vector<18x18x4xf32> to vector<18x16x4xf32>
    %15 = vector.extract_strided_slice %12 {offsets = [0, 2, 0], sizes = [18, 16, 4], strides = [1, 1, 1]} : vector<18x18x4xf32> to vector<18x16x4xf32>
    %16 = vector.extract_strided_slice %13 {offsets = [0, 0, 0], sizes = [16, 16, 4], strides = [1, 1, 1]} : vector<18x16x4xf32> to vector<16x16x4xf32>
    %c0_25 = arith.constant 0 : index
    %c0_26 = arith.constant 0 : index
    %c0_27 = arith.constant 0 : index
    %c0_28 = arith.constant 0 : index
    %17 = vector.load %arg2[%c0_25, %c0_26, %c0_27, %c0_28] : memref<3x3x4x4xf32, #tpu.memory_space<vmem>>, vector<1x1x4x4xf32>
    %18 = vector.shape_cast %17 : vector<1x1x4x4xf32> to vector<4x4xf32>
    %cst_29 = arith.constant dense<0.000000e+00> : vector<16x16x4xf32>
    %19 = tpu.matmul %16, %18, %cst_29 {dimension_numbers = #tpu.dot_dimension_numbers<[2], [0], [0, 1], [1], [0, 0, 0, 1, 1, 1], [], []>} : vector<16x16x4xf32>, vector<4x4xf32>, vector<16x16x4xf32> -> vector<16x16x4xf32>
    %20 = vector.broadcast %11 : vector<1x1x4xf32> to vector<16x16x4xf32>
    %21 = arith.addf %19, %20 : vector<16x16x4xf32>
    %22 = vector.extract_strided_slice %14 {offsets = [0, 0, 0], sizes = [16, 16, 4], strides = [1, 1, 1]} : vector<18x16x4xf32> to vector<16x16x4xf32>
    %c0_30 = arith.constant 0 : index
    %c1_31 = arith.constant 1 : index
    %c0_32 = arith.constant 0 : index
    %c0_33 = arith.constant 0 : index
    %23 = vector.load %arg2[%c0_30, %c1_31, %c0_32, %c0_33] : memref<3x3x4x4xf32, #tpu.memory_space<vmem>>, vector<1x1x4x4xf32>
    %24 = vector.shape_cast %23 : vector<1x1x4x4xf32> to vector<4x4xf32>
    %cst_34 = arith.constant dense<0.000000e+00> : vector<16x16x4xf32>
    %25 = tpu.matmul %22, %24, %cst_34 {dimension_numbers = #tpu.dot_dimension_numbers<[2], [0], [0, 1], [1], [0, 0, 0, 1, 1, 1], [], []>} : vector<16x16x4xf32>, vector<4x4xf32>, vector<16x16x4xf32> -> vector<16x16x4xf32>
    %26 = arith.addf %21, %25 : vector<16x16x4xf32>
    %27 = vector.extract_strided_slice %15 {offsets = [0, 0, 0], sizes = [16, 16, 4], strides = [1, 1, 1]} : vector<18x16x4xf32> to vector<16x16x4xf32>
    %c0_35 = arith.constant 0 : index
    %c2 = arith.constant 2 : index
    %c0_36 = arith.constant 0 : index
    %c0_37 = arith.constant 0 : index
    %28 = vector.load %arg2[%c0_35, %c2, %c0_36, %c0_37] : memref<3x3x4x4xf32, #tpu.memory_space<vmem>>, vector<1x1x4x4xf32>
    %29 = vector.shape_cast %28 : vector<1x1x4x4xf32> to vector<4x4xf32>
    %cst_38 = arith.constant dense<0.000000e+00> : vector<16x16x4xf32>
    %30 = tpu.matmul %27, %29, %cst_38 {dimension_numbers = #tpu.dot_dimension_numbers<[2], [0], [0, 1], [1], [0, 0, 0, 1, 1, 1], [], []>} : vector<16x16x4xf32>, vector<4x4xf32>, vector<16x16x4xf32> -> vector<16x16x4xf32>
    %31 = arith.addf %26, %30 : vector<16x16x4xf32>
    %32 = vector.extract_strided_slice %13 {offsets = [1, 0, 0], sizes = [16, 16, 4], strides = [1, 1, 1]} : vector<18x16x4xf32> to vector<16x16x4xf32>
    %c1_39 = arith.constant 1 : index
    %c0_40 = arith.constant 0 : index
    %c0_41 = arith.constant 0 : index
    %c0_42 = arith.constant 0 : index
    %33 = vector.load %arg2[%c1_39, %c0_40, %c0_41, %c0_42] : memref<3x3x4x4xf32, #tpu.memory_space<vmem>>, vector<1x1x4x4xf32>
    %34 = vector.shape_cast %33 : vector<1x1x4x4xf32> to vector<4x4xf32>
    %cst_43 = arith.constant dense<0.000000e+00> : vector<16x16x4xf32>
    %35 = tpu.matmul %32, %34, %cst_43 {dimension_numbers = #tpu.dot_dimension_numbers<[2], [0], [0, 1], [1], [0, 0, 0, 1, 1, 1], [], []>} : vector<16x16x4xf32>, vector<4x4xf32>, vector<16x16x4xf32> -> vector<16x16x4xf32>
    %36 = arith.addf %31, %35 : vector<16x16x4xf32>
    %37 = vector.extract_strided_slice %14 {offsets = [1, 0, 0], sizes = [16, 16, 4], strides = [1, 1, 1]} : vector<18x16x4xf32> to vector<16x16x4xf32>
    %c1_44 = arith.constant 1 : index
    %c1_45 = arith.constant 1 : index
    %c0_46 = arith.constant 0 : index
    %c0_47 = arith.constant 0 : index
    %38 = vector.load %arg2[%c1_44, %c1_45, %c0_46, %c0_47] : memref<3x3x4x4xf32, #tpu.memory_space<vmem>>, vector<1x1x4x4xf32>
    %39 = vector.shape_cast %38 : vector<1x1x4x4xf32> to vector<4x4xf32>
    %cst_48 = arith.constant dense<0.000000e+00> : vector<16x16x4xf32>
    %40 = tpu.matmul %37, %39, %cst_48 {dimension_numbers = #tpu.dot_dimension_numbers<[2], [0], [0, 1], [1], [0, 0, 0, 1, 1, 1], [], []>} : vector<16x16x4xf32>, vector<4x4xf32>, vector<16x16x4xf32> -> vector<16x16x4xf32>
    %41 = arith.addf %36, %40 : vector<16x16x4xf32>
    %42 = vector.extract_strided_slice %15 {offsets = [1, 0, 0], sizes = [16, 16, 4], strides = [1, 1, 1]} : vector<18x16x4xf32> to vector<16x16x4xf32>
    %c1_49 = arith.constant 1 : index
    %c2_50 = arith.constant 2 : index
    %c0_51 = arith.constant 0 : index
    %c0_52 = arith.constant 0 : index
    %43 = vector.load %arg2[%c1_49, %c2_50, %c0_51, %c0_52] : memref<3x3x4x4xf32, #tpu.memory_space<vmem>>, vector<1x1x4x4xf32>
    %44 = vector.shape_cast %43 : vector<1x1x4x4xf32> to vector<4x4xf32>
    %cst_53 = arith.constant dense<0.000000e+00> : vector<16x16x4xf32>
    %45 = tpu.matmul %42, %44, %cst_53 {dimension_numbers = #tpu.dot_dimension_numbers<[2], [0], [0, 1], [1], [0, 0, 0, 1, 1, 1], [], []>} : vector<16x16x4xf32>, vector<4x4xf32>, vector<16x16x4xf32> -> vector<16x16x4xf32>
    %46 = arith.addf %41, %45 : vector<16x16x4xf32>
    %47 = vector.extract_strided_slice %13 {offsets = [2, 0, 0], sizes = [16, 16, 4], strides = [1, 1, 1]} : vector<18x16x4xf32> to vector<16x16x4xf32>
    %c2_54 = arith.constant 2 : index
    %c0_55 = arith.constant 0 : index
    %c0_56 = arith.constant 0 : index
    %c0_57 = arith.constant 0 : index
    %48 = vector.load %arg2[%c2_54, %c0_55, %c0_56, %c0_57] : memref<3x3x4x4xf32, #tpu.memory_space<vmem>>, vector<1x1x4x4xf32>
    %49 = vector.shape_cast %48 : vector<1x1x4x4xf32> to vector<4x4xf32>
    %cst_58 = arith.constant dense<0.000000e+00> : vector<16x16x4xf32>
    %50 = tpu.matmul %47, %49, %cst_58 {dimension_numbers = #tpu.dot_dimension_numbers<[2], [0], [0, 1], [1], [0, 0, 0, 1, 1, 1], [], []>} : vector<16x16x4xf32>, vector<4x4xf32>, vector<16x16x4xf32> -> vector<16x16x4xf32>
    %51 = arith.addf %46, %50 : vector<16x16x4xf32>
    %52 = vector.extract_strided_slice %14 {offsets = [2, 0, 0], sizes = [16, 16, 4], strides = [1, 1, 1]} : vector<18x16x4xf32> to vector<16x16x4xf32>
    %c2_59 = arith.constant 2 : index
    %c1_60 = arith.constant 1 : index
    %c0_61 = arith.constant 0 : index
    %c0_62 = arith.constant 0 : index
    %53 = vector.load %arg2[%c2_59, %c1_60, %c0_61, %c0_62] : memref<3x3x4x4xf32, #tpu.memory_space<vmem>>, vector<1x1x4x4xf32>
    %54 = vector.shape_cast %53 : vector<1x1x4x4xf32> to vector<4x4xf32>
    %cst_63 = arith.constant dense<0.000000e+00> : vector<16x16x4xf32>
    %55 = tpu.matmul %52, %54, %cst_63 {dimension_numbers = #tpu.dot_dimension_numbers<[2], [0], [0, 1], [1], [0, 0, 0, 1, 1, 1], [], []>} : vector<16x16x4xf32>, vector<4x4xf32>, vector<16x16x4xf32> -> vector<16x16x4xf32>
    %56 = arith.addf %51, %55 : vector<16x16x4xf32>
    %57 = vector.extract_strided_slice %15 {offsets = [2, 0, 0], sizes = [16, 16, 4], strides = [1, 1, 1]} : vector<18x16x4xf32> to vector<16x16x4xf32>
    %c2_64 = arith.constant 2 : index
    %c2_65 = arith.constant 2 : index
    %c0_66 = arith.constant 0 : index
    %c0_67 = arith.constant 0 : index
    %58 = vector.load %arg2[%c2_64, %c2_65, %c0_66, %c0_67] : memref<3x3x4x4xf32, #tpu.memory_space<vmem>>, vector<1x1x4x4xf32>
    %59 = vector.shape_cast %58 : vector<1x1x4x4xf32> to vector<4x4xf32>
    %cst_68 = arith.constant dense<0.000000e+00> : vector<16x16x4xf32>
    %60 = tpu.matmul %57, %59, %cst_68 {dimension_numbers = #tpu.dot_dimension_numbers<[2], [0], [0, 1], [1], [0, 0, 0, 1, 1, 1], [], []>} : vector<16x16x4xf32>, vector<4x4xf32>, vector<16x16x4xf32> -> vector<16x16x4xf32>
    %61 = arith.addf %56, %60 : vector<16x16x4xf32>
    %cst_69 = arith.constant 0.000000e+00 : f32
    %62 = vector.broadcast %cst_69 : f32 to vector<16x16x4xf32>
    %63 = arith.maximumf %61, %62 : vector<16x16x4xf32>
    %c1_70 = arith.constant 1 : index
    %c1_71 = arith.constant 1 : index
    %c0_72 = arith.constant 0 : index
    %64 = vector.load %arg7[%c1_70, %c1_71, %c0_72] : memref<18x18x4xf32, #tpu.memory_space<vmem>>, vector<16x16x4xf32>
    tpu.vector_store %arg7[%c1_70, %c1_71, %c0_72], %63 {strides = array<i32>} : memref<18x18x4xf32, #tpu.memory_space<vmem>>, vector<16x16x4xf32>,
    %c0_73 = arith.constant 0 : index
    %c0_74 = arith.constant 0 : index
    %c0_75 = arith.constant 0 : index
    %65 = vector.load %arg5[%c0_73, %c0_74, %c0_75] : memref<1x1x4xf32, #tpu.memory_space<vmem>>, vector<1x1x4xf32>
    %c0_76 = arith.constant 0 : index
    %c0_77 = arith.constant 0 : index
    %c0_78 = arith.constant 0 : index
    %66 = vector.load %arg7[%c0_76, %c0_77, %c0_78] : memref<18x18x4xf32, #tpu.memory_space<vmem>>, vector<18x18x4xf32>
    %67 = vector.extract_strided_slice %66 {offsets = [0, 0, 0], sizes = [18, 16, 4], strides = [1, 1, 1]} : vector<18x18x4xf32> to vector<18x16x4xf32>
    %68 = vector.extract_strided_slice %66 {offsets = [0, 1, 0], sizes = [18, 16, 4], strides = [1, 1, 1]} : vector<18x18x4xf32> to vector<18x16x4xf32>
    %69 = vector.extract_strided_slice %66 {offsets = [0, 2, 0], sizes = [18, 16, 4], strides = [1, 1, 1]} : vector<18x18x4xf32> to vector<18x16x4xf32>
    %70 = vector.extract_strided_slice %67 {offsets = [0, 0, 0], sizes = [16, 16, 4], strides = [1, 1, 1]} : vector<18x16x4xf32> to vector<16x16x4xf32>
    %c0_79 = arith.constant 0 : index
    %c0_80 = arith.constant 0 : index
    %c0_81 = arith.constant 0 : index
    %c0_82 = arith.constant 0 : index
    %71 = vector.load %arg4[%c0_79, %c0_80, %c0_81, %c0_82] : memref<3x3x4x4xf32, #tpu.memory_space<vmem>>, vector<1x1x4x4xf32>
    %72 = vector.shape_cast %71 : vector<1x1x4x4xf32> to vector<4x4xf32>
    %cst_83 = arith.constant dense<0.000000e+00> : vector<16x16x4xf32>
    %73 = tpu.matmul %70, %72, %cst_83 {dimension_numbers = #tpu.dot_dimension_numbers<[2], [0], [0, 1], [1], [0, 0, 0, 1, 1, 1], [], []>} : vector<16x16x4xf32>, vector<4x4xf32>, vector<16x16x4xf32> -> vector<16x16x4xf32>
    %74 = vector.broadcast %65 : vector<1x1x4xf32> to vector<16x16x4xf32>
    %75 = arith.addf %73, %74 : vector<16x16x4xf32>
    %76 = vector.extract_strided_slice %68 {offsets = [0, 0, 0], sizes = [16, 16, 4], strides = [1, 1, 1]} : vector<18x16x4xf32> to vector<16x16x4xf32>
    %c0_84 = arith.constant 0 : index
    %c1_85 = arith.constant 1 : index
    %c0_86 = arith.constant 0 : index
    %c0_87 = arith.constant 0 : index
    %77 = vector.load %arg4[%c0_84, %c1_85, %c0_86, %c0_87] : memref<3x3x4x4xf32, #tpu.memory_space<vmem>>, vector<1x1x4x4xf32>
    %78 = vector.shape_cast %77 : vector<1x1x4x4xf32> to vector<4x4xf32>
    %cst_88 = arith.constant dense<0.000000e+00> : vector<16x16x4xf32>
    %79 = tpu.matmul %76, %78, %cst_88 {dimension_numbers = #tpu.dot_dimension_numbers<[2], [0], [0, 1], [1], [0, 0, 0, 1, 1, 1], [], []>} : vector<16x16x4xf32>, vector<4x4xf32>, vector<16x16x4xf32> -> vector<16x16x4xf32>
    %80 = arith.addf %75, %79 : vector<16x16x4xf32>
    %81 = vector.extract_strided_slice %69 {offsets = [0, 0, 0], sizes = [16, 16, 4], strides = [1, 1, 1]} : vector<18x16x4xf32> to vector<16x16x4xf32>
    %c0_89 = arith.constant 0 : index
    %c2_90 = arith.constant 2 : index
    %c0_91 = arith.constant 0 : index
    %c0_92 = arith.constant 0 : index
    %82 = vector.load %arg4[%c0_89, %c2_90, %c0_91, %c0_92] : memref<3x3x4x4xf32, #tpu.memory_space<vmem>>, vector<1x1x4x4xf32>
    %83 = vector.shape_cast %82 : vector<1x1x4x4xf32> to vector<4x4xf32>
    %cst_93 = arith.constant dense<0.000000e+00> : vector<16x16x4xf32>
    %84 = tpu.matmul %81, %83, %cst_93 {dimension_numbers = #tpu.dot_dimension_numbers<[2], [0], [0, 1], [1], [0, 0, 0, 1, 1, 1], [], []>} : vector<16x16x4xf32>, vector<4x4xf32>, vector<16x16x4xf32> -> vector<16x16x4xf32>
    %85 = arith.addf %80, %84 : vector<16x16x4xf32>
    %86 = vector.extract_strided_slice %67 {offsets = [1, 0, 0], sizes = [16, 16, 4], strides = [1, 1, 1]} : vector<18x16x4xf32> to vector<16x16x4xf32>
    %c1_94 = arith.constant 1 : index
    %c0_95 = arith.constant 0 : index
    %c0_96 = arith.constant 0 : index
    %c0_97 = arith.constant 0 : index
    %87 = vector.load %arg4[%c1_94, %c0_95, %c0_96, %c0_97] : memref<3x3x4x4xf32, #tpu.memory_space<vmem>>, vector<1x1x4x4xf32>
    %88 = vector.shape_cast %87 : vector<1x1x4x4xf32> to vector<4x4xf32>
    %cst_98 = arith.constant dense<0.000000e+00> : vector<16x16x4xf32>
    %89 = tpu.matmul %86, %88, %cst_98 {dimension_numbers = #tpu.dot_dimension_numbers<[2], [0], [0, 1], [1], [0, 0, 0, 1, 1, 1], [], []>} : vector<16x16x4xf32>, vector<4x4xf32>, vector<16x16x4xf32> -> vector<16x16x4xf32>
    %90 = arith.addf %85, %89 : vector<16x16x4xf32>
    %91 = vector.extract_strided_slice %68 {offsets = [1, 0, 0], sizes = [16, 16, 4], strides = [1, 1, 1]} : vector<18x16x4xf32> to vector<16x16x4xf32>
    %c1_99 = arith.constant 1 : index
    %c1_100 = arith.constant 1 : index
    %c0_101 = arith.constant 0 : index
    %c0_102 = arith.constant 0 : index
    %92 = vector.load %arg4[%c1_99, %c1_100, %c0_101, %c0_102] : memref<3x3x4x4xf32, #tpu.memory_space<vmem>>, vector<1x1x4x4xf32>
    %93 = vector.shape_cast %92 : vector<1x1x4x4xf32> to vector<4x4xf32>
    %cst_103 = arith.constant dense<0.000000e+00> : vector<16x16x4xf32>
    %94 = tpu.matmul %91, %93, %cst_103 {dimension_numbers = #tpu.dot_dimension_numbers<[2], [0], [0, 1], [1], [0, 0, 0, 1, 1, 1], [], []>} : vector<16x16x4xf32>, vector<4x4xf32>, vector<16x16x4xf32> -> vector<16x16x4xf32>
    %95 = arith.addf %90, %94 : vector<16x16x4xf32>
    %96 = vector.extract_strided_slice %69 {offsets = [1, 0, 0], sizes = [16, 16, 4], strides = [1, 1, 1]} : vector<18x16x4xf32> to vector<16x16x4xf32>
    %c1_104 = arith.constant 1 : index
    %c2_105 = arith.constant 2 : index
    %c0_106 = arith.constant 0 : index
    %c0_107 = arith.constant 0 : index
    %97 = vector.load %arg4[%c1_104, %c2_105, %c0_106, %c0_107] : memref<3x3x4x4xf32, #tpu.memory_space<vmem>>, vector<1x1x4x4xf32>
    %98 = vector.shape_cast %97 : vector<1x1x4x4xf32> to vector<4x4xf32>
    %cst_108 = arith.constant dense<0.000000e+00> : vector<16x16x4xf32>
    %99 = tpu.matmul %96, %98, %cst_108 {dimension_numbers = #tpu.dot_dimension_numbers<[2], [0], [0, 1], [1], [0, 0, 0, 1, 1, 1], [], []>} : vector<16x16x4xf32>, vector<4x4xf32>, vector<16x16x4xf32> -> vector<16x16x4xf32>
    %100 = arith.addf %95, %99 : vector<16x16x4xf32>
    %101 = vector.extract_strided_slice %67 {offsets = [2, 0, 0], sizes = [16, 16, 4], strides = [1, 1, 1]} : vector<18x16x4xf32> to vector<16x16x4xf32>
    %c2_109 = arith.constant 2 : index
    %c0_110 = arith.constant 0 : index
    %c0_111 = arith.constant 0 : index
    %c0_112 = arith.constant 0 : index
    %102 = vector.load %arg4[%c2_109, %c0_110, %c0_111, %c0_112] : memref<3x3x4x4xf32, #tpu.memory_space<vmem>>, vector<1x1x4x4xf32>
    %103 = vector.shape_cast %102 : vector<1x1x4x4xf32> to vector<4x4xf32>
    %cst_113 = arith.constant dense<0.000000e+00> : vector<16x16x4xf32>
    %104 = tpu.matmul %101, %103, %cst_113 {dimension_numbers = #tpu.dot_dimension_numbers<[2], [0], [0, 1], [1], [0, 0, 0, 1, 1, 1], [], []>} : vector<16x16x4xf32>, vector<4x4xf32>, vector<16x16x4xf32> -> vector<16x16x4xf32>
    %105 = arith.addf %100, %104 : vector<16x16x4xf32>
    %106 = vector.extract_strided_slice %68 {offsets = [2, 0, 0], sizes = [16, 16, 4], strides = [1, 1, 1]} : vector<18x16x4xf32> to vector<16x16x4xf32>
    %c2_114 = arith.constant 2 : index
    %c1_115 = arith.constant 1 : index
    %c0_116 = arith.constant 0 : index
    %c0_117 = arith.constant 0 : index
    %107 = vector.load %arg4[%c2_114, %c1_115, %c0_116, %c0_117] : memref<3x3x4x4xf32, #tpu.memory_space<vmem>>, vector<1x1x4x4xf32>
    %108 = vector.shape_cast %107 : vector<1x1x4x4xf32> to vector<4x4xf32>
    %cst_118 = arith.constant dense<0.000000e+00> : vector<16x16x4xf32>
    %109 = tpu.matmul %106, %108, %cst_118 {dimension_numbers = #tpu.dot_dimension_numbers<[2], [0], [0, 1], [1], [0, 0, 0, 1, 1, 1], [], []>} : vector<16x16x4xf32>, vector<4x4xf32>, vector<16x16x4xf32> -> vector<16x16x4xf32>
    %110 = arith.addf %105, %109 : vector<16x16x4xf32>
    %111 = vector.extract_strided_slice %69 {offsets = [2, 0, 0], sizes = [16, 16, 4], strides = [1, 1, 1]} : vector<18x16x4xf32> to vector<16x16x4xf32>
    %c2_119 = arith.constant 2 : index
    %c2_120 = arith.constant 2 : index
    %c0_121 = arith.constant 0 : index
    %c0_122 = arith.constant 0 : index
    %112 = vector.load %arg4[%c2_119, %c2_120, %c0_121, %c0_122] : memref<3x3x4x4xf32, #tpu.memory_space<vmem>>, vector<1x1x4x4xf32>
    %113 = vector.shape_cast %112 : vector<1x1x4x4xf32> to vector<4x4xf32>
    %cst_123 = arith.constant dense<0.000000e+00> : vector<16x16x4xf32>
    %114 = tpu.matmul %111, %113, %cst_123 {dimension_numbers = #tpu.dot_dimension_numbers<[2], [0], [0, 1], [1], [0, 0, 0, 1, 1, 1], [], []>} : vector<16x16x4xf32>, vector<4x4xf32>, vector<16x16x4xf32> -> vector<16x16x4xf32>
    %115 = arith.addf %110, %114 : vector<16x16x4xf32>
    %116 = arith.addf %115, %9 : vector<16x16x4xf32>
    %c0_124 = arith.constant 0 : index
    %c0_125 = arith.constant 0 : index
    %c0_126 = arith.constant 0 : index
    %c0_127 = arith.constant 0 : index
    %117 = vector.load %arg6[%c0_124, %c0_125, %c0_126, %c0_127] : memref<1x16x16x4xf32, #tpu.memory_space<vmem>>, vector<1x16x16x4xf32>
    %118 = vector.shape_cast %117 : vector<1x16x16x4xf32> to vector<16x16x4xf32>
    %119 = vector.shape_cast %116 : vector<16x16x4xf32> to vector<1x16x16x4xf32>
    tpu.vector_store %arg6[%c0_124, %c0_125, %c0_126, %c0_127], %119 {strides = array<i32>} : memref<1x16x16x4xf32, #tpu.memory_space<vmem>>, vector<1x16x16x4xf32>,
    return
  }
  func.func @transform_0(%arg0: i32) -> (i32, i32, i32, i32) {
    %c0_i32 = arith.constant 0 : i32
    %c0_i32_0 = arith.constant 0 : i32
    %c0_i32_1 = arith.constant 0 : i32
    %c0_i32_2 = arith.constant 0 : i32
    return %arg0, %c0_i32, %c0_i32_0, %c0_i32_1 : i32, i32, i32, i32
  }
  func.func @transform_1(%arg0: i32) -> (i32, i32, i32, i32) {
    %c0_i32 = arith.constant 0 : i32
    %c0_i32_0 = arith.constant 0 : i32
    %c0_i32_1 = arith.constant 0 : i32
    %c0_i32_2 = arith.constant 0 : i32
    %c0_i32_3 = arith.constant 0 : i32
    return %c0_i32, %c0_i32_0, %c0_i32_1, %c0_i32_2 : i32, i32, i32, i32
  }
  func.func @transform_2(%arg0: i32) -> (i32, i32, i32) {
    %c0_i32 = arith.constant 0 : i32
    %c0_i32_0 = arith.constant 0 : i32
    %c0_i32_1 = arith.constant 0 : i32
    %c0_i32_2 = arith.constant 0 : i32
    return %c0_i32, %c0_i32_0, %c0_i32_1 : i32, i32, i32
  }
  func.func @transform_3(%arg0: i32) -> (i32, i32, i32, i32) {
    %c0_i32 = arith.constant 0 : i32
    %c0_i32_0 = arith.constant 0 : i32
    %c0_i32_1 = arith.constant 0 : i32
    %c0_i32_2 = arith.constant 0 : i32
    %c0_i32_3 = arith.constant 0 : i32
    return %c0_i32, %c0_i32_0, %c0_i32_1, %c0_i32_2 : i32, i32, i32, i32
  }
  func.func @transform_4(%arg0: i32) -> (i32, i32, i32) {
    %c0_i32 = arith.constant 0 : i32
    %c0_i32_0 = arith.constant 0 : i32
    %c0_i32_1 = arith.constant 0 : i32
    %c0_i32_2 = arith.constant 0 : i32
    return %c0_i32, %c0_i32_0, %c0_i32_1 : i32, i32, i32
  }
  func.func @transform_5(%arg0: i32) -> (i32, i32, i32, i32) {
    %c0_i32 = arith.constant 0 : i32
    %c0_i32_0 = arith.constant 0 : i32
    %c0_i32_1 = arith.constant 0 : i32
    %c0_i32_2 = arith.constant 0 : i32
    return %arg0, %c0_i32, %c0_i32_0, %c0_i32_1 : i32, i32, i32, i32
  }
}

</mosaic_0001>

<bundles_post_ra>
// kernel: residual_block_nchw.1
= control target key start
LH: loop header
LB: loop body
LE: loop exit
PB: predicated region body
PF: predicated region fallthrough
CT: control target
= control target key end

     0   :  { %s8372_s18 = smov 0   ;;  %s12096_s0 = inlined_call_operand.vmem [shape: f32[2,16,16,4], index: 0, kind: input, shape index: {}]   ;;  %s12097_s1 = inlined_call_operand.vmem [shape: f32[3,3,4,4], index: 1, kind: input, shape index: {}]   ;;  %s12098_s2 = inlined_call_operand.vmem [shape: f32[1,1,4], index: 2, kind: input, shape index: {}]   ;;  %s12099_s3 = inlined_call_operand.vmem [shape: f32[3,3,4,4], index: 3, kind: input, shape index: {}]   ;;  %s12100_s4 = inlined_call_operand.vmem [shape: f32[1,1,4], index: 4, kind: input, shape index: {}]   ;;  %s12101_s5 = inlined_call_operand.vmem [shape: f32[2,16,16,4], index: 5, kind: output, shape index: {}]  }
   0x1 LB: > { %s6194_s19 = sadd.s32 4294967295, %s8339_s18   ;;  %p6198_p0 = scmp.ge.s32.totalorder %s8339_s18, 1  ;;  %s8339_s18 = sphi %s8372_s18, %s15_s18  }
   0x2   : > { %p187_p1 = scmp.lt.s32.totalorder %s8339_s18, 3 }
   0x4   : > { %p188_p2 = pnand %p6198_p0, %p187_p1 }
   0x6   : > { %191 = sbr.rel (%p188_p2) target bundleno = 1017 (0x3f9), region = 40 }
   0xb   : > { %v391_v0 = vld [vmem:[%s12097_s1] sm:$0xf]  ;;  %vm494_vm0 = vcmask 1043456   ;;  %vm225_vm1 = vcmask 31744   ;;  %vm234_vm2 = vcmask 24576   ;;  %v8341_v1 = vmov 0.0  }
   0xc   : > { %7413 = vmatprep.subr.msk.mxu0 %vm494_vm0, %v391_v0  ;;  %226 = vst.msk [vmem:[#allocation2] sm:$0xff] %vm225_vm1, %v8341_v1  ;;  %227 = vst.msk [vmem:[#allocation2 + $0x8] sm:$0xff] %vm225_vm1, %v8341_v1  ;;  %v6271_v2 = vld [vmem:[%s12097_s1 + $0x8] sm:$0xf]  ;;  %v6237_v3 = vld [vmem:[%s12097_s1 + $0x4] sm:$0xf] }
   0xd   : > { %231 = vst.msk [vmem:[#allocation2 + $0x198] sm:$0xff] %vm225_vm1, %v8341_v1  ;;  %232 = vst.msk [vmem:[#allocation2 + $0x1a0] sm:$0xff] %vm225_vm1, %v8341_v1  ;;  %vm228_vm3 = vcmask 25600   ;;  %7414 = vmatpush3.msk.msra.mxu0 %vm494_vm0, %v391_v0  ;;  %7463 = vmatprep.subr.msk.mxu1 %vm494_vm0, %v6237_v3  ;;  %p215_p3 = scmp.lt.s32.totalorder %s6194_s19, 1  ;;  %v8435_v4 = vld [vmem:[%s12097_s1 + $0xc] sm:$0xf] }
   0xe   : > { %236 = vst.msk [vmem:[#allocation2 + $0x18] sm:$0x1] %vm234_vm2, %v8341_v1  ;;  %237 = vst.msk [vmem:[#allocation2 + $0x30] sm:$0x1] %vm234_vm2, %v8341_v1  ;;  %7513 = vmatprep.subr.msk.mxu0 %vm494_vm0, %v6271_v2  ;;  %7464 = vmatpush3.msk.msra.mxu1 %vm494_vm0, %v6237_v3  ;;  %v8466_v8 = vld [vmem:[%s12097_s1 + $0x10] sm:$0xf] }
   0xf   : > { %238 = vst.msk [vmem:[#allocation2 + $0x48] sm:$0x1] %vm234_vm2, %v8341_v1  ;;  %239 = vst.msk [vmem:[#allocation2 + $0x60] sm:$0x1] %vm234_vm2, %v8341_v1  ;;  %s12900_s19 = smov (!%p215_p3, %s6194_s19), 1  ;;  %7563 = vmatprep.subr.msk.mxu1 %vm494_vm0, %v8435_v4  ;;  %vm741_vm4 = vcmask 1046528  }
  0x10   : > { %240 = vst.msk [vmem:[#allocation2 + $0x78] sm:$0x1] %vm234_vm2, %v8341_v1  ;;  %241 = vst.msk [vmem:[#allocation2 + $0x90] sm:$0x1] %vm234_vm2, %v8341_v1  ;;  %s6817_s28 = sshll.u32 %s12900_s19, 8  ;;  %vm1148_vm5 = vcmask 1045504  }
  0x11   : > { %242 = vst.msk [vmem:[#allocation2 + $0xa8] sm:$0x1] %vm234_vm2, %v8341_v1  ;;  %243 = vst.msk [vmem:[#allocation2 + $0xc0] sm:$0x1] %vm234_vm2, %v8341_v1  ;;  %s8453_s6 = scalar_lea.vmem %s12096_s0, %s6817_s28  ;;  %s11883_s23 = scalar_lea.vmem %s12101_s5, %s6817_s28 }
  0x12   : > { %244 = vst.msk [vmem:[#allocation2 + $0xd8] sm:$0x1] %vm234_vm2, %v8341_v1  ;;  %245 = vst.msk [vmem:[#allocation2 + $0xf0] sm:$0x1] %vm234_vm2, %v8341_v1  ;;  %v8458_v6 = vld [vmem:[%s8453_s6] sm:$0xff]  ;;  %v8461_v7 = vld [vmem:[%s8453_s6 + $0x8] sm:$0xff] }
  0x13   : > { %246 = vst.msk [vmem:[#allocation2 + $0x108] sm:$0x1] %vm234_vm2, %v8341_v1  ;;  %247 = vst.msk [vmem:[#allocation2 + $0x120] sm:$0x1] %vm234_vm2, %v8341_v1  ;;  %v8455_v5 = vld [vmem:[#allocation2 + $0x8] sm:$0xff]  ;;  %v8476_v11 = vld [vmem:[%s8453_s6 + $0x10] sm:$0xff] }
  0x14   : > { %248 = vst.msk [vmem:[#allocation2 + $0x138] sm:$0x1] %vm234_vm2, %v8341_v1  ;;  %249 = vst.msk [vmem:[#allocation2 + $0x150] sm:$0x1] %vm234_vm2, %v8341_v1  ;;  %v743_v10 = vrot.slane %v8455_v5, 1  ;;  %v8479_v12 = vld [vmem:[%s8453_s6 + $0x18] sm:$0xff] }
  0x15   : > { %250 = vst.msk [vmem:[#allocation2 + $0x168] sm:$0x1] %vm234_vm2, %v8341_v1  ;;  %251 = vst.msk [vmem:[#allocation2 + $0x180] sm:$0x1] %vm234_vm2, %v8341_v1  ;;  %v8491_v15 = vld [vmem:[%s8453_s6 + $0x20] sm:$0xff]  ;;  %v8494_v16 = vld [vmem:[%s8453_s6 + $0x28] sm:$0xff] }
  0x16   : > { %254 = vst.msk [vmem:[#allocation2 + $0x29] sm:$0x1] %vm234_vm2, %v8341_v1  ;;  %255 = vst.msk [vmem:[#allocation2 + $0x41] sm:$0x1] %vm234_vm2, %v8341_v1  ;;  %v8504_v18 = vld [vmem:[%s8453_s6 + $0x30] sm:$0xff]  ;;  %v8507_v19 = vld [vmem:[%s8453_s6 + $0x38] sm:$0xff] }
  0x17   : > { %256 = vst.msk [vmem:[#allocation2 + $0x59] sm:$0x1] %vm234_vm2, %v8341_v1  ;;  %257 = vst.msk [vmem:[#allocation2 + $0x71] sm:$0x1] %vm234_vm2, %v8341_v1  ;;  %v8510_v20 = vld [vmem:[%s8453_s6 + $0x40] sm:$0xff]  ;;  %v8521_v22 = vld [vmem:[%s8453_s6 + $0x48] sm:$0xff] }
  0x18   : > { %258 = vst.msk [vmem:[#allocation2 + $0x89] sm:$0x1] %vm234_vm2, %v8341_v1  ;;  %259 = vst.msk [vmem:[#allocation2 + $0xa1] sm:$0x1] %vm234_vm2, %v8341_v1  ;;  %v8524_v23 = vld [vmem:[%s8453_s6 + $0x50] sm:$0xff]  ;;  %v8527_v24 = vld [vmem:[%s8453_s6 + $0x58] sm:$0xff] }
  0x19   : > { %260 = vst.msk [vmem:[#allocation2 + $0xb9] sm:$0x1] %vm234_vm2, %v8341_v1  ;;  %261 = vst.msk [vmem:[#allocation2 + $0xd1] sm:$0x1] %vm234_vm2, %v8341_v1  ;;  %v8538_v26 = vld [vmem:[%s8453_s6 + $0x60] sm:$0xff]  ;;  %v8541_v27 = vld [vmem:[%s8453_s6 + $0x68] sm:$0xff] }
  0x1a   : > { %262 = vst.msk [vmem:[#allocation2 + $0xe9] sm:$0x1] %vm234_vm2, %v8341_v1  ;;  %263 = vst.msk [vmem:[#allocation2 + $0x101] sm:$0x1] %vm234_vm2, %v8341_v1  ;;  %v8544_v28 = vld [vmem:[%s8453_s6 + $0x70] sm:$0xff]  ;;  %v8556_v29 = vld [vmem:[%s8453_s6 + $0x78] sm:$0xff] }
  0x1b   : > { %264 = vst.msk [vmem:[#allocation2 + $0x119] sm:$0x1] %vm234_vm2, %v8341_v1  ;;  %265 = vst.msk [vmem:[#allocation2 + $0x131] sm:$0x1] %vm234_vm2, %v8341_v1  ;;  %v8559_v30 = vld [vmem:[%s8453_s6 + $0x80] sm:$0xff]  ;;  %v8562_v31 = vld [vmem:[%s8453_s6 + $0x88] sm:$0xff] }
  0x1c   : > { %266 = vst.msk [vmem:[#allocation2 + $0x149] sm:$0x1] %vm234_vm2, %v8341_v1  ;;  %267 = vst.msk [vmem:[#allocation2 + $0x161] sm:$0x1] %vm234_vm2, %v8341_v1  ;;  %v8571_v32 = vld [vmem:[%s8453_s6 + $0x90] sm:$0xff]  ;;  %v8574_v33 = vld [vmem:[%s8453_s6 + $0x98] sm:$0xff] }
  0x1d   : > { %268 = vst.msk [vmem:[#allocation2 + $0x179] sm:$0x1] %vm234_vm2, %v8341_v1  ;;  %269 = vst.msk [vmem:[#allocation2 + $0x191] sm:$0x1] %vm234_vm2, %v8341_v1  ;;  %v8577_v34 = vld [vmem:[%s8453_s6 + $0xa0] sm:$0xff]  ;;  %v8603_v43 = vld [vmem:[%s8453_s6 + $0xa8] sm:$0xff] }
  0x1e   : > { %235 = vst.msk [vmem:[#allocation2] sm:$0x1] %vm234_vm2, %v8341_v1  ;;  %252 = vst.msk [vmem:[#allocation2 + $0x198] sm:$0x1] %vm234_vm2, %v8341_v1 }
  0x1f   : > { %229 = vst.msk [vmem:[#allocation2 + $0x10] sm:$0x3] %vm228_vm3, %v8341_v1  ;;  %233 = vst.msk [vmem:[#allocation2 + $0x1a8] sm:$0x3] %vm228_vm3, %v8341_v1 }
  0x20   : > { %253 = vst.msk [vmem:[#allocation2 + $0x11] sm:$0x1] %vm234_vm2, %v8341_v1  ;;  %270 = vst.msk [vmem:[#allocation2 + $0x1a9] sm:$0x1] %vm234_vm2, %v8341_v1 }
  0x21   : > { %12297 = vst [vmem:[#allocation3_spill] sm:$0xff] %v8458_v6  ;;  %12298 = vst [vmem:[#allocation4_spill] sm:$0xff] %v8461_v7 }
  0x22   : > { %304 = vst.msk [vmem:[#allocation2 + $0x19] sm:$0xff] %vm225_vm1, %v8458_v6  ;;  %305 = vst.msk [vmem:[#allocation2 + $0x21] sm:$0xff] %vm225_vm1, %v8461_v7 }
  0x23   : > { %12299 = vst [vmem:[#allocation5_spill] sm:$0xff] %v8476_v11  ;;  %12300 = vst [vmem:[#allocation6_spill] sm:$0xff] %v8479_v12 }
  0x24   : > { %306 = vst.msk [vmem:[#allocation2 + $0x31] sm:$0xff] %vm225_vm1, %v8476_v11  ;;  %307 = vst.msk [vmem:[#allocation2 + $0x39] sm:$0xff] %vm225_vm1, %v8479_v12 }
  0x25   : > { %v8468_v9 = vld [vmem:[#allocation2] sm:$0xff]  ;;  %12301 = vst [vmem:[#allocation7_spill] sm:$0xff] %v8491_v15  ;;  %12302 = vst [vmem:[#allocation8_spill] sm:$0xff] %v8494_v16 }
  0x26   : > { %7415 = vmatprep.mubr.msk.f32.mxu0 %vm225_vm1, %v8468_v9  ;;  %v742_v13 = vrot.slane %v8468_v9, 1  ;;  %308 = vst.msk [vmem:[#allocation2 + $0x49] sm:$0xff] %vm225_vm1, %v8491_v15  ;;  %309 = vst.msk [vmem:[#allocation2 + $0x51] sm:$0xff] %vm225_vm1, %v8494_v16 }
  0x27   : > { %v8484_v14 = vld [vmem:[#allocation2 + $0x10] sm:$0x3]  ;;  %7416 = vmatmul.mubr.msk.f32.vlgmr.msra.gmra.mxu0 %vm225_vm1, %v8455_v5  ;;  %12303 = vst [vmem:[#allocation9_spill] sm:$0xff] %v8504_v18  ;;  %12304 = vst [vmem:[#allocation10_spill] sm:$0xff] %v8507_v19 }
  0x28   : > { %v745_v17 = vrot.slane %v8484_v14, 1  ;;  %12305 = vst [vmem:[#allocation11_spill] sm:$0xff] %v8510_v20  ;;  %7514 = vmatpush3.msk.msra.mxu0 %vm494_vm0, %v6271_v2  ;;  %v744_v21 = vsel %vm741_vm4, %v742_v13, %v743_v10  ;;  %310 = vst.msk [vmem:[#allocation2 + $0x61] sm:$0xff] %vm225_vm1, %v8504_v18 }
  0x29   : > { %311 = vst.msk [vmem:[#allocation2 + $0x69] sm:$0xff] %vm225_vm1, %v8507_v19  ;;  %312 = vst.msk [vmem:[#allocation2 + $0x79] sm:$0xff] %vm225_vm1, %v8510_v20  ;;  %7465 = vmatprep.mubr.msk.f32.mxu1 %vm225_vm1, %v744_v21  ;;  %7613 = vmatprep.subr.msk.mxu0 %vm494_vm0, %v8466_v8  ;;  %v8581_v35 = vld [vmem:[#allocation2 + $0x18] sm:$0xff]  ;;  %v8583_v36 = vld [vmem:[#allocation2 + $0x20] sm:$0xff] }
  0x2a   : > { %12306 = vst [vmem:[#allocation12_spill] sm:$0xff] %v8521_v22  ;;  %12307 = vst [vmem:[#allocation13_spill] sm:$0xff] %v8524_v23  ;;  %v746_v25 = vsel %vm741_vm4, %v743_v10, %v745_v17  ;;  %v8585_v37 = vld [vmem:[#allocation2 + $0x28] sm:$0x3]  ;;  %7418 = vmatprep.mubr.msk.f32.mxu0 %vm225_vm1, %v8581_v35  ;;  %v747_v38 = vrot.slane %v8581_v35, 1  ;;  %v748_v39 = vrot.slane %v8583_v36, 1 }
  0x2b   : > { %12308 = vst [vmem:[#allocation14_spill] sm:$0xff] %v8527_v24  ;;  %313 = vst.msk [vmem:[#allocation2 + $0x81] sm:$0xff] %vm225_vm1, %v8521_v22  ;;  %7466 = vmatmul.mubr.msk.f32.vlgmr.msra.gmra.mxu1 %vm225_vm1, %v746_v25  ;;  %v8597_v40 = vld [vmem:[#allocation2 + $0x30] sm:$0xff]  ;;  %v750_v41 = vrot.slane %v8585_v37, 1  ;;  %v8600_v42 = vld [vmem:[#allocation2 + $0x38] sm:$0xff]  ;;  %7419 = vmatmul.mubr.msk.f32.gmra.mxu0 %vm225_vm1, %v8583_v36 }
  0x2c   : > { %314 = vst.msk [vmem:[#allocation2 + $0x91] sm:$0xff] %vm225_vm1, %v8524_v23  ;;  %315 = vst.msk [vmem:[#allocation2 + $0x99] sm:$0xff] %vm225_vm1, %v8527_v24  ;;  %7564 = vmatpush3.msk.msra.mxu1 %vm494_vm0, %v8435_v4  ;;  %v752_v44 = vrot.slane %v8597_v40, 1  ;;  %v753_v45 = vrot.slane %v8600_v42, 1  ;;  %v8611_v47 = vld [vmem:[#allocation2 + $0x40] sm:$0x3]  ;;  %v8618_v49 = vsel %vm741_vm4, %v747_v38, %v748_v39  ;;  %7421 = vmatprep.mubr.msk.f32.mxu0 %vm225_vm1, %v8597_v40 }
  0x2d   : > { %12309 = vst [vmem:[#allocation15_spill] sm:$0xff] %v8538_v26  ;;  %12310 = vst [vmem:[#allocation16_spill] sm:$0xff] %v8541_v27  ;;  %v8609_v46 = vld [vmem:[#allocation2 + $0x48] sm:$0xff]  ;;  %v8613_v48 = vld [vmem:[#allocation2 + $0x50] sm:$0xff]  ;;  %v8623_v50 = vsel %vm741_vm4, %v748_v39, %v750_v41  ;;  %v755_v51 = vrot.slane %v8611_v47, 1  ;;  %7468 = vmatprep.mubr.msk.f32.mxu1 %vm225_vm1, %v8618_v49 }
  0x2e   : > { %12311 = vst [vmem:[#allocation17_spill] sm:$0xff] %v8544_v28  ;;  %316 = vst.msk [vmem:[#allocation2 + $0xa9] sm:$0xff] %vm225_vm1, %v8538_v26  ;;  %v757_v52 = vrot.slane %v8609_v46, 1  ;;  %v8627_v53 = vld [vmem:[#allocation2 + $0x58] sm:$0x3]  ;;  %v8632_v54 = vsel %vm741_vm4, %v752_v44, %v753_v45  ;;  %v758_v55 = vrot.slane %v8613_v48, 1 }
  0x2f   : > { %317 = vst.msk [vmem:[#allocation2 + $0xb1] sm:$0xff] %vm225_vm1, %v8541_v27  ;;  %318 = vst.msk [vmem:[#allocation2 + $0xc1] sm:$0xff] %vm225_vm1, %v8544_v28  ;;  %v8635_v56 = vld [vmem:[#allocation2 + $0x60] sm:$0xff]  ;;  %7469 = vmatmul.mubr.msk.f32.gmra.mxu1 %vm225_vm1, %v8623_v50  ;;  %7422 = vmatmul.mubr.msk.f32.gmra.mxu0 %vm225_vm1, %v8600_v42  ;;  %v8646_v58 = vsel %vm741_vm4, %v753_v45, %v755_v51  ;;  %v760_v59 = vrot.slane %v8627_v53, 1  ;;  %v8686_v38 = vld [vmem:[%s8453_s6 + $0xb0] sm:$0xff] }
  0x30   : > { %12312 = vst [vmem:[#allocation18_spill] sm:$0xff] %v8556_v29  ;;  %12313 = vst [vmem:[#allocation19_spill] sm:$0xff] %v8559_v30  ;;  %v8637_v57 = vld [vmem:[#allocation2 + $0x68] sm:$0xff]  ;;  %7471 = vmatprep.mubr.msk.f32.mxu1 %vm225_vm1, %v8632_v54  ;;  %7424 = vmatprep.mubr.msk.f32.mxu0 %vm225_vm1, %v8609_v46  ;;  %v8652_v60 = vsel %vm741_vm4, %v757_v52, %v758_v55  ;;  %v762_v61 = vrot.slane %v8635_v56, 1  ;;  %v8656_v63 = vld [vmem:[#allocation2 + $0x70] sm:$0x3] }
  0x31   : > { %12314 = vst [vmem:[#allocation20_spill] sm:$0xff] %v8562_v31  ;;  %319 = vst.msk [vmem:[#allocation2 + $0xc9] sm:$0xff] %vm225_vm1, %v8556_v29  ;;  %v763_v62 = vrot.slane %v8637_v57, 1  ;;  %v8658_v0 = vld [vmem:[#allocation2 + $0x78] sm:$0xff]  ;;  %v8669_v2 = vsel %vm741_vm4, %v758_v55, %v760_v59  ;;  %v765_v3 = vrot.slane %v8656_v63, 1  ;;  %v8698_v41 = vld [vmem:[%s8453_s6 + $0xc0] sm:$0xff] }
  0x32   : > { %320 = vst.msk [vmem:[#allocation2 + $0xd9] sm:$0xff] %vm225_vm1, %v8559_v30  ;;  %321 = vst.msk [vmem:[#allocation2 + $0xe1] sm:$0xff] %vm225_vm1, %v8562_v31  ;;  %v8660_v1 = vld [vmem:[#allocation2 + $0x80] sm:$0xff]  ;;  %v767_v10 = vrot.slane %v8658_v0, 1  ;;  %v8681_v21 = vld [vmem:[#allocation2 + $0x88] sm:$0x3] }
  0x33   : > { %12315 = vst [vmem:[#allocation21_spill] sm:$0xff] %v8571_v32  ;;  %12316 = vst [vmem:[#allocation22_spill] sm:$0xff] %v8574_v33  ;;  %7472 = vmatmul.mubr.msk.f32.gmra.mxu1 %vm225_vm1, %v8646_v58  ;;  %7425 = vmatmul.mubr.msk.f32.gmra.mxu0 %vm225_vm1, %v8613_v48  ;;  %v8675_v4 = vsel %vm741_vm4, %v762_v61, %v763_v62  ;;  %v768_v13 = vrot.slane %v8660_v1, 1  ;;  %v8679_v17 = vld [vmem:[#allocation2 + $0x90] sm:$0xff]  ;;  %v8683_v25 = vld [vmem:[#allocation2 + $0x98] sm:$0xff]  ;;  %v8711_v51 = vsel %vm741_vm4, %v763_v62, %v765_v3 }
  0x34   : > { %12317 = vst [vmem:[#allocation23_spill] sm:$0xff] %v8577_v34  ;;  %322 = vst.msk [vmem:[#allocation2 + $0xf1] sm:$0xff] %vm225_vm1, %v8571_v32  ;;  %7474 = vmatprep.mubr.msk.f32.mxu1 %vm225_vm1, %v8652_v60  ;;  %7427 = vmatprep.mubr.msk.f32.mxu0 %vm225_vm1, %v8635_v56  ;;  %v8689_v39 = vld [vmem:[%s8453_s6 + $0xb8] sm:$0xff]  ;;  %v8701_v44 = vld [vmem:[%s8453_s6 + $0xc8] sm:$0xff]  ;;  %v770_v52 = vrot.slane %v8681_v21, 1  ;;  %v772_v55 = vrot.slane %v8679_v17, 1 }
  0x35   : > { %323 = vst.msk [vmem:[#allocation2 + $0xf9] sm:$0xff] %vm225_vm1, %v8574_v33  ;;  %324 = vst.msk [vmem:[#allocation2 + $0x109] sm:$0xff] %vm225_vm1, %v8577_v34  ;;  %v8704_v45 = vld [vmem:[%s8453_s6 + $0xd0] sm:$0xff]  ;;  %v8722_v59 = vld [vmem:[%s8453_s6 + $0xd8] sm:$0xff]  ;;  %v8733_v3 = vsel %vm741_vm4, %v767_v10, %v768_v13 }
  0x36   : > { %12318 = vst [vmem:[#allocation24_spill] sm:$0xff] %v8603_v43  ;;  %325 = vst.msk [vmem:[#allocation2 + $0x111] sm:$0xff] %vm225_vm1, %v8603_v43  ;;  %v8725_v61 = vld [vmem:[%s8453_s6 + $0xe0] sm:$0xff]  ;;  %v8728_v62 = vld [vmem:[%s8453_s6 + $0xe8] sm:$0xff] }
  0x37   : > { %12319 = vst [vmem:[#allocation25_spill] sm:$0xff] %v8632_v54  ;;  %12320 = vst [vmem:[#allocation26_spill] sm:$0xff] %v8646_v58  ;;  %7475 = vmatmul.mubr.msk.f32.gmra.mxu1 %vm225_vm1, %v8669_v2  ;;  %7428 = vmatmul.mubr.msk.f32.gmra.mxu0 %vm225_vm1, %v8637_v57  ;;  %v8750_v10 = vld [vmem:[%s8453_s6 + $0xf0] sm:$0xff]  ;;  %v8782_v43 = vld [vmem:[#allocation2 + $0xb8] sm:$0x3]  ;;  %v1149_v58 = vrot.slane %v8468_v9, 2 }
  0x38   : > { %12321 = vst [vmem:[#allocation27_spill] sm:$0xff] %v8652_v60  ;;  %12322 = vst [vmem:[#allocation28_spill] sm:$0xff] %v8669_v2  ;;  %7477 = vmatprep.mubr.msk.f32.mxu1 %vm225_vm1, %v8675_v4  ;;  %7430 = vmatprep.mubr.msk.f32.mxu0 %vm225_vm1, %v8658_v0  ;;  %v8784_v32 = vld [vmem:[#allocation2 + $0xc0] sm:$0xff]  ;;  %v8786_v33 = vld [vmem:[#allocation2 + $0xc8] sm:$0xff]  ;;  %v1155_v54 = vrot.slane %v8583_v36, 2 }
  0x39   : > { %12323 = vst [vmem:[#allocation29_spill] sm:$0xff] %v8675_v4  ;;  %12324 = vst [vmem:[#allocation30_spill] sm:$0xff] %v8683_v25  ;;  %v782_v30 = vrot.slane %v8784_v32, 1  ;;  %v783_v31 = vrot.slane %v8786_v33, 1  ;;  %v8805_v28 = vld [vmem:[#allocation2 + $0xd0] sm:$0x3] }
  0x3a   : > { %12325 = vst [vmem:[#allocation31_spill] sm:$0xff] %v8686_v38  ;;  %12326 = vst [vmem:[#allocation32_spill] sm:$0xff] %v8689_v39  ;;  %v8807_v29 = vld [vmem:[#allocation2 + $0xd8] sm:$0xff]  ;;  %v8809_v26 = vld [vmem:[#allocation2 + $0xe0] sm:$0xff] }
  0x3b   : > { %326 = vst.msk [vmem:[#allocation2 + $0x121] sm:$0xff] %vm225_vm1, %v8686_v38  ;;  %327 = vst.msk [vmem:[#allocation2 + $0x129] sm:$0xff] %vm225_vm1, %v8689_v39  ;;  %v8736_v38 = vld [vmem:[#allocation2 + $0xa0] sm:$0x3]  ;;  %v8754_v39 = vld [vmem:[#allocation2 + $0xb0] sm:$0xff]  ;;  %7478 = vmatmul.mubr.msk.f32.gmra.mxu1 %vm225_vm1, %v8711_v51  ;;  %7431 = vmatmul.mubr.msk.f32.gmra.mxu0 %vm225_vm1, %v8660_v1  ;;  %v787_v27 = vrot.slane %v8807_v29, 1 }
  0x3c   : > { %12327 = vst [vmem:[#allocation33_spill] sm:$0xff] %v8698_v41  ;;  %12328 = vst [vmem:[#allocation34_spill] sm:$0xff] %v8701_v44  ;;  %7480 = vmatprep.mubr.msk.f32.mxu1 %vm225_vm1, %v8733_v3  ;;  %7433 = vmatprep.mubr.msk.f32.mxu0 %vm225_vm1, %v8679_v17  ;;  %v788_v23 = vrot.slane %v8809_v26, 1  ;;  %v8828_v24 = vld [vmem:[#allocation2 + $0xe8] sm:$0x3]  ;;  %v8830_v20 = vld [vmem:[#allocation2 + $0xf0] sm:$0xff] }
  0x3d   : > { %12329 = vst [vmem:[#allocation35_spill] sm:$0xff] %v8704_v45  ;;  %12330 = vst [vmem:[#allocation36_spill] sm:$0xff] %v8711_v51  ;;  %v8832_v22 = vld [vmem:[#allocation2 + $0xf8] sm:$0xff]  ;;  %v792_v18 = vrot.slane %v8830_v20, 1  ;;  %v8851_v15 = vld [vmem:[#allocation2 + $0x100] sm:$0x3] }
  0x3e   : > { %328 = vst.msk [vmem:[#allocation2 + $0x139] sm:$0xff] %vm225_vm1, %v8698_v41  ;;  %329 = vst.msk [vmem:[#allocation2 + $0x141] sm:$0xff] %vm225_vm1, %v8701_v44  ;;  %v773_v41 = vrot.slane %v8683_v25, 1  ;;  %v8752_v44 = vld [vmem:[#allocation2 + $0xa8] sm:$0xff]  ;;  %v793_v19 = vrot.slane %v8832_v22, 1  ;;  %v8855_v11 = vld [vmem:[#allocation2 + $0x110] sm:$0xff] }
  0x3f   : > { %330 = vst.msk [vmem:[#allocation2 + $0x151] sm:$0xff] %vm225_vm1, %v8704_v45  ;;  %12331 = vst [vmem:[#allocation37_spill] sm:$0xff] %v8722_v59  ;;  %v8747_v45 = vld [vmem:[%s12097_s1 + $0x14] sm:$0xf]  ;;  %v777_v34 = vrot.slane %v8752_v44, 1  ;;  %7434 = vmatmul.mubr.msk.f32.gmra.mxu0 %vm225_vm1, %v8683_v25  ;;  %v8853_v16 = vld [vmem:[#allocation2 + $0x108] sm:$0xff] }
  0x40   : > { %12332 = vst [vmem:[#allocation38_spill] sm:$0xff] %v8725_v61  ;;  %12333 = vst [vmem:[#allocation39_spill] sm:$0xff] %v8728_v62  ;;  %7663 = vmatprep.subr.msk.mxu1 %vm494_vm0, %v8747_v45  ;;  %7436 = vmatprep.mubr.msk.f32.mxu0 %vm225_vm1, %v8752_v44  ;;  %v797_v12 = vrot.slane %v8853_v16, 1  ;;  %v798_v6 = vrot.slane %v8855_v11, 1  ;;  %v8874_v7 = vld [vmem:[#allocation2 + $0x118] sm:$0x3] }
  0x41   : > { %12334 = vst [vmem:[#allocation40_spill] sm:$0xff] %v8733_v3  ;;  %331 = vst.msk [vmem:[#allocation2 + $0x159] sm:$0xff] %vm225_vm1, %v8722_v59  ;;  %v775_v59 = vrot.slane %v8736_v38, 1 }
  0x42   : > { %332 = vst.msk [vmem:[#allocation2 + $0x169] sm:$0xff] %vm225_vm1, %v8725_v61  ;;  %333 = vst.msk [vmem:[#allocation2 + $0x171] sm:$0xff] %vm225_vm1, %v8728_v62  ;;  %v8761_v61 = vld [vmem:[%s8453_s6 + $0xf8] sm:$0xff]  ;;  %v8772_v62 = vsel %vm741_vm4, %v768_v13, %v770_v52  ;;  %v780_v52 = vrot.slane %v8782_v43, 1 }
  0x43   : > { %12335 = vst [vmem:[#allocation41_spill] sm:$0xff] %v8750_v10  ;;  %12336 = vst [vmem:[#allocation42_spill] sm:$0xff] %v8754_v39  ;;  %7481 = vmatmul.mubr.msk.f32.gmra.mxu1 %vm225_vm1, %v8772_v62  ;;  %v8795_v13 = vsel %vm741_vm4, %v773_v41, %v775_v59  ;;  %7437 = vmatmul.mubr.msk.f32.gmra.mxu0 %vm225_vm1, %v8754_v39  ;;  %v8824_v59 = vsel %vm741_vm4, %v782_v30, %v783_v31 }
  0x44   : > { %334 = vst.msk [vmem:[#allocation2 + $0x181] sm:$0xff] %vm225_vm1, %v8750_v10  ;;  %12337 = vst [vmem:[#allocation43_spill] sm:$0xff] %v8761_v61  ;;  %v8778_v10 = vsel %vm741_vm4, %v772_v55, %v773_v41  ;;  %v785_v41 = vrot.slane %v8805_v28, 1  ;;  %7439 = vmatprep.mubr.msk.f32.mxu0 %vm225_vm1, %v8784_v32 }
  0x45   : > { %335 = vst.msk [vmem:[#allocation2 + $0x189] sm:$0xff] %vm225_vm1, %v8761_v61  ;;  %12338 = vst [vmem:[#allocation44_spill] sm:$0xff] %v8772_v62  ;;  %v778_v61 = vrot.slane %v8754_v39, 1  ;;  %7483 = vmatprep.mubr.msk.f32.mxu1 %vm225_vm1, %v8778_v10 }
  0x46   : > { %12339 = vst [vmem:[#allocation45_spill] sm:$0xff] %v8778_v10  ;;  %12340 = vst [vmem:[#allocation46_spill] sm:$0xff] %v8786_v33  ;;  %v8841_v30 = vsel %vm741_vm4, %v783_v31, %v785_v41  ;;  %v795_v31 = vrot.slane %v8851_v15, 1  ;;  %v8870_v41 = vsel %vm741_vm4, %v792_v18, %v793_v19  ;;  %v8920_v10 = vld [vmem:[#allocation2 + $0x148] sm:$0x3]  ;;  %v8922_v62 = vld [vmem:[#allocation2 + $0x150] sm:$0xff] }
  0x47   : > { %12341 = vst [vmem:[#allocation47_spill] sm:$0xff] %v8795_v13  ;;  %v8801_v55 = vsel %vm741_vm4, %v777_v34, %v778_v61  ;;  %12343 = vst [vmem:[#allocation49_spill] sm:$0xff] %v8809_v26  ;;  %7484 = vmatmul.mubr.msk.f32.gmra.mxu1 %vm225_vm1, %v8795_v13  ;;  %v8818_v34 = vsel %vm741_vm4, %v778_v61, %v780_v52  ;;  %7440 = vmatmul.mubr.msk.f32.gmra.mxu0 %vm225_vm1, %v8786_v33  ;;  %v790_v61 = vrot.slane %v8828_v24, 1 }
  0x48   : > { %12342 = vst [vmem:[#allocation48_spill] sm:$0xff] %v8801_v55  ;;  %7486 = vmatprep.mubr.msk.f32.mxu1 %vm225_vm1, %v8801_v55  ;;  %12344 = vst [vmem:[#allocation50_spill] sm:$0xff] %v8818_v34  ;;  %7442 = vmatprep.mubr.msk.f32.mxu0 %vm225_vm1, %v8807_v29  ;;  %v8847_v52 = vsel %vm741_vm4, %v787_v27, %v788_v23  ;;  %v8887_v18 = vsel %vm741_vm4, %v793_v19, %v795_v31  ;;  %v8899_v55 = vld [vmem:[#allocation2 + $0x138] sm:$0xff]  ;;  %v812_v3 = vrot.slane %v8922_v62, 1  ;;  %v8943_v51 = vld [vmem:[#allocation2 + $0x160] sm:$0x3] }
  0x49   : > { %12345 = vst [vmem:[#allocation51_spill] sm:$0xff] %v8824_v59  ;;  %12346 = vst [vmem:[#allocation52_spill] sm:$0xff] %v8832_v22  ;;  %v8864_v27 = vsel %vm741_vm4, %v788_v23, %v790_v61  ;;  %v800_v23 = vrot.slane %v8874_v7, 1  ;;  %v8893_v61 = vsel %vm741_vm4, %v797_v12, %v798_v6  ;;  %v807_v13 = vrot.slane %v8899_v55, 1  ;;  %v8945_v4 = vld [vmem:[#allocation2 + $0x168] sm:$0xff] }
  0x4a   : > { %12347 = vst [vmem:[#allocation53_spill] sm:$0xff] %v8841_v30  ;;  %12348 = vst [vmem:[#allocation54_spill] sm:$0xff] %v8847_v52  ;;  %v817_v2 = vrot.slane %v8945_v4, 1  ;;  %v8966_v60 = vld [vmem:[#allocation2 + $0x178] sm:$0x3] }
  0x4b   : > { %7487 = vmatmul.mubr.msk.f32.gmra.mxu1 %vm225_vm1, %v8818_v34  ;;  %12349 = vst [vmem:[#allocation55_spill] sm:$0xff] %v8855_v11  ;;  %7443 = vmatmul.mubr.msk.f32.gmra.mxu0 %vm225_vm1, %v8809_v26  ;;  %12350 = vst [vmem:[#allocation56_spill] sm:$0xff] %v8864_v27  ;;  %v8897_v34 = vld [vmem:[#allocation2 + $0x130] sm:$0x3]  ;;  %v8910_v12 = vsel %vm741_vm4, %v798_v6, %v800_v23 }
  0x4c   : > { %7489 = vmatprep.mubr.msk.f32.mxu1 %vm225_vm1, %v8824_v59  ;;  %7445 = vmatprep.mubr.msk.f32.mxu0 %vm225_vm1, %v8830_v20  ;;  %12351 = vst [vmem:[#allocation57_spill] sm:$0xff] %v8870_v41  ;;  %12353 = vst [vmem:[#allocation59_spill] sm:$0xff] %v8887_v18  ;;  %v805_v19 = vrot.slane %v8897_v34, 1 }
  0x4d   : > { %12354 = vst [vmem:[#allocation60_spill] sm:$0xff] %v8893_v61  ;;  %12355 = vst [vmem:[#allocation61_spill] sm:$0xff] %v8910_v12 }
  0x4f   : > { %7490 = vmatmul.mubr.msk.f32.gmra.mxu1 %vm225_vm1, %v8841_v30  ;;  %v8876_v30 = vld [vmem:[#allocation2 + $0x120] sm:$0xff]  ;;  %7446 = vmatmul.mubr.msk.f32.gmra.mxu0 %vm225_vm1, %v8832_v22 }
  0x50   : > { %7492 = vmatprep.mubr.msk.f32.mxu1 %vm225_vm1, %v8847_v52  ;;  %v8878_v52 = vld [vmem:[#allocation2 + $0x128] sm:$0xff]  ;;  %7448 = vmatprep.mubr.msk.f32.mxu0 %vm225_vm1, %v8853_v16  ;;  %v802_v59 = vrot.slane %v8876_v30, 1 }
  0x51   : > { %12352 = vst [vmem:[#allocation58_spill] sm:$0xff] %v8878_v52 }
  0x53   : > { %7493 = vmatmul.mubr.msk.f32.gmra.mxu1 %vm225_vm1, %v8864_v27  ;;  %v803_v27 = vrot.slane %v8878_v52, 1  ;;  %7449 = vmatmul.mubr.msk.f32.gmra.mxu0 %vm225_vm1, %v8855_v11 }
  0x54   : > { %7495 = vmatprep.mubr.msk.f32.mxu1 %vm225_vm1, %v8870_v41  ;;  %v8901_v41 = vld [vmem:[#allocation2 + $0x140] sm:$0xff]  ;;  %7451 = vmatprep.mubr.msk.f32.mxu0 %vm225_vm1, %v8876_v30 }
  0x55   : > { %v8916_v31 = vsel %vm741_vm4, %v802_v59, %v803_v27  ;;  %v8933_v6 = vsel %vm741_vm4, %v803_v27, %v805_v19  ;;  %v810_v59 = vrot.slane %v8920_v10, 1  ;;  %v815_v27 = vrot.slane %v8943_v51, 1 }
  0x56   : > { %12356 = vst [vmem:[#allocation62_spill] sm:$0xff] %v8916_v31  ;;  %12357 = vst [vmem:[#allocation63_spill] sm:$0xff] %v8933_v6 }
  0x57   : > { %7496 = vmatmul.mubr.msk.f32.gmra.mxu1 %vm225_vm1, %v8887_v18  ;;  %v808_v18 = vrot.slane %v8901_v41, 1  ;;  %7452 = vmatmul.mubr.msk.f32.gmra.mxu0 %vm225_vm1, %v8878_v52 }
  0x58   : > { %7498 = vmatprep.mubr.msk.f32.mxu1 %vm225_vm1, %v8893_v61  ;;  %v8924_v61 = vld [vmem:[#allocation2 + $0x158] sm:$0xff]  ;;  %7454 = vmatprep.mubr.msk.f32.mxu0 %vm225_vm1, %v8899_v55 }
  0x59   : > { %v8939_v23 = vsel %vm741_vm4, %v807_v13, %v808_v18  ;;  %v8956_v13 = vsel %vm741_vm4, %v808_v18, %v810_v59  ;;  %v820_v18 = vrot.slane %v8966_v60, 1  ;;  %v1152_v59 = vrot.slane %v8484_v14, 2 }
  0x5a   : > { %12358 = vst [vmem:[#allocation64_spill] sm:$0xff] %v8939_v23  ;;  %12359 = vst [vmem:[#allocation65_spill] sm:$0xff] %v8956_v13 }
  0x5b   : > { %7499 = vmatmul.mubr.msk.f32.gmra.mxu1 %vm225_vm1, %v8910_v12  ;;  %v813_v12 = vrot.slane %v8924_v61, 1  ;;  %7455 = vmatmul.mubr.msk.f32.gmra.mxu0 %vm225_vm1, %v8901_v41 }
  0x5c   : > { %7501 = vmatprep.mubr.msk.f32.mxu1 %vm225_vm1, %v8916_v31  ;;  %v8947_v31 = vld [vmem:[#allocation2 + $0x170] sm:$0xff]  ;;  %7457 = vmatprep.mubr.msk.f32.mxu0 %vm225_vm1, %v8922_v62 }
  0x5d   : > { %v8962_v19 = vsel %vm741_vm4, %v812_v3, %v813_v12  ;;  %v8977_v3 = vsel %vm741_vm4, %v813_v12, %v815_v27  ;;  %v1159_v27 = vrot.slane %v8597_v40, 2 }
  0x5e   : > { %12360 = vst [vmem:[#allocation66_spill] sm:$0xff] %v8977_v3 }
  0x5f   : > { %7502 = vmatmul.mubr.msk.f32.gmra.mxu1 %vm225_vm1, %v8933_v6  ;;  %v818_v6 = vrot.slane %v8947_v31, 1  ;;  %7458 = vmatmul.mubr.msk.f32.gmra.mxu0 %vm225_vm1, %v8924_v61 }
  0x60   : > { %7504 = vmatprep.mubr.msk.f32.mxu1 %vm225_vm1, %v8939_v23  ;;  %v1150_v23 = vrot.slane %v8455_v5, 2  ;;  %7460 = vmatprep.mubr.msk.f32.mxu0 %vm225_vm1, %v8945_v4 }
  0x61   : > { %v8984_v5 = vsel %vm741_vm4, %v817_v2, %v818_v6  ;;  %v8996_v14 = vsel %vm741_vm4, %v818_v6, %v820_v18  ;;  %v1157_v2 = vrot.slane %v8585_v37, 2  ;;  %v9011_v6 = vld [vmem:[%s12097_s1 + $0x18] sm:$0xf]  ;;  %v1164_v18 = vrot.slane %v8609_v46, 2 }
  0x62   : > { %v1151_v9 = vsel %vm1148_vm5, %v1149_v58, %v1150_v23  ;;  %v1153_v58 = vsel %vm1148_vm5, %v1150_v23, %v1152_v59  ;;  %v1162_v23 = vrot.slane %v8611_v47, 2  ;;  %v1165_v59 = vrot.slane %v8613_v48, 2 }
  0x63   : > { %7505 = vmatmul.mubr.msk.f32.gmra.mxu1 %vm225_vm1, %v8956_v13  ;;  %v1154_v13 = vrot.slane %v8581_v35, 2  ;;  %7461 = vmatmul.mubr.msk.f32.gmra.mxu0 %vm225_vm1, %v8947_v31  ;;  %v9021_v37 = vsel %vm1148_vm5, %v1155_v54, %v1157_v2  ;;  %v1167_v47 = vrot.slane %v8627_v53, 2  ;;  %v1175_v2 = vrot.slane %v8660_v1, 2 }
  0x64   : > { %7507 = vmatprep.mubr.msk.f32.mxu1 %vm225_vm1, %v8962_v19  ;;  %7515 = vmatprep.mubr.msk.f32.mxu0 %vm225_vm1, %v1151_v9  ;;  %v1170_v9 = vrot.slane %v8637_v57, 2 }
  0x65   : > { %v9002_v12 = vsel %vm1148_vm5, %v1154_v13, %v1155_v54  ;;  %v1169_v54 = vrot.slane %v8635_v56, 2  ;;  %v9066_v53 = vsel %vm1148_vm5, %v1165_v59, %v1167_v47  ;;  %v1182_v47 = vrot.slane %v8736_v38, 2 }
  0x66   : > { %12364 = vst [vmem:[#allocation70_spill] sm:$0xff] %v9066_v53 }
  0x67   : > { %7508 = vmatmul.mubr.msk.f32.gmra.mxu1 %vm225_vm1, %v8977_v3  ;;  %v1160_v3 = vrot.slane %v8600_v42, 2  ;;  %7516 = vmatmul.mubr.msk.f32.vlgmr.msra.gmra.mxu0 %vm225_vm1, %v1153_v58  ;;  %v1174_v58 = vrot.slane %v8658_v0, 2 }
  0x68   : > { %7510 = vmatprep.mubr.msk.f32.mxu1 %vm225_vm1, %v8984_v5  ;;  %7614 = vmatpush3.msk.msra.mxu0 %vm494_vm0, %v8466_v8  ;;  %v9036_v8 = vld [vmem:[%s12097_s1 + $0x1c] sm:$0xf] }
  0x69   : > { %7518 = vmatprep.mubr.msk.f32.mxu0 %vm225_vm1, %v9002_v12  ;;  %v9025_v13 = vsel %vm1148_vm5, %v1159_v27, %v1160_v3  ;;  %7713 = vmatprep.subr.msk.mxu0 %vm494_vm0, %v9011_v6  ;;  %v1177_v27 = vrot.slane %v8681_v21, 2 }
  0x6a   : > { %12361 = vst [vmem:[#allocation67_spill] sm:$0xff] %v9025_v13 }
  0x6b   : > { %7511 = vmatmul.mubr.msk.f32.gmra.mxu1 %vm225_vm1, %v8996_v14  ;;  %7519 = vmatmul.mubr.msk.f32.gmra.mxu0 %vm225_vm1, %v9021_v37  ;;  %v9100_v21 = vsel %vm1148_vm5, %v1175_v2, %v1177_v27  ;;  %v1189_v27 = vrot.slane %v8784_v32, 2 }
  0x6c   : > { %7565 = vmatprep.mubr.msk.f32.mxu1 %vm225_vm1, %v8581_v35  ;;  %7521 = vmatprep.mubr.msk.f32.mxu0 %vm225_vm1, %v9025_v13  ;;  %v9045_v35 = vsel %vm1148_vm5, %v1160_v3, %v1162_v23  ;;  %v9070_v3 = vsel %vm1148_vm5, %v1169_v54, %v1170_v9  ;;  %v9087_v23 = vsel %vm1148_vm5, %v1174_v58, %v1175_v2  ;;  %v1187_v58 = vrot.slane %v8782_v43, 2 }
  0x6d   : > { %12362 = vst [vmem:[#allocation68_spill] sm:$0xff] %v9045_v35  ;;  %12365 = vst [vmem:[#allocation71_spill] sm:$0xff] %v9070_v3 }
  0x6e   : > { %12367 = vst [vmem:[#allocation73_spill] sm:$0xff] %v9087_v23  ;;  %12368 = vst [vmem:[#allocation74_spill] sm:$0xff] %v9100_v21 }
  0x6f   : > { %7566 = vmatmul.mubr.msk.f32.vlgmr.msra.gmra.mxu1 %vm225_vm1, %v8583_v36  ;;  %v9051_v36 = vsel %vm1148_vm5, %v1164_v18, %v1165_v59  ;;  %7522 = vmatmul.mubr.msk.f32.gmra.mxu0 %vm225_vm1, %v9045_v35  ;;  %v1179_v18 = vrot.slane %v8679_v17, 2  ;;  %v1180_v59 = vrot.slane %v8683_v25, 2 }
  0x70   : > { %7568 = vmatprep.mubr.msk.f32.mxu1 %vm225_vm1, %v8597_v40  ;;  %7664 = vmatpush3.msk.msra.mxu1 %vm494_vm0, %v8747_v45  ;;  %12363 = vst [vmem:[#allocation69_spill] sm:$0xff] %v9051_v36  ;;  %v1172_v45 = vrot.slane %v8656_v63, 2 }
  0x71   : > { %7763 = vmatprep.subr.msk.mxu1 %vm494_vm0, %v9036_v8  ;;  %7524 = vmatprep.mubr.msk.f32.mxu0 %vm225_vm1, %v9051_v36  ;;  %v9104_v54 = vsel %vm1148_vm5, %v1179_v18, %v1180_v59  ;;  %v9117_v38 = vsel %vm1148_vm5, %v1180_v59, %v1182_v47  ;;  %v1190_v18 = vrot.slane %v8786_v33, 2  ;;  %v1192_v59 = vrot.slane %v8805_v28, 2 }
  0x72   : > { %v9083_v63 = vsel %vm1148_vm5, %v1170_v9, %v1172_v45  ;;  %12369 = vst [vmem:[#allocation75_spill] sm:$0xff] %v9104_v54  ;;  %v1184_v9 = vrot.slane %v8752_v44, 2  ;;  %v1185_v45 = vrot.slane %v8754_v39, 2  ;;  %12370 = vst [vmem:[#allocation76_spill] sm:$0xff] %v9117_v38 }
  0x73   : > { %7569 = vmatmul.mubr.msk.f32.gmra.mxu1 %vm225_vm1, %v8600_v42  ;;  %7525 = vmatmul.mubr.msk.f32.gmra.mxu0 %vm225_vm1, %v9066_v53  ;;  %12366 = vst [vmem:[#allocation72_spill] sm:$0xff] %v9083_v63  ;;  %v9138_v47 = vsel %vm1148_vm5, %v1189_v27, %v1190_v18  ;;  %v9151_v28 = vsel %vm1148_vm5, %v1190_v18, %v1192_v59  ;;  %v1199_v27 = vrot.slane %v8830_v20, 2  ;;  %v1202_v18 = vrot.slane %v8851_v15, 2 }
  0x74   : > { %7571 = vmatprep.mubr.msk.f32.mxu1 %vm225_vm1, %v8609_v46  ;;  %7527 = vmatprep.mubr.msk.f32.mxu0 %vm225_vm1, %v9070_v3  ;;  %v9121_v2 = vsel %vm1148_vm5, %v1184_v9, %v1185_v45  ;;  %v9134_v43 = vsel %vm1148_vm5, %v1185_v45, %v1187_v58  ;;  %12373 = vst [vmem:[#allocation79_spill] sm:$0xff] %v9138_v47  ;;  %v1194_v9 = vrot.slane %v8807_v29, 2  ;;  %12374 = vst [vmem:[#allocation80_spill] sm:$0xff] %v9151_v28 }
  0x75   : > { %12371 = vst [vmem:[#allocation77_spill] sm:$0xff] %v9121_v2  ;;  %12372 = vst [vmem:[#allocation78_spill] sm:$0xff] %v9134_v43  ;;  %v1197_v45 = vrot.slane %v8828_v24, 2 }
  0x77   : > { %7572 = vmatmul.mubr.msk.f32.gmra.mxu1 %vm225_vm1, %v8613_v48  ;;  %7528 = vmatmul.mubr.msk.f32.gmra.mxu0 %vm225_vm1, %v9083_v63 }
  0x78   : > { %7574 = vmatprep.mubr.msk.f32.mxu1 %vm225_vm1, %v8635_v56  ;;  %7530 = vmatprep.mubr.msk.f32.mxu0 %vm225_vm1, %v9087_v23 }
  0x7b   : > { %7575 = vmatmul.mubr.msk.f32.gmra.mxu1 %vm225_vm1, %v8637_v57  ;;  %7531 = vmatmul.mubr.msk.f32.gmra.mxu0 %vm225_vm1, %v9100_v21 }
  0x7c   : > { %7577 = vmatprep.mubr.msk.f32.mxu1 %vm225_vm1, %v8658_v0  ;;  %7533 = vmatprep.mubr.msk.f32.mxu0 %vm225_vm1, %v9104_v54 }
  0x7f   : > { %7578 = vmatmul.mubr.msk.f32.gmra.mxu1 %vm225_vm1, %v8660_v1  ;;  %7534 = vmatmul.mubr.msk.f32.gmra.mxu0 %vm225_vm1, %v9117_v38 }
  0x80   : > { %7580 = vmatprep.mubr.msk.f32.mxu1 %vm225_vm1, %v8679_v17  ;;  %7536 = vmatprep.mubr.msk.f32.mxu0 %vm225_vm1, %v9121_v2 }
  0x83   : > { %7581 = vmatmul.mubr.msk.f32.gmra.mxu1 %vm225_vm1, %v8683_v25  ;;  %v1195_v25 = vrot.slane %v8809_v26, 2  ;;  %7537 = vmatmul.mubr.msk.f32.gmra.mxu0 %vm225_vm1, %v9134_v43 }
  0x84   : > { %7583 = vmatprep.mubr.msk.f32.mxu1 %vm225_vm1, %v8752_v44  ;;  %7539 = vmatprep.mubr.msk.f32.mxu0 %vm225_vm1, %v9138_v47 }
  0x85   : > { %v9155_v58 = vsel %vm1148_vm5, %v1194_v9, %v1195_v25  ;;  %v9168_v24 = vsel %vm1148_vm5, %v1195_v25, %v1197_v45  ;;  %v1204_v9 = vrot.slane %v8853_v16, 2  ;;  %v1207_v25 = vrot.slane %v8874_v7, 2 }
  0x86   : > { %12375 = vst [vmem:[#allocation81_spill] sm:$0xff] %v9155_v58  ;;  %12376 = vst [vmem:[#allocation82_spill] sm:$0xff] %v9168_v24 }
  0x87   : > { %7584 = vmatmul.mubr.msk.f32.gmra.mxu1 %vm225_vm1, %v8754_v39  ;;  %v1200_v39 = vrot.slane %v8832_v22, 2  ;;  %7540 = vmatmul.mubr.msk.f32.gmra.mxu0 %vm225_vm1, %v9151_v28 }
  0x88   : > { %7586 = vmatprep.mubr.msk.f32.mxu1 %vm225_vm1, %v8784_v32  ;;  %7542 = vmatprep.mubr.msk.f32.mxu0 %vm225_vm1, %v9155_v58 }
  0x89   : > { %v9172_v59 = vsel %vm1148_vm5, %v1199_v27, %v1200_v39  ;;  %v9185_v15 = vsel %vm1148_vm5, %v1200_v39, %v1202_v18  ;;  %v1209_v27 = vrot.slane %v8876_v30, 2  ;;  %v1212_v39 = vrot.slane %v8897_v34, 2 }
  0x8a   : > { %12377 = vst [vmem:[#allocation83_spill] sm:$0xff] %v9172_v59  ;;  %12378 = vst [vmem:[#allocation84_spill] sm:$0xff] %v9185_v15  ;;  %v1217_v34 = vrot.slane %v8920_v10, 2  ;;  %v1222_v10 = vrot.slane %v8943_v51, 2  ;;  %v1227_v51 = vrot.slane %v8966_v60, 2  ;;  %v9278_v60 = vld [vmem:[#allocation2 + $0x188] sm:$0xff] }
  0x8b   : > { %7587 = vmatmul.mubr.msk.f32.gmra.mxu1 %vm225_vm1, %v8786_v33  ;;  %v1205_v33 = vrot.slane %v8855_v11, 2  ;;  %7543 = vmatmul.mubr.msk.f32.gmra.mxu0 %vm225_vm1, %v9168_v24  ;;  %12388 = vst [vmem:[#allocation94_spill] sm:$0xff] %v9278_v60 }
  0x8c   : > { %7589 = vmatprep.mubr.msk.f32.mxu1 %vm225_vm1, %v8807_v29  ;;  %7545 = vmatprep.mubr.msk.f32.mxu0 %vm225_vm1, %v9172_v59 }
  0x8d   : > { %v9189_v45 = vsel %vm1148_vm5, %v1204_v9, %v1205_v33  ;;  %v9202_v7 = vsel %vm1148_vm5, %v1205_v33, %v1207_v25  ;;  %v1214_v9 = vrot.slane %v8899_v55, 2 }
  0x8e   : > { %12379 = vst [vmem:[#allocation85_spill] sm:$0xff] %v9189_v45  ;;  %12380 = vst [vmem:[#allocation86_spill] sm:$0xff] %v9202_v7 }
  0x8f   : > { %7590 = vmatmul.mubr.msk.f32.gmra.mxu1 %vm225_vm1, %v8809_v26  ;;  %v1210_v26 = vrot.slane %v8878_v52, 2  ;;  %7546 = vmatmul.mubr.msk.f32.gmra.mxu0 %vm225_vm1, %v9185_v15 }
  0x90   : > { %7592 = vmatprep.mubr.msk.f32.mxu1 %vm225_vm1, %v8830_v20  ;;  %7548 = vmatprep.mubr.msk.f32.mxu0 %vm225_vm1, %v9189_v45 }
  0x91   : > { %v9206_v18 = vsel %vm1148_vm5, %v1209_v27, %v1210_v26  ;;  %v9219_v33 = vsel %vm1148_vm5, %v1210_v26, %v1212_v39  ;;  %v1219_v27 = vrot.slane %v8922_v62, 2 }
  0x92   : > { %12381 = vst [vmem:[#allocation87_spill] sm:$0xff] %v9206_v18  ;;  %12382 = vst [vmem:[#allocation88_spill] sm:$0xff] %v9219_v33 }
  0x93   : > { %7593 = vmatmul.mubr.msk.f32.gmra.mxu1 %vm225_vm1, %v8832_v22  ;;  %v1215_v22 = vrot.slane %v8901_v41, 2  ;;  %7549 = vmatmul.mubr.msk.f32.gmra.mxu0 %vm225_vm1, %v9202_v7 }
  0x94   : > { %7595 = vmatprep.mubr.msk.f32.mxu1 %vm225_vm1, %v8853_v16  ;;  %7551 = vmatprep.mubr.msk.f32.mxu0 %vm225_vm1, %v9206_v18 }
  0x95   : > { %v9223_v25 = vsel %vm1148_vm5, %v1214_v9, %v1215_v22  ;;  %v9236_v26 = vsel %vm1148_vm5, %v1215_v22, %v1217_v34  ;;  %v1224_v9 = vrot.slane %v8945_v4, 2 }
  0x96   : > { %12383 = vst [vmem:[#allocation89_spill] sm:$0xff] %v9223_v25  ;;  %12384 = vst [vmem:[#allocation90_spill] sm:$0xff] %v9236_v26 }
  0x97   : > { %7596 = vmatmul.mubr.msk.f32.gmra.mxu1 %vm225_vm1, %v8855_v11  ;;  %v1220_v11 = vrot.slane %v8924_v61, 2  ;;  %7552 = vmatmul.mubr.msk.f32.gmra.mxu0 %vm225_vm1, %v9219_v33 }
  0x98   : > { %7598 = vmatprep.mubr.msk.f32.mxu1 %vm225_vm1, %v8876_v30  ;;  %7554 = vmatprep.mubr.msk.f32.mxu0 %vm225_vm1, %v9223_v25 }
  0x99   : > { %v9240_v39 = vsel %vm1148_vm5, %v1219_v27, %v1220_v11  ;;  %v9253_v22 = vsel %vm1148_vm5, %v1220_v11, %v1222_v10  ;;  %v9270_v27 = vld [vmem:[#allocation2 + $0x180] sm:$0xff] }
  0x9a   : > { %12385 = vst [vmem:[#allocation91_spill] sm:$0xff] %v9240_v39  ;;  %v12389_v10 = vld [vmem:[#allocation25_spill] sm:$0xff] }
  0x9b   : > { %7599 = vmatmul.mubr.msk.f32.gmra.mxu1 %vm225_vm1, %v8878_v52  ;;  %v1225_v52 = vrot.slane %v8947_v31, 2  ;;  %7555 = vmatmul.mubr.msk.f32.gmra.mxu0 %vm225_vm1, %v9236_v26 }
  0x9c   : > { %7601 = vmatprep.mubr.msk.f32.mxu1 %vm225_vm1, %v8899_v55  ;;  %7557 = vmatprep.mubr.msk.f32.mxu0 %vm225_vm1, %v9240_v39 }
  0x9d   : > { %v9257_v34 = vsel %vm1148_vm5, %v1224_v9, %v1225_v52  ;;  %v9268_v11 = vsel %vm1148_vm5, %v1225_v52, %v1227_v51  ;;  %v9287_v52 = vld [vmem:[%s12097_s1 + $0x20] sm:$0xf]  ;;  %v12396_v9 = vld [vmem:[#allocation44_spill] sm:$0xff] }
  0x9e   : > { %12386 = vst [vmem:[#allocation92_spill] sm:$0xff] %v9257_v34  ;;  %12387 = vst [vmem:[#allocation93_spill] sm:$0xff] %v9268_v11  ;;  %v12397_v51 = vld [vmem:[#allocation45_spill] sm:$0xff] }
  0x9f   : > { %7602 = vmatmul.mubr.msk.f32.gmra.mxu1 %vm225_vm1, %v8901_v41  ;;  %7558 = vmatmul.mubr.msk.f32.gmra.mxu0 %vm225_vm1, %v9253_v22 }
  0xa0   : > { %7604 = vmatprep.mubr.msk.f32.mxu1 %vm225_vm1, %v8922_v62  ;;  %7560 = vmatprep.mubr.msk.f32.mxu0 %vm225_vm1, %v9257_v34 }
  0xa3   : > { %7605 = vmatmul.mubr.msk.f32.gmra.mxu1 %vm225_vm1, %v8924_v61  ;;  %7561 = vmatmul.mubr.msk.f32.gmra.mxu0 %vm225_vm1, %v9268_v11 }
  0xa4   : > { %7607 = vmatprep.mubr.msk.f32.mxu1 %vm225_vm1, %v8945_v4  ;;  %7615 = vmatprep.mubr.msk.f32.mxu0 %vm225_vm1, %v8618_v49  ;;  %v12390_v49 = vld [vmem:[#allocation26_spill] sm:$0xff] }
  0xa7   : > { %7608 = vmatmul.mubr.msk.f32.gmra.mxu1 %vm225_vm1, %v8947_v31  ;;  %7616 = vmatmul.mubr.msk.f32.vlgmr.msra.gmra.mxu0 %vm225_vm1, %v8623_v50  ;;  %v12391_v50 = vld [vmem:[#allocation27_spill] sm:$0xff] }
  0xa8   : > { %7610 = vmatprep.mubr.msk.f32.mxu1 %vm225_vm1, %v9270_v27  ;;  %7714 = vmatpush3.msk.msra.mxu0 %vm494_vm0, %v9011_v6  ;;  %v12393_v6 = vld [vmem:[#allocation29_spill] sm:$0xff] }
  0xa9   : > { %7618 = vmatprep.mubr.msk.f32.mxu0 %vm225_vm1, %v12389_v10  ;;  %7813 = vmatprep.subr.msk.mxu0 %vm494_vm0, %v9287_v52 }
  0xab   : > { %7611 = vmatmul.mubr.msk.f32.gmra.mxu1 %vm225_vm1, %v9278_v60  ;;  %7619 = vmatmul.mubr.msk.f32.gmra.mxu0 %vm225_vm1, %v12390_v49 }
  0xac   : > { %7665 = vmatprep.mubr.msk.f32.mxu1 %vm225_vm1, %v9002_v12  ;;  %7621 = vmatprep.mubr.msk.f32.mxu0 %vm225_vm1, %v12391_v50  ;;  %v12392_v12 = vld [vmem:[#allocation28_spill] sm:$0xff] }
  0xaf   : > { %7666 = vmatmul.mubr.msk.f32.vlgmr.msra.gmra.mxu1 %vm225_vm1, %v9021_v37  ;;  %7622 = vmatmul.mubr.msk.f32.gmra.mxu0 %vm225_vm1, %v12392_v12  ;;  %v12394_v37 = vld [vmem:[#allocation36_spill] sm:$0xff] }
  0xb0   : > { %7668 = vmatprep.mubr.msk.f32.mxu1 %vm225_vm1, %v9025_v13  ;;  %7764 = vmatpush3.msk.msra.mxu1 %vm494_vm0, %v9036_v8  ;;  %v12395_v8 = vld [vmem:[#allocation40_spill] sm:$0xff] }
  0xb1   : > { %7624 = vmatprep.mubr.msk.f32.mxu0 %vm225_vm1, %v12393_v6 }
  0xb3   : > { %7669 = vmatmul.mubr.msk.f32.gmra.mxu1 %vm225_vm1, %v9045_v35  ;;  %7625 = vmatmul.mubr.msk.f32.gmra.mxu0 %vm225_vm1, %v12394_v37  ;;  %v2096_v35 = vrot.slane %v9278_v60, 2 }
  0xb4   : > { %7671 = vmatprep.mubr.msk.f32.mxu1 %vm225_vm1, %v9051_v36  ;;  %7627 = vmatprep.mubr.msk.f32.mxu0 %vm225_vm1, %v12395_v8  ;;  %v12413_v36 = vld [vmem:[#allocation66_spill] sm:$0xff] }
  0xb7   : > { %7672 = vmatmul.mubr.msk.f32.gmra.mxu1 %vm225_vm1, %v9066_v53  ;;  %7628 = vmatmul.mubr.msk.f32.gmra.mxu0 %vm225_vm1, %v12396_v9  ;;  %v12398_v53 = vld [vmem:[#allocation47_spill] sm:$0xff] }
  0xb8   : > { %7674 = vmatprep.mubr.msk.f32.mxu1 %vm225_vm1, %v9070_v3  ;;  %7630 = vmatprep.mubr.msk.f32.mxu0 %vm225_vm1, %v12397_v51  ;;  %v12399_v3 = vld [vmem:[#allocation48_spill] sm:$0xff] }
  0xbb   : > { %7675 = vmatmul.mubr.msk.f32.gmra.mxu1 %vm225_vm1, %v9083_v63  ;;  %7631 = vmatmul.mubr.msk.f32.gmra.mxu0 %vm225_vm1, %v12398_v53  ;;  %v12400_v63 = vld [vmem:[#allocation50_spill] sm:$0xff] }
  0xbc   : > { %7677 = vmatprep.mubr.msk.f32.mxu1 %vm225_vm1, %v9087_v23  ;;  %7633 = vmatprep.mubr.msk.f32.mxu0 %vm225_vm1, %v12399_v3  ;;  %v12401_v23 = vld [vmem:[#allocation51_spill] sm:$0xff] }
  0xbf   : > { %7678 = vmatmul.mubr.msk.f32.gmra.mxu1 %vm225_vm1, %v9100_v21  ;;  %7634 = vmatmul.mubr.msk.f32.gmra.mxu0 %vm225_vm1, %v12400_v63  ;;  %v12402_v21 = vld [vmem:[#allocation53_spill] sm:$0xff] }
  0xc0   : > { %7680 = vmatprep.mubr.msk.f32.mxu1 %vm225_vm1, %v9104_v54  ;;  %7636 = vmatprep.mubr.msk.f32.mxu0 %vm225_vm1, %v12401_v23  ;;  %v12403_v54 = vld [vmem:[#allocation54_spill] sm:$0xff] }
  0xc3   : > { %7681 = vmatmul.mubr.msk.f32.gmra.mxu1 %vm225_vm1, %v9117_v38  ;;  %7637 = vmatmul.mubr.msk.f32.gmra.mxu0 %vm225_vm1, %v12402_v21  ;;  %v12404_v38 = vld [vmem:[#allocation56_spill] sm:$0xff] }
  0xc4   : > { %7683 = vmatprep.mubr.msk.f32.mxu1 %vm225_vm1, %v9121_v2  ;;  %7639 = vmatprep.mubr.msk.f32.mxu0 %vm225_vm1, %v12403_v54  ;;  %v12405_v2 = vld [vmem:[#allocation57_spill] sm:$0xff] }
  0xc7   : > { %7684 = vmatmul.mubr.msk.f32.gmra.mxu1 %vm225_vm1, %v9134_v43  ;;  %7640 = vmatmul.mubr.msk.f32.gmra.mxu0 %vm225_vm1, %v12404_v38  ;;  %v12406_v43 = vld [vmem:[#allocation59_spill] sm:$0xff] }
  0xc8   : > { %7686 = vmatprep.mubr.msk.f32.mxu1 %vm225_vm1, %v9138_v47  ;;  %7642 = vmatprep.mubr.msk.f32.mxu0 %vm225_vm1, %v12405_v2  ;;  %v12407_v47 = vld [vmem:[#allocation60_spill] sm:$0xff] }
  0xcb   : > { %7687 = vmatmul.mubr.msk.f32.gmra.mxu1 %vm225_vm1, %v9151_v28  ;;  %7643 = vmatmul.mubr.msk.f32.gmra.mxu0 %vm225_vm1, %v12406_v43  ;;  %v12408_v28 = vld [vmem:[#allocation61_spill] sm:$0xff] }
  0xcc   : > { %7689 = vmatprep.mubr.msk.f32.mxu1 %vm225_vm1, %v9155_v58  ;;  %7645 = vmatprep.mubr.msk.f32.mxu0 %vm225_vm1, %v12407_v47  ;;  %v12409_v58 = vld [vmem:[#allocation62_spill] sm:$0xff] }
  0xcf   : > { %7690 = vmatmul.mubr.msk.f32.gmra.mxu1 %vm225_vm1, %v9168_v24  ;;  %7646 = vmatmul.mubr.msk.f32.gmra.mxu0 %vm225_vm1, %v12408_v28  ;;  %v12410_v24 = vld [vmem:[#allocation63_spill] sm:$0xff] }
  0xd0   : > { %7692 = vmatprep.mubr.msk.f32.mxu1 %vm225_vm1, %v9172_v59  ;;  %7648 = vmatprep.mubr.msk.f32.mxu0 %vm225_vm1, %v12409_v58  ;;  %v12411_v59 = vld [vmem:[#allocation64_spill] sm:$0xff] }
  0xd3   : > { %7693 = vmatmul.mubr.msk.f32.gmra.mxu1 %vm225_vm1, %v9185_v15  ;;  %7649 = vmatmul.mubr.msk.f32.gmra.mxu0 %vm225_vm1, %v12410_v24  ;;  %v12412_v15 = vld [vmem:[#allocation65_spill] sm:$0xff] }
  0xd4   : > { %7695 = vmatprep.mubr.msk.f32.mxu1 %vm225_vm1, %v9189_v45  ;;  %7651 = vmatprep.mubr.msk.f32.mxu0 %vm225_vm1, %v12411_v59  ;;  %v1825_v45 = vrot.slane %v9278_v60, 1 }
  0xd7   : > { %7696 = vmatmul.mubr.msk.f32.gmra.mxu1 %vm225_vm1, %v9202_v7  ;;  %7652 = vmatmul.mubr.msk.f32.gmra.mxu0 %vm225_vm1, %v12412_v15  ;;  %v1824_v7 = vrot.slane %v9270_v27, 1 }
  0xd8   : > { %7698 = vmatprep.mubr.msk.f32.mxu1 %vm225_vm1, %v9206_v18  ;;  %7654 = vmatprep.mubr.msk.f32.mxu0 %vm225_vm1, %v8962_v19  ;;  %v387_v18 = vld [vmem:[#allocation2 + $0x190] sm:$0x3] }
  0xd9   : > { %v9410_v13 = vsel %vm741_vm4, %v1824_v7, %v1825_v45  ;;  %v9431_v7 = vld [vmem:[%s12098_s2] ss:$0 sm:$0xff] }
  0xdb   : > { %7699 = vmatmul.mubr.msk.f32.gmra.mxu1 %vm225_vm1, %v9219_v33  ;;  %7655 = vmatmul.mubr.msk.f32.gmra.mxu0 %vm225_vm1, %v12413_v36  ;;  %v2095_v33 = vrot.slane %v9270_v27, 2 }
  0xdc   : > { %7701 = vmatprep.mubr.msk.f32.mxu1 %vm225_vm1, %v9223_v25  ;;  %7657 = vmatprep.mubr.msk.f32.mxu0 %vm225_vm1, %v8984_v5  ;;  %v1827_v25 = vrot.slane %v387_v18, 1 }
  0xdd   : > { %v9424_v60 = vsel %vm1148_vm5, %v2095_v33, %v2096_v35 }
  0xdf   : > { %7702 = vmatmul.mubr.msk.f32.gmra.mxu1 %vm225_vm1, %v9236_v26  ;;  %7658 = vmatmul.mubr.msk.f32.gmra.mxu0 %vm225_vm1, %v8996_v14  ;;  %v9421_v26 = vsel %vm741_vm4, %v1825_v45, %v1827_v25 }
  0xe0   : > { %7704 = vmatprep.mubr.msk.f32.mxu1 %vm225_vm1, %v9240_v39  ;;  %v2098_v39 = vrot.slane %v387_v18, 2  ;;  %7660 = vmatprep.mubr.msk.f32.mxu0 %vm225_vm1, %v9410_v13 }
  0xe2   : > { %v9438_v45 = vsel %vm1148_vm5, %v2096_v35, %v2098_v39 }
  0xe3   : > { %7705 = vmatmul.mubr.msk.f32.gmra.mxu1 %vm225_vm1, %v9253_v22  ;;  %7661 = vmatmul.mubr.msk.f32.gmra.mxu0 %vm225_vm1, %v9421_v26 }
  0xe4   : > { %7707 = vmatprep.mubr.msk.f32.mxu1 %vm225_vm1, %v9257_v34  ;;  %7715 = vmatprep.mubr.msk.f32.mxu0 %vm225_vm1, %v8597_v40 }
  0xe7   : > { %7708 = vmatmul.mubr.msk.f32.gmra.mxu1 %vm225_vm1, %v9268_v11  ;;  %v7417_v18 = vpop.f32.mrf.mxu0  ;;  %7716 = vmatmul.mubr.msk.f32.vlgmr.msra.gmra.mxu0 %vm225_vm1, %v8600_v42 }
  0xe8   : > { %7710 = vmatprep.mubr.msk.f32.mxu1 %vm225_vm1, %v9424_v60  ;;  %v570_v33 = vadd.f32 %v7417_v18, %v9431_v7  ;;  %7814 = vmatpush3.msk.msra.mxu0 %vm494_vm0, %v9287_v52 }
  0xe9   : > { %v564_v25 = vpop.f32.mrf.mxu0  ;;  %7718 = vmatprep.mubr.msk.f32.mxu0 %vm225_vm1, %v8609_v46 }
  0xea   : > { %v565_v11 = vadd.f32 %v9431_v7, %v564_v25 }
  0xeb   : > { %7711 = vmatmul.mubr.msk.f32.gmra.mxu1 %vm225_vm1, %v9438_v45  ;;  %v7467_v34 = vpop.f32.mrf.mxu1  ;;  %v7420_v42 = vpop.f32.mrf.mxu0  ;;  %7719 = vmatmul.mubr.msk.f32.gmra.mxu0 %vm225_vm1, %v8613_v48 }
  0xec   : > { %7765 = vmatprep.mubr.msk.f32.mxu1 %vm225_vm1, %v12389_v10  ;;  %v9452_v35 = vadd.f32 %v7467_v34, %v570_v33  ;;  %v580_v52 = vadd.f32 %v7420_v42, %v9431_v7  ;;  %7721 = vmatprep.mubr.msk.f32.mxu0 %vm225_vm1, %v8635_v56 }
  0xed   : > { %v955_v40 = vpop.f32.mrf.mxu1  ;;  %v574_v34 = vpop.f32.mrf.mxu0 }
  0xee   : > { %v9458_v39 = vadd.f32 %v955_v40, %v565_v11  ;;  %v575_v46 = vadd.f32 %v9431_v7, %v574_v34 }
  0xef   : > { %7766 = vmatmul.mubr.msk.f32.vlgmr.msra.gmra.mxu1 %vm225_vm1, %v12390_v49  ;;  %v7470_v10 = vpop.f32.mrf.mxu1  ;;  %v7423_v49 = vpop.f32.mrf.mxu0  ;;  %7722 = vmatmul.mubr.msk.f32.gmra.mxu0 %vm225_vm1, %v8637_v57 }
  0xf0   : > { %7768 = vmatprep.mubr.msk.f32.mxu1 %vm225_vm1, %v12391_v50  ;;  %v9470_v11 = vadd.f32 %v7470_v10, %v580_v52  ;;  %v590_v48 = vadd.f32 %v7423_v49, %v9431_v7  ;;  %7724 = vmatprep.mubr.msk.f32.mxu0 %vm225_vm1, %v8658_v0 }
  0xf1   : > { %v965_v50 = vpop.f32.mrf.mxu1  ;;  %v584_v18 = vpop.f32.mrf.mxu0 }
  0xf2   : > { %v9479_v56 = vadd.f32 %v965_v50, %v575_v46  ;;  %v12414_v46 = vld [vmem:[#allocation30_spill] sm:$0xff] }
  0xf3   : > { %7769 = vmatmul.mubr.msk.f32.gmra.mxu1 %vm225_vm1, %v12392_v12  ;;  %v585_v12 = vadd.f32 %v9431_v7, %v584_v18  ;;  %v7473_v33 = vpop.f32.mrf.mxu1  ;;  %v7426_v57 = vpop.f32.mrf.mxu0  ;;  %7725 = vmatmul.mubr.msk.f32.gmra.mxu0 %vm225_vm1, %v8660_v1 }
  0xf4   : > { %7771 = vmatprep.mubr.msk.f32.mxu1 %vm225_vm1, %v12393_v6  ;;  %v9484_v25 = vadd.f32 %v7473_v33, %v590_v48  ;;  %v600_v0 = vadd.f32 %v7426_v57, %v9431_v7  ;;  %7727 = vmatprep.mubr.msk.f32.mxu0 %vm225_vm1, %v8679_v17 }
  0xf5   : > { %v975_v6 = vpop.f32.mrf.mxu1  ;;  %v594_v42 = vpop.f32.mrf.mxu0 }
  0xf6   : > { %v9493_v40 = vadd.f32 %v975_v6, %v585_v12  ;;  %v12415_v12 = vld [vmem:[#allocation42_spill] sm:$0xff] }
  0xf7   : > { %7772 = vmatmul.mubr.msk.f32.gmra.mxu1 %vm225_vm1, %v12394_v37  ;;  %v595_v37 = vadd.f32 %v9431_v7, %v594_v42  ;;  %v7476_v52 = vpop.f32.mrf.mxu1  ;;  %v7429_v1 = vpop.f32.mrf.mxu0  ;;  %7728 = vmatmul.mubr.msk.f32.gmra.mxu0 %vm225_vm1, %v12414_v46 }
  0xf8   : > { %7774 = vmatprep.mubr.msk.f32.mxu1 %vm225_vm1, %v12395_v8  ;;  %v9498_v34 = vadd.f32 %v7476_v52, %v600_v0  ;;  %v610_v17 = vadd.f32 %v7429_v1, %v9431_v7  ;;  %7730 = vmatprep.mubr.msk.f32.mxu0 %vm225_vm1, %v8752_v44 }
  0xf9   : > { %v985_v8 = vpop.f32.mrf.mxu1  ;;  %v604_v49 = vpop.f32.mrf.mxu0 }
  0xfa   : > { %v9507_v10 = vadd.f32 %v985_v8, %v595_v37  ;;  %v12416_v37 = vld [vmem:[#allocation46_spill] sm:$0xff] }
  0xfb   : > { %7775 = vmatmul.mubr.msk.f32.gmra.mxu1 %vm225_vm1, %v12396_v9  ;;  %v605_v9 = vadd.f32 %v9431_v7, %v604_v49  ;;  %v7479_v48 = vpop.f32.mrf.mxu1  ;;  %v7432_v18 = vpop.f32.mrf.mxu0  ;;  %7731 = vmatmul.mubr.msk.f32.gmra.mxu0 %vm225_vm1, %v12415_v12  ;;  %v12417_v49 = vld [vmem:[#allocation49_spill] sm:$0xff] }
  0xfc   : > { %7777 = vmatprep.mubr.msk.f32.mxu1 %vm225_vm1, %v12397_v51  ;;  %v9512_v50 = vadd.f32 %v7479_v48, %v610_v17  ;;  %v620_v44 = vadd.f32 %v7432_v18, %v9431_v7  ;;  %7733 = vmatprep.mubr.msk.f32.mxu0 %vm225_vm1, %v8784_v32 }
  0xfd   : > { %v995_v51 = vpop.f32.mrf.mxu1  ;;  %v614_v57 = vpop.f32.mrf.mxu0 }
  0xfe   : > { %v9521_v33 = vadd.f32 %v995_v51, %v605_v9  ;;  %v12418_v51 = vld [vmem:[#allocation52_spill] sm:$0xff] }
  0xff   : > { %7778 = vmatmul.mubr.msk.f32.gmra.mxu1 %vm225_vm1, %v12398_v53  ;;  %v615_v53 = vadd.f32 %v9431_v7, %v614_v57  ;;  %v7435_v42 = vpop.f32.mrf.mxu0  ;;  %7734 = vmatmul.mubr.msk.f32.gmra.mxu0 %vm225_vm1, %v12416_v37  ;;  %v12419_v37 = vld [vmem:[#allocation55_spill] sm:$0xff] }
 0x100   : > { %7780 = vmatprep.mubr.msk.f32.mxu1 %vm225_vm1, %v12399_v3  ;;  %v630_v32 = vadd.f32 %v7435_v42, %v9431_v7  ;;  %7736 = vmatprep.mubr.msk.f32.mxu0 %vm225_vm1, %v8807_v29 }
 0x101   : > { %v624_v1 = vpop.f32.mrf.mxu0 }
 0x103   : > { %v7482_v0 = vpop.f32.mrf.mxu1  ;;  %7781 = vmatmul.mubr.msk.f32.gmra.mxu1 %vm225_vm1, %v12400_v63  ;;  %v625_v63 = vadd.f32 %v9431_v7, %v624_v1  ;;  %v7438_v8 = vpop.f32.mrf.mxu0  ;;  %7737 = vmatmul.mubr.msk.f32.gmra.mxu0 %vm225_vm1, %v12417_v49 }
 0x104   : > { %v9526_v6 = vadd.f32 %v7482_v0, %v620_v44  ;;  %7783 = vmatprep.mubr.msk.f32.mxu1 %vm225_vm1, %v12401_v23  ;;  %v640_v29 = vadd.f32 %v7438_v8, %v9431_v7  ;;  %7739 = vmatprep.mubr.msk.f32.mxu0 %vm225_vm1, %v8830_v20 }
 0x105   : > { %v1005_v3 = vpop.f32.mrf.mxu1  ;;  %v634_v48 = vpop.f32.mrf.mxu0 }
 0x106   : > { %v9535_v52 = vadd.f32 %v1005_v3, %v615_v53 }
 0x107   : > { %v7485_v46 = vpop.f32.mrf.mxu1  ;;  %7784 = vmatmul.mubr.msk.f32.gmra.mxu1 %vm225_vm1, %v12402_v21  ;;  %v635_v21 = vadd.f32 %v9431_v7, %v634_v48  ;;  %v7441_v44 = vpop.f32.mrf.mxu0  ;;  %7740 = vmatmul.mubr.msk.f32.gmra.mxu0 %vm225_vm1, %v12418_v51 }
 0x108   : > { %v9540_v17 = vadd.f32 %v7485_v46, %v630_v32  ;;  %7786 = vmatprep.mubr.msk.f32.mxu1 %vm225_vm1, %v12403_v54  ;;  %v650_v20 = vadd.f32 %v7441_v44, %v9431_v7  ;;  %7742 = vmatprep.mubr.msk.f32.mxu0 %vm225_vm1, %v8853_v16 }
 0x109   : > { %v1015_v23 = vpop.f32.mrf.mxu1  ;;  %v9565_v53 = vpop.f32.mrf.mxu0 }
 0x10a   : > { %v9549_v9 = vadd.f32 %v1015_v23, %v625_v63  ;;  %v12420_v63 = vld [vmem:[#allocation58_spill] sm:$0xff] }
 0x10b   : > { %v7488_v18 = vpop.f32.mrf.mxu1  ;;  %7787 = vmatmul.mubr.msk.f32.gmra.mxu1 %vm225_vm1, %v12404_v38  ;;  %v7444_v42 = vpop.f32.mrf.mxu0  ;;  %7743 = vmatmul.mubr.msk.f32.gmra.mxu0 %vm225_vm1, %v12419_v37 }
 0x10c   : > { %v9554_v12 = vadd.f32 %v7488_v18, %v640_v29  ;;  %7789 = vmatprep.mubr.msk.f32.mxu1 %vm225_vm1, %v12405_v2  ;;  %v660_v2 = vadd.f32 %v7444_v42, %v9431_v7  ;;  %7745 = vmatprep.mubr.msk.f32.mxu0 %vm225_vm1, %v8876_v30  ;;  %v12421_v42 = vld [vmem:[#allocation94_spill] sm:$0xff] }
 0x10d   : > { %v1025_v54 = vpop.f32.mrf.mxu1  ;;  %v9580_v32 = vpop.f32.mrf.mxu0 }
 0x10e   : > { %v9563_v57 = vadd.f32 %v1025_v54, %v635_v21  ;;  %v9627_v21 = vld [vmem:[#allocation2 + $0x198] sm:$0xff] }
 0x10f   : > { %v7491_v38 = vpop.f32.mrf.mxu1  ;;  %7790 = vmatmul.mubr.msk.f32.gmra.mxu1 %vm225_vm1, %v12406_v43  ;;  %v7447_v1 = vpop.f32.mrf.mxu0  ;;  %7746 = vmatmul.mubr.msk.f32.gmra.mxu0 %vm225_vm1, %v12420_v63  ;;  %v2635_v51 = vrot.slane %v9627_v21, 1 }
 0x110   : > { %v9569_v0 = vadd.f32 %v7491_v38, %v650_v20  ;;  %7792 = vmatprep.mubr.msk.f32.mxu1 %vm225_vm1, %v12407_v47  ;;  %v670_v47 = vadd.f32 %v7447_v1, %v9431_v7  ;;  %7748 = vmatprep.mubr.msk.f32.mxu0 %vm225_vm1, %v8899_v55  ;;  %v9646_v20 = vld [vmem:[#allocation2 + $0x1a8] sm:$0x3] }
 0x111   : > { %v9576_v16 = vpop.f32.mrf.mxu1  ;;  %v9595_v30 = vpop.f32.mrf.mxu0 }
 0x113   : > { %v7494_v3 = vpop.f32.mrf.mxu1  ;;  %7793 = vmatmul.mubr.msk.f32.gmra.mxu1 %vm225_vm1, %v12408_v28  ;;  %v7450_v49 = vpop.f32.mrf.mxu0  ;;  %7749 = vmatmul.mubr.msk.f32.gmra.mxu0 %vm225_vm1, %v8901_v41 }
 0x114   : > { %v9584_v43 = vadd.f32 %v7494_v3, %v660_v2  ;;  %7795 = vmatprep.mubr.msk.f32.mxu1 %vm225_vm1, %v12409_v58  ;;  %v680_v58 = vadd.f32 %v7450_v49, %v9431_v7  ;;  %7751 = vmatprep.mubr.msk.f32.mxu0 %vm225_vm1, %v8922_v62 }
 0x115   : > { %v9591_v46 = vpop.f32.mrf.mxu1  ;;  %v9610_v55 = vpop.f32.mrf.mxu0 }
 0x117   : > { %v7497_v8 = vpop.f32.mrf.mxu1  ;;  %7796 = vmatmul.mubr.msk.f32.gmra.mxu1 %vm225_vm1, %v12410_v24  ;;  %v7453_v48 = vpop.f32.mrf.mxu0  ;;  %7752 = vmatmul.mubr.msk.f32.gmra.mxu0 %vm225_vm1, %v8924_v61 }
 0x118   : > { %v9599_v28 = vadd.f32 %v7497_v8, %v670_v47  ;;  %7798 = vmatprep.mubr.msk.f32.mxu1 %vm225_vm1, %v12411_v59  ;;  %v690_v41 = vadd.f32 %v7453_v48, %v9431_v7  ;;  %7754 = vmatprep.mubr.msk.f32.mxu0 %vm225_vm1, %v8945_v4 }
 0x119   : > { %v9606_v29 = vpop.f32.mrf.mxu1  ;;  %v9625_v62 = vpop.f32.mrf.mxu0 }
 0x11b   : > { %v7500_v23 = vpop.f32.mrf.mxu1  ;;  %7799 = vmatmul.mubr.msk.f32.gmra.mxu1 %vm225_vm1, %v12412_v15  ;;  %v9629_v15 = vld [vmem:[#allocation2 + $0x1a0] sm:$0xff]  ;;  %7755 = vmatmul.mubr.msk.f32.gmra.mxu0 %vm225_vm1, %v8947_v31 }
 0x11c   : > { %v9614_v24 = vadd.f32 %v7500_v23, %v680_v58  ;;  %7801 = vmatprep.mubr.msk.f32.mxu1 %vm225_vm1, %v8962_v19  ;;  %v7456_v19 = vpop.f32.mrf.mxu0  ;;  %7757 = vmatprep.mubr.msk.f32.mxu0 %vm225_vm1, %v9270_v27  ;;  %v2638_v27 = vrot.slane %v9646_v20, 1  ;;  %v12422_v58 = vld [vmem:[#allocation67_spill] sm:$0xff] }
 0x11d   : > { %v9621_v59 = vpop.f32.mrf.mxu1  ;;  %v700_v4 = vadd.f32 %v7456_v19, %v9431_v7 }
 0x11e   : > { %v9648_v54 = vpop.f32.mrf.mxu0 }
 0x11f   : > { %v7503_v18 = vpop.f32.mrf.mxu1  ;;  %7802 = vmatmul.mubr.msk.f32.gmra.mxu1 %vm225_vm1, %v12413_v36  ;;  %v2636_v36 = vrot.slane %v9629_v15, 1  ;;  %7758 = vmatmul.mubr.msk.f32.gmra.mxu0 %vm225_vm1, %v12421_v42 }
 0x120   : > { %v9633_v61 = vadd.f32 %v7503_v18, %v690_v41  ;;  %7804 = vmatprep.mubr.msk.f32.mxu1 %vm225_vm1, %v8984_v5  ;;  %v7459_v5 = vpop.f32.mrf.mxu0  ;;  %7760 = vmatprep.mubr.msk.f32.mxu0 %vm225_vm1, %v9627_v21  ;;  %v12423_v18 = vld [vmem:[#allocation68_spill] sm:$0xff] }
 0x121   : > { %v9640_v44 = vpop.f32.mrf.mxu1  ;;  %v710_v37 = vadd.f32 %v7459_v5, %v9431_v7  ;;  %v2639_v47 = vsel %vm741_vm4, %v2636_v36, %v2638_v27 }
 0x122   : > { %v9665_v3 = vpop.f32.mrf.mxu0 }
 0x123   : > { %v7506_v38 = vpop.f32.mrf.mxu1  ;;  %7805 = vmatmul.mubr.msk.f32.gmra.mxu1 %vm225_vm1, %v8996_v14  ;;  %v2637_v14 = vsel %vm741_vm4, %v2635_v51, %v2636_v36  ;;  %7761 = vmatmul.mubr.msk.f32.gmra.mxu0 %vm225_vm1, %v9629_v15  ;;  %v12424_v51 = vld [vmem:[#allocation69_spill] sm:$0xff] }
 0x124   : > { %v9652_v31 = vadd.f32 %v7506_v38, %v700_v4  ;;  %7807 = vmatprep.mubr.msk.f32.mxu1 %vm225_vm1, %v9410_v13  ;;  %v7462_v13 = vpop.f32.mrf.mxu0  ;;  %7815 = vmatprep.mubr.msk.f32.mxu0 %vm225_vm1, %v12422_v58 }
 0x125   : > { %v9660_v2 = vpop.f32.mrf.mxu1  ;;  %v720_v8 = vadd.f32 %v7462_v13, %v9431_v7 }
 0x126   : > { %v9680_v23 = vpop.f32.mrf.mxu0 }
 0x127   : > { %v7509_v1 = vpop.f32.mrf.mxu1  ;;  %7808 = vmatmul.mubr.msk.f32.gmra.mxu1 %vm225_vm1, %v9421_v26  ;;  %7816 = vmatmul.mubr.msk.f32.vlgmr.msra.gmra.mxu0 %vm225_vm1, %v12423_v18 }
 0x128   : > { %v9669_v63 = vadd.f32 %v7509_v1, %v710_v37  ;;  %7810 = vmatprep.mubr.msk.f32.mxu1 %vm225_vm1, %v2637_v14  ;;  %v7517_v41 = vpop.f32.mrf.mxu0  ;;  %7818 = vmatprep.mubr.msk.f32.mxu0 %vm225_vm1, %v12424_v51  ;;  %v12425_v37 = vld [vmem:[#allocation70_spill] sm:$0xff] }
 0x129   : > { %v9676_v49 = vpop.f32.mrf.mxu1  ;;  %v1522_v19 = vadd.f32 %v7517_v41, %v9452_v35  ;;  %v12426_v35 = vld [vmem:[#allocation71_spill] sm:$0xff] }
 0x12a   : > { %v1362_v36 = vpop.f32.mrf.mxu0 }
 0x12b   : > { %v7512_v26 = vpop.f32.mrf.mxu1  ;;  %7811 = vmatmul.mubr.msk.f32.gmra.mxu1 %vm225_vm1, %v2639_v47  ;;  %v9693_v38 = vadd.f32 %v1362_v36, %v9458_v39  ;;  %7819 = vmatmul.mubr.msk.f32.gmra.mxu0 %vm225_vm1, %v12425_v37 }
 0x12c   : > { %v9683_v48 = vadd.f32 %v7512_v26, %v720_v8  ;;  %v7520_v27 = vpop.f32.mrf.mxu0  ;;  %7821 = vmatprep.mubr.msk.f32.mxu0 %vm225_vm1, %v12426_v35  ;;  %v12427_v26 = vld [vmem:[#allocation72_spill] sm:$0xff]  ;;  %v12430_v35 = vld [vmem:[#allocation75_spill] sm:$0xff] }
 0x12d   : > { %v9688_v4 = vpop.f32.mrf.mxu1  ;;  %v1524_v14 = vadd.f32 %v7520_v27, %v9470_v11  ;;  %v12428_v11 = vld [vmem:[#allocation73_spill] sm:$0xff]  ;;  %v12429_v27 = vld [vmem:[#allocation74_spill] sm:$0xff] }
 0x12e   : > { %v1372_v13 = vpop.f32.mrf.mxu0 }
 0x12f   : > { %v7567_v5 = vpop.f32.mrf.mxu1  ;;  %v9705_v47 = vadd.f32 %v1372_v13, %v9479_v56  ;;  %7822 = vmatmul.mubr.msk.f32.gmra.mxu0 %vm225_vm1, %v12427_v26 }
 0x130   : > { %v9695_v42 = vadd.f32 %v7567_v5, %v1522_v19  ;;  %v7523_v58 = vpop.f32.mrf.mxu0  ;;  %7824 = vmatprep.mubr.msk.f32.mxu0 %vm225_vm1, %v12428_v11 }
 0x131   : > { %v9700_v1 = vpop.f32.mrf.mxu1  ;;  %v1526_v41 = vadd.f32 %v7523_v58, %v9484_v25  ;;  %v3294_v25 = vld [vmem:[%s12099_s3] sm:$0xf] }
 0x132   : > { %v1382_v19 = vpop.f32.mrf.mxu0  ;;  %7863 = vmatprep.subr.msk.mxu1 %vm494_vm0, %v3294_v25 }
 0x133   : > { %v7570_v39 = vpop.f32.mrf.mxu1  ;;  %v9717_v51 = vadd.f32 %v1382_v19, %v9493_v40  ;;  %7825 = vmatmul.mubr.msk.f32.gmra.mxu0 %vm225_vm1, %v12429_v27  ;;  %7864 = vmatpush3.msk.msra.mxu1 %vm494_vm0, %v3294_v25  ;;  %v12432_v19 = vld [vmem:[#allocation77_spill] sm:$0xff] }
 0x134   : > { %v9707_v8 = vadd.f32 %v7570_v39, %v1524_v14  ;;  %v7526_v5 = vpop.f32.mrf.mxu0  ;;  %7827 = vmatprep.mubr.msk.f32.mxu0 %vm225_vm1, %v12430_v35 }
 0x135   : > { %v9712_v18 = vpop.f32.mrf.mxu1  ;;  %v1528_v37 = vadd.f32 %v7526_v5, %v9498_v34 }
 0x136   : > { %v1392_v40 = vpop.f32.mrf.mxu0 }
 0x137   : > { %v7573_v56 = vpop.f32.mrf.mxu1  ;;  %v9734_v13 = vadd.f32 %v1392_v40, %v9507_v10 }
 0x138   : > { %v9719_v36 = vadd.f32 %v7573_v56, %v1526_v41  ;;  %v7529_v26 = vpop.f32.mrf.mxu0  ;;  %v12431_v41 = vld [vmem:[#allocation76_spill] sm:$0xff] }
 0x139   : > { %v9727_v14 = vpop.f32.mrf.mxu1  ;;  %7828 = vmatmul.mubr.msk.f32.gmra.mxu0 %vm225_vm1, %v12431_v41  ;;  %v1530_v34 = vadd.f32 %v7529_v26, %v9512_v50  ;;  %v12434_v50 = vld [vmem:[#allocation79_spill] sm:$0xff] }
 0x13a   : > { %7830 = vmatprep.mubr.msk.f32.mxu0 %vm225_vm1, %v12432_v19  ;;  %v1402_v56 = vpop.f32.mrf.mxu0  ;;  %v12435_v19 = vld [vmem:[#allocation80_spill] sm:$0xff] }
 0x13b   : > { %v7576_v39 = vpop.f32.mrf.mxu1  ;;  %v9746_v5 = vadd.f32 %v1402_v56, %v9521_v33 }
 0x13c   : > { %v9736_v58 = vadd.f32 %v7576_v39, %v1528_v37  ;;  %v7532_v25 = vpop.f32.mrf.mxu0  ;;  %v12433_v37 = vld [vmem:[#allocation78_spill] sm:$0xff] }
 0x13d   : > { %v9741_v11 = vpop.f32.mrf.mxu1  ;;  %7831 = vmatmul.mubr.msk.f32.gmra.mxu0 %vm225_vm1, %v12433_v37  ;;  %v1532_v35 = vadd.f32 %v7532_v25, %v9526_v6  ;;  %v12436_v6 = vld [vmem:[#allocation81_spill] sm:$0xff] }
 0x13e   : > { %7833 = vmatprep.mubr.msk.f32.mxu0 %vm225_vm1, %v12434_v50  ;;  %v1412_v39 = vpop.f32.mrf.mxu0 }
 0x13f   : > { %v7579_v10 = vpop.f32.mrf.mxu1  ;;  %v9758_v26 = vadd.f32 %v1412_v39, %v9535_v52  ;;  %v12438_v39 = vld [vmem:[#allocation82_spill] sm:$0xff] }
 0x140   : > { %v9748_v27 = vadd.f32 %v7579_v10, %v1530_v34  ;;  %v7535_v34 = vpop.f32.mrf.mxu0 }
 0x141   : > { %v9753_v40 = vpop.f32.mrf.mxu1  ;;  %7834 = vmatmul.mubr.msk.f32.gmra.mxu0 %vm225_vm1, %v12435_v19  ;;  %v1534_v56 = vadd.f32 %v7535_v34, %v9540_v17  ;;  %v12440_v19 = vld [vmem:[#allocation83_spill] sm:$0xff] }
 0x142   : > { %7836 = vmatprep.mubr.msk.f32.mxu0 %vm225_vm1, %v12436_v6  ;;  %v1422_v25 = vpop.f32.mrf.mxu0 }
 0x143   : > { %v7582_v33 = vpop.f32.mrf.mxu1  ;;  %v9770_v37 = vadd.f32 %v1422_v25, %v9549_v9 }
 0x144   : > { %v9760_v41 = vadd.f32 %v7582_v33, %v1532_v35  ;;  %v7538_v35 = vpop.f32.mrf.mxu0  ;;  %v645_v33 = vadd.f32 %v9431_v7, %v9565_v53 }
 0x145   : > { %v9765_v10 = vpop.f32.mrf.mxu1  ;;  %12437 = vst [vmem:[#allocation25_spill] sm:$0xff] %v9770_v37  ;;  %7837 = vmatmul.mubr.msk.f32.gmra.mxu0 %vm225_vm1, %v12438_v39  ;;  %v1536_v17 = vadd.f32 %v7538_v35, %v9554_v12  ;;  %v12441_v37 = vld [vmem:[#allocation84_spill] sm:$0xff]  ;;  %v12443_v39 = vld [vmem:[#allocation85_spill] sm:$0xff] }
 0x146   : > { %7839 = vmatprep.mubr.msk.f32.mxu0 %vm225_vm1, %v12440_v19  ;;  %v1432_v6 = vpop.f32.mrf.mxu0  ;;  %v1130_v53 = vadd.f32 %v9576_v16, %v645_v33 }
 0x147   : > { %v7585_v52 = vpop.f32.mrf.mxu1  ;;  %v9784_v9 = vadd.f32 %v1432_v6, %v9563_v57 }
 0x148   : > { %v9772_v50 = vadd.f32 %v7585_v52, %v1534_v56  ;;  %v7541_v52 = vpop.f32.mrf.mxu0 }
 0x149   : > { %v9779_v34 = vpop.f32.mrf.mxu1  ;;  %7840 = vmatmul.mubr.msk.f32.gmra.mxu0 %vm225_vm1, %v12441_v37  ;;  %v1538_v12 = vadd.f32 %v7541_v52, %v9569_v0  ;;  %v12447_v0 = vld [vmem:[#allocation87_spill] sm:$0xff] }
 0x14a   : > { %12439 = vst [vmem:[#allocation26_spill] sm:$0xff] %v9779_v34  ;;  %7842 = vmatprep.mubr.msk.f32.mxu0 %vm225_vm1, %v12443_v39  ;;  %v1442_v19 = vpop.f32.mrf.mxu0 }
 0x14b   : > { %v7588_v56 = vpop.f32.mrf.mxu1  ;;  %v9796_v34 = vadd.f32 %v1442_v19, %v1130_v53  ;;  %v12448_v19 = vld [vmem:[#allocation88_spill] sm:$0xff] }
 0x14c   : > { %v9786_v25 = vadd.f32 %v7588_v56, %v1536_v17  ;;  %v7544_v17 = vpop.f32.mrf.mxu0  ;;  %v12445_v56 = vld [vmem:[#allocation86_spill] sm:$0xff] }
 0x14d   : > { %v9792_v35 = vpop.f32.mrf.mxu1  ;;  %12444 = vst [vmem:[#allocation28_spill] sm:$0xff] %v9796_v34  ;;  %7843 = vmatmul.mubr.msk.f32.gmra.mxu0 %vm225_vm1, %v12445_v56  ;;  %v1540_v37 = vadd.f32 %v7544_v17, %v9584_v43  ;;  %v12450_v56 = vld [vmem:[#allocation89_spill] sm:$0xff]  ;;  %v12451_v34 = vld [vmem:[#allocation90_spill] sm:$0xff] }
 0x14e   : > { %12442 = vst [vmem:[#allocation27_spill] sm:$0xff] %v9792_v35  ;;  %7845 = vmatprep.mubr.msk.f32.mxu0 %vm225_vm1, %v12447_v0  ;;  %v9807_v33 = vpop.f32.mrf.mxu0  ;;  %v12457_v35 = vld [vmem:[#allocation93_spill] sm:$0xff] }
 0x14f   : > { %v7591_v57 = vpop.f32.mrf.mxu1 }
 0x150   : > { %v9798_v6 = vadd.f32 %v7591_v57, %v1538_v12  ;;  %v7547_v53 = vpop.f32.mrf.mxu0 }
 0x151   : > { %v9803_v16 = vpop.f32.mrf.mxu1  ;;  %7846 = vmatmul.mubr.msk.f32.gmra.mxu0 %vm225_vm1, %v12448_v19  ;;  %v1542_v12 = vadd.f32 %v7547_v53, %v9599_v28  ;;  %v12453_v19 = vld [vmem:[#allocation91_spill] sm:$0xff] }
 0x152   : > { %12446 = vst [vmem:[#allocation29_spill] sm:$0xff] %v9803_v16  ;;  %7848 = vmatprep.mubr.msk.f32.mxu0 %vm225_vm1, %v12450_v56  ;;  %v9818_v43 = vpop.f32.mrf.mxu0 }
 0x153   : > { %v7594_v52 = vpop.f32.mrf.mxu1 }
 0x154   : > { %v9809_v39 = vadd.f32 %v7594_v52, %v1540_v37  ;;  %v7550_v16 = vpop.f32.mrf.mxu0 }
 0x155   : > { %v9814_v57 = vpop.f32.mrf.mxu1  ;;  %7849 = vmatmul.mubr.msk.f32.gmra.mxu0 %vm225_vm1, %v12451_v34  ;;  %v1544_v37 = vadd.f32 %v7550_v16, %v9614_v24  ;;  %v12455_v34 = vld [vmem:[#allocation92_spill] sm:$0xff]  ;;  %v2906_v24 = vrot.slane %v9627_v21, 2  ;;  %v2909_v21 = vrot.slane %v9646_v20, 2 }
 0x156   : > { %12449 = vst [vmem:[#allocation36_spill] sm:$0xff] %v9814_v57  ;;  %7851 = vmatprep.mubr.msk.f32.mxu0 %vm225_vm1, %v12453_v19  ;;  %v9829_v28 = vpop.f32.mrf.mxu0  ;;  %v2907_v19 = vrot.slane %v9629_v15, 2 }
 0x157   : > { %v7597_v17 = vpop.f32.mrf.mxu1 }
 0x158   : > { %v9820_v0 = vadd.f32 %v7597_v17, %v1542_v12  ;;  %v7553_v57 = vpop.f32.mrf.mxu0  ;;  %v2908_v15 = vsel %vm1148_vm5, %v2906_v24, %v2907_v19 }
 0x159   : > { %v9825_v52 = vpop.f32.mrf.mxu1  ;;  %7852 = vmatmul.mubr.msk.f32.gmra.mxu0 %vm225_vm1, %v9253_v22  ;;  %v1546_v12 = vadd.f32 %v7553_v57, %v9633_v61 }
 0x15a   : > { %12452 = vst [vmem:[#allocation40_spill] sm:$0xff] %v9825_v52  ;;  %7854 = vmatprep.mubr.msk.f32.mxu0 %vm225_vm1, %v12455_v34  ;;  %v9841_v16 = vpop.f32.mrf.mxu0 }
 0x15b   : > { %v7600_v53 = vpop.f32.mrf.mxu1  ;;  %12456 = vst [vmem:[#allocation45_spill] sm:$0xff] %v9841_v16 }
 0x15c   : > { %v9831_v56 = vadd.f32 %v7600_v53, %v1544_v37  ;;  %v7556_v53 = vpop.f32.mrf.mxu0 }
 0x15d   : > { %v9836_v17 = vpop.f32.mrf.mxu1  ;;  %7855 = vmatmul.mubr.msk.f32.gmra.mxu0 %vm225_vm1, %v12457_v35  ;;  %v1548_v22 = vadd.f32 %v7556_v53, %v9652_v31 }
 0x15e   : > { %12454 = vst [vmem:[#allocation44_spill] sm:$0xff] %v9836_v17  ;;  %7857 = vmatprep.mubr.msk.f32.mxu0 %vm225_vm1, %v9424_v60  ;;  %v9854_v57 = vpop.f32.mrf.mxu0  ;;  %v2910_v60 = vsel %vm1148_vm5, %v2907_v19, %v2909_v21 }
 0x15f   : > { %v7603_v52 = vpop.f32.mrf.mxu1  ;;  %12459 = vst [vmem:[#allocation48_spill] sm:$0xff] %v9854_v57 }
 0x160   : > { %v9844_v37 = vadd.f32 %v7603_v52, %v1546_v12  ;;  %v7559_v12 = vpop.f32.mrf.mxu0 }
 0x161   : > { %v9849_v61 = vpop.f32.mrf.mxu1  ;;  %7858 = vmatmul.mubr.msk.f32.gmra.mxu0 %vm225_vm1, %v9438_v45  ;;  %v1550_v31 = vadd.f32 %v7559_v12, %v9669_v63 }
 0x162   : > { %12458 = vst [vmem:[#allocation47_spill] sm:$0xff] %v9849_v61  ;;  %7860 = vmatprep.mubr.msk.f32.mxu0 %vm225_vm1, %v2908_v15  ;;  %v9866_v20 = vpop.f32.mrf.mxu0 }
 0x163   : > { %v7606_v34 = vpop.f32.mrf.mxu1  ;;  %12461 = vst [vmem:[#allocation51_spill] sm:$0xff] %v9866_v20 }
 0x164   : > { %v9857_v52 = vadd.f32 %v7606_v34, %v1548_v22  ;;  %v7562_v24 = vpop.f32.mrf.mxu0 }
 0x165   : > { %v9862_v35 = vpop.f32.mrf.mxu1  ;;  %7861 = vmatmul.mubr.msk.f32.gmra.mxu0 %vm225_vm1, %v2910_v60  ;;  %v1552_v22 = vadd.f32 %v7562_v24, %v9683_v48 }
 0x166   : > { %12460 = vst [vmem:[#allocation50_spill] sm:$0xff] %v9862_v35  ;;  %v9874_v45 = vpop.f32.mrf.mxu0  ;;  %v3241_v35 = vld [vmem:[#allocation2 + $0x8] sm:$0xff] }
 0x167   : > { %v7609_v53 = vpop.f32.mrf.mxu1  ;;  %12463 = vst [vmem:[#allocation54_spill] sm:$0xff] %v9874_v45  ;;  %v3242_v45 = vld [vmem:[#allocation2 + $0x10] sm:$0x3] }
 0x168   : > { %v9868_v61 = vadd.f32 %v7609_v53, %v1550_v31  ;;  %v7617_v15 = vpop.f32.mrf.mxu0 }
 0x169   : > { %v9872_v34 = vpop.f32.mrf.mxu1  ;;  %v9879_v19 = vadd.f32 %v7617_v15, %v9695_v42 }
 0x16a   : > { %12462 = vst [vmem:[#allocation53_spill] sm:$0xff] %v9872_v34  ;;  %v9883_v31 = vpop.f32.mrf.mxu0 }
 0x16b   : > { %v7612_v63 = vpop.f32.mrf.mxu1 }
 0x16c   : > { %v9876_v12 = vadd.f32 %v7612_v63, %v1552_v22  ;;  %v7620_v60 = vpop.f32.mrf.mxu0  ;;  %v3240_v63 = vld [vmem:[#allocation2] sm:$0xff] }
 0x16d   : > { %v9881_v21 = vpop.f32.mrf.mxu1  ;;  %v9888_v48 = vadd.f32 %v7620_v60, %v9707_v8  ;;  %7865 = vmatprep.mubr.msk.f32.mxu1 %vm225_vm1, %v3240_v63  ;;  %v3643_v15 = vrot.slane %v3240_v63, 1  ;;  %v6543_v8 = vld [vmem:[%s12099_s3 + $0x4] sm:$0xf]  ;;  %v3646_v60 = vrot.slane %v3242_v45, 1 }
 0x16e   : > { %12464 = vst [vmem:[#allocation56_spill] sm:$0xff] %v9881_v21  ;;  %v9892_v34 = vpop.f32.mrf.mxu0  ;;  %v3644_v21 = vrot.slane %v3241_v35, 1  ;;  %7866 = vmatmul.mubr.msk.f32.vlgmr.msra.gmra.mxu1 %vm225_vm1, %v3241_v35  ;;  %7913 = vmatprep.subr.msk.mxu0 %vm494_vm0, %v6543_v8 }
 0x16f   : > { %v9885_v53 = vpop.f32.mrf.mxu1  ;;  %7914 = vmatpush3.msk.msra.mxu0 %vm494_vm0, %v6543_v8 }
 0x170   : > { %v7623_v42 = vpop.f32.mrf.mxu0  ;;  %v3645_v63 = vsel %vm741_vm4, %v3643_v15, %v3644_v21  ;;  %v6577_v15 = vld [vmem:[%s12099_s3 + $0x8] sm:$0xf] }
 0x171   : > { %v9890_v24 = vpop.f32.mrf.mxu1  ;;  %v9898_v20 = vadd.f32 %v7623_v42, %v9719_v36  ;;  %7915 = vmatprep.mubr.msk.f32.mxu0 %vm225_vm1, %v3645_v63  ;;  %v3647_v36 = vsel %vm741_vm4, %v3644_v21, %v3646_v60  ;;  %7963 = vmatprep.subr.msk.mxu1 %vm494_vm0, %v6577_v15 }
 0x172   : > { %v9906_v16 = vpop.f32.mrf.mxu0  ;;  %7916 = vmatmul.mubr.msk.f32.vlgmr.msra.gmra.mxu0 %vm225_vm1, %v3647_v36  ;;  %7964 = vmatpush3.msk.msra.mxu1 %vm494_vm0, %v6577_v15 }
 0x173   : > { %v9894_v22 = vpop.f32.mrf.mxu1  ;;  %12465 = vst [vmem:[#allocation57_spill] sm:$0xff] %v9898_v20 }
 0x174   : > { %v7626_v42 = vpop.f32.mrf.mxu0 }
 0x175   : > { %v9900_v57 = vpop.f32.mrf.mxu1  ;;  %v9917_v35 = vadd.f32 %v7626_v42, %v9736_v58 }
 0x176   : > { %12466 = vst [vmem:[#allocation59_spill] sm:$0xff] %v9900_v57  ;;  %v9921_v20 = vpop.f32.mrf.mxu0 }
 0x177   : > { %v9910_v17 = vpop.f32.mrf.mxu1  ;;  %12467 = vst [vmem:[#allocation60_spill] sm:$0xff] %v9917_v35  ;;  %12468 = vst [vmem:[#allocation61_spill] sm:$0xff] %v9921_v20 }
 0x178   : > { %v7629_v8 = vpop.f32.mrf.mxu0 }
 0x179   : > { %v9919_v45 = vpop.f32.mrf.mxu1  ;;  %v9930_v21 = vadd.f32 %v7629_v8, %v9748_v27 }
 0x17a   : > { %v9935_v58 = vpop.f32.mrf.mxu0 }
 0x17b   : > { %v9923_v57 = vpop.f32.mrf.mxu1  ;;  %12470 = vst [vmem:[#allocation63_spill] sm:$0xff] %v9930_v21 }
 0x17c   : > { %12469 = vst [vmem:[#allocation62_spill] sm:$0xff] %v9923_v57  ;;  %v7632_v36 = vpop.f32.mrf.mxu0 }
 0x17d   : > { %v9932_v60 = vpop.f32.mrf.mxu1  ;;  %v9940_v42 = vadd.f32 %v7632_v36, %v9760_v41 }
 0x17e   : > { %12471 = vst [vmem:[#allocation64_spill] sm:$0xff] %v9932_v60  ;;  %v9944_v35 = vpop.f32.mrf.mxu0 }
 0x17f   : > { %v9937_v63 = vpop.f32.mrf.mxu1  ;;  %12473 = vst [vmem:[#allocation66_spill] sm:$0xff] %v9940_v42 }
 0x180   : > { %12472 = vst [vmem:[#allocation65_spill] sm:$0xff] %v9937_v63  ;;  %v7635_v27 = vpop.f32.mrf.mxu0 }
 0x181   : > { %v9942_v57 = vpop.f32.mrf.mxu1  ;;  %v9949_v8 = vadd.f32 %v7635_v27, %v9772_v50 }
 0x182   : > { %12474 = vst [vmem:[#allocation30_spill] sm:$0xff] %v9942_v57  ;;  %v9953_v15 = vpop.f32.mrf.mxu0 }
 0x183   : > { %v9946_v20 = vpop.f32.mrf.mxu1  ;;  %12476 = vst [vmem:[#allocation46_spill] sm:$0xff] %v9949_v8  ;;  %12478 = vst [vmem:[#allocation52_spill] sm:$0xff] %v9953_v15 }
 0x184   : > { %12475 = vst [vmem:[#allocation42_spill] sm:$0xff] %v9946_v20  ;;  %v7638_v63 = vpop.f32.mrf.mxu0 }
 0x185   : > { %v9951_v21 = vpop.f32.mrf.mxu1  ;;  %v9958_v41 = vadd.f32 %v7638_v63, %v9786_v25 }
 0x186   : > { %12477 = vst [vmem:[#allocation49_spill] sm:$0xff] %v9951_v21  ;;  %v9962_v42 = vpop.f32.mrf.mxu0 }
 0x187   : > { %v9955_v60 = vpop.f32.mrf.mxu1  ;;  %12480 = vst [vmem:[#allocation58_spill] sm:$0xff] %v9958_v41  ;;  %12482 = vst [vmem:[#allocation67_spill] sm:$0xff] %v9962_v42 }
 0x188   : > { %12479 = vst [vmem:[#allocation55_spill] sm:$0xff] %v9955_v60  ;;  %v7641_v20 = vpop.f32.mrf.mxu0 }
 0x189   : > { %v9960_v36 = vpop.f32.mrf.mxu1  ;;  %v9967_v50 = vadd.f32 %v7641_v20, %v9798_v6 }
 0x18a   : > { %12481 = vst [vmem:[#allocation94_spill] sm:$0xff] %v9960_v36  ;;  %v9971_v8 = vpop.f32.mrf.mxu0 }
 0x18b   : > { %v9964_v57 = vpop.f32.mrf.mxu1  ;;  %12484 = vst [vmem:[#allocation69_spill] sm:$0xff] %v9967_v50  ;;  %12486 = vst [vmem:[#allocation71_spill] sm:$0xff] %v9971_v8 }
 0x18c   : > { %12483 = vst [vmem:[#allocation68_spill] sm:$0xff] %v9964_v57  ;;  %v7644_v60 = vpop.f32.mrf.mxu0 }
 0x18d   : > { %v9969_v27 = vpop.f32.mrf.mxu1  ;;  %v9976_v25 = vadd.f32 %v7644_v60, %v9809_v39 }
 0x18e   : > { %12485 = vst [vmem:[#allocation70_spill] sm:$0xff] %v9969_v27  ;;  %v9980_v41 = vpop.f32.mrf.mxu0 }
 0x18f   : > { %v9973_v21 = vpop.f32.mrf.mxu1  ;;  %12488 = vst [vmem:[#allocation73_spill] sm:$0xff] %v9976_v25  ;;  %12490 = vst [vmem:[#allocation75_spill] sm:$0xff] %v9980_v41 }
 0x190   : > { %12487 = vst [vmem:[#allocation72_spill] sm:$0xff] %v9973_v21  ;;  %v7647_v57 = vpop.f32.mrf.mxu0 }
 0x191   : > { %v9978_v63 = vpop.f32.mrf.mxu1  ;;  %v9985_v6 = vadd.f32 %v7647_v57, %v9820_v0 }
 0x192   : > { %12489 = vst [vmem:[#allocation74_spill] sm:$0xff] %v9978_v63  ;;  %v9989_v50 = vpop.f32.mrf.mxu0 }
 0x193   : > { %v9982_v36 = vpop.f32.mrf.mxu1  ;;  %12492 = vst [vmem:[#allocation77_spill] sm:$0xff] %v9985_v6  ;;  %12494 = vst [vmem:[#allocation79_spill] sm:$0xff] %v9989_v50 }
 0x194   : > { %12491 = vst [vmem:[#allocation76_spill] sm:$0xff] %v9982_v36  ;;  %v7650_v21 = vpop.f32.mrf.mxu0 }
 0x195   : > { %v9987_v20 = vpop.f32.mrf.mxu1  ;;  %v9994_v39 = vadd.f32 %v7650_v21, %v9831_v56 }
 0x196   : > { %12493 = vst [vmem:[#allocation78_spill] sm:$0xff] %v9987_v20  ;;  %v9998_v25 = vpop.f32.mrf.mxu0 }
 0x197   : > { %v9991_v27 = vpop.f32.mrf.mxu1  ;;  %12496 = vst [vmem:[#allocation81_spill] sm:$0xff] %v9994_v39  ;;  %12498 = vst [vmem:[#allocation83_spill] sm:$0xff] %v9998_v25 }
 0x198   : > { %12495 = vst [vmem:[#allocation80_spill] sm:$0xff] %v9991_v27  ;;  %v7653_v36 = vpop.f32.mrf.mxu0 }
 0x199   : > { %v9996_v60 = vpop.f32.mrf.mxu1  ;;  %v10003_v0 = vadd.f32 %v7653_v36, %v9844_v37 }
 0x19a   : > { %12497 = vst [vmem:[#allocation82_spill] sm:$0xff] %v9996_v60  ;;  %v10007_v6 = vpop.f32.mrf.mxu0 }
 0x19b   : > { %v10000_v63 = vpop.f32.mrf.mxu1  ;;  %12500 = vst [vmem:[#allocation85_spill] sm:$0xff] %v10003_v0  ;;  %12502 = vst [vmem:[#allocation87_spill] sm:$0xff] %v10007_v6 }
 0x19c   : > { %12499 = vst [vmem:[#allocation84_spill] sm:$0xff] %v10000_v63  ;;  %v7656_v27 = vpop.f32.mrf.mxu0 }
 0x19d   : > { %v10005_v57 = vpop.f32.mrf.mxu1  ;;  %v10012_v56 = vadd.f32 %v7656_v27, %v9857_v52 }
 0x19e   : > { %12501 = vst [vmem:[#allocation86_spill] sm:$0xff] %v10005_v57  ;;  %v10016_v39 = vpop.f32.mrf.mxu0 }
 0x19f   : > { %v10009_v50 = vpop.f32.mrf.mxu1  ;;  %12504 = vst [vmem:[#allocation89_spill] sm:$0xff] %v10012_v56  ;;  %12506 = vst [vmem:[#allocation91_spill] sm:$0xff] %v10016_v39 }
 0x1a0   : > { %12503 = vst [vmem:[#allocation88_spill] sm:$0xff] %v10009_v50  ;;  %v7659_v63 = vpop.f32.mrf.mxu0 }
 0x1a1   : > { %v10014_v21 = vpop.f32.mrf.mxu1  ;;  %v10021_v37 = vadd.f32 %v7659_v63, %v9868_v61 }
 0x1a2   : > { %12505 = vst [vmem:[#allocation90_spill] sm:$0xff] %v10014_v21  ;;  %v10025_v0 = vpop.f32.mrf.mxu0 }
 0x1a3   : > { %v10018_v25 = vpop.f32.mrf.mxu1  ;;  %12508 = vst [vmem:[#allocation93_spill] sm:$0xff] %v10021_v37  ;;  %12510 = vst [vmem:[#allocation96_spill] sm:$0xff] %v10025_v0 }
 0x1a4   : > { %12507 = vst [vmem:[#allocation92_spill] sm:$0xff] %v10018_v25  ;;  %v7662_v50 = vpop.f32.mrf.mxu0 }
 0x1a5   : > { %v10023_v36 = vpop.f32.mrf.mxu1  ;;  %v10030_v52 = vadd.f32 %v7662_v50, %v9876_v12 }
 0x1a6   : > { %12509 = vst [vmem:[#allocation95_spill] sm:$0xff] %v10023_v36  ;;  %v10034_v56 = vpop.f32.mrf.mxu0  ;;  %v6645_v36 = vld [vmem:[%s12099_s3 + $0x10] sm:$0xf] }
 0x1a7   : > { %v10027_v6 = vpop.f32.mrf.mxu1  ;;  %12512 = vst [vmem:[#allocation98_spill] sm:$0xff] %v10030_v52  ;;  %12514 = vst [vmem:[#allocation100_spill] sm:$0xff] %v10034_v56  ;;  %8063 = vmatprep.subr.msk.mxu1 %vm494_vm0, %v6645_v36 }
 0x1a8   : > { %12511 = vst [vmem:[#allocation97_spill] sm:$0xff] %v10027_v6  ;;  %v10038_v25 = vpop.f32.mrf.mxu0 }
 0x1a9   : > { %v10032_v27 = vpop.f32.mrf.mxu1 }
 0x1aa   : > { %12513 = vst [vmem:[#allocation99_spill] sm:$0xff] %v10032_v27  ;;  %v10042_v63 = vpop.f32.mrf.mxu0 }
 0x1ab   : > { %v10036_v39 = vpop.f32.mrf.mxu1 }
 0x1ac   : > { %12515 = vst [vmem:[#allocation101_spill] sm:$0xff] %v10036_v39  ;;  %v10046_v0 = vpop.f32.mrf.mxu0  ;;  %v6611_v39 = vld [vmem:[%s12099_s3 + $0xc] sm:$0xf] }
 0x1ad   : > { %v10040_v61 = vpop.f32.mrf.mxu1  ;;  %8013 = vmatprep.subr.msk.mxu0 %vm494_vm0, %v6611_v39 }
 0x1ae   : > { %12516 = vst [vmem:[#allocation102_spill] sm:$0xff] %v10040_v61  ;;  %v10050_v12 = vpop.f32.mrf.mxu0  ;;  %8014 = vmatpush3.msk.msra.mxu0 %vm494_vm0, %v6611_v39 }
 0x1af   : > { %v10044_v37 = vpop.f32.mrf.mxu1 }
 0x1b0   : > { %v10054_v52 = vpop.f32.mrf.mxu0 }
 0x1b1   : > { %v10048_v6 = vpop.f32.mrf.mxu1 }
 0x1b2   : > { %v10062_v61 = vpop.f32.mrf.mxu0 }
 0x1b3   : > { %v10052_v50 = vpop.f32.mrf.mxu1 }
 0x1b4   : > { %v10065_v27 = vpop.f32.mrf.mxu0 }
 0x1b5   : > { %v10059_v56 = vpop.f32.mrf.mxu1  ;;  %12517 = vst [vmem:[#allocation103_spill] sm:$0xff] %v10065_v27 }
 0x1b6   : > { %v10073_v57 = vpop.f32.mrf.mxu0 }
 0x1b7   : > { %v10070_v21 = vpop.f32.mrf.mxu1  ;;  %12519 = vst [vmem:[#allocation105_spill] sm:$0xff] %v10073_v57 }
 0x1b8   : > { %12518 = vst [vmem:[#allocation104_spill] sm:$0xff] %v10070_v21  ;;  %v10075_v60 = vpop.f32.mrf.mxu0 }
 0x1b9   : > { %12520 = vst [vmem:[#allocation106_spill] sm:$0xff] %v10075_v60  ;;  %v10077_v20 = vpop.f32.mrf.mxu1 }
 0x1ba   : > { %12521 = vst [vmem:[#allocation107_spill] sm:$0xff] %v10077_v20  ;;  %v10079_v41 = vpop.f32.mrf.mxu0 }
 0x1bb   : > { %12522 = vst [vmem:[#allocation108_spill] sm:$0xff] %v10079_v41  ;;  %v10083_v39 = vpop.f32.mrf.mxu1 }
 0x1bc   : > { %v10081_v8 = vpop.f32.mrf.mxu0  ;;  %12524 = vst [vmem:[#allocation110_spill] sm:$0xff] %v10083_v39 }
 0x1bd   : > { %12523 = vst [vmem:[#allocation109_spill] sm:$0xff] %v10081_v8  ;;  %v10089_v27 = vpop.f32.mrf.mxu1 }
 0x1be   : > { %v10085_v42 = vpop.f32.mrf.mxu0  ;;  %12527 = vst [vmem:[#allocation113_spill] sm:$0xff] %v10089_v27 }
 0x1bf   : > { %12525 = vst [vmem:[#allocation111_spill] sm:$0xff] %v10085_v42  ;;  %v10095_v57 = vpop.f32.mrf.mxu1 }
 0x1c0   : > { %v10087_v15 = vpop.f32.mrf.mxu0  ;;  %12530 = vst [vmem:[#allocation116_spill] sm:$0xff] %v10095_v57 }
 0x1c1   : > { %12526 = vst [vmem:[#allocation112_spill] sm:$0xff] %v10087_v15  ;;  %v10101_v41 = vpop.f32.mrf.mxu1 }
 0x1c2   : > { %v10091_v21 = vpop.f32.mrf.mxu0  ;;  %12533 = vst [vmem:[#allocation119_spill] sm:$0xff] %v10101_v41 }
 0x1c3   : > { %12528 = vst [vmem:[#allocation114_spill] sm:$0xff] %v10091_v21  ;;  %v10107_v42 = vpop.f32.mrf.mxu1 }
 0x1c4   : > { %v10093_v36 = vpop.f32.mrf.mxu0 }
 0x1c5   : > { %12529 = vst [vmem:[#allocation115_spill] sm:$0xff] %v10093_v36  ;;  %v10113_v21 = vpop.f32.mrf.mxu1 }
 0x1c6   : > { %v10097_v60 = vpop.f32.mrf.mxu0 }
 0x1c7   : > { %12531 = vst [vmem:[#allocation117_spill] sm:$0xff] %v10097_v60  ;;  %v10119_v60 = vpop.f32.mrf.mxu1 }
 0x1c8   : > { %v10099_v20 = vpop.f32.mrf.mxu0  ;;  %12540 = vst [vmem:[#allocation126_spill] sm:$0xff] %v10119_v60 }
 0x1c9   : > { %12532 = vst [vmem:[#allocation118_spill] sm:$0xff] %v10099_v20 }
 0x1ca   : > { %v10103_v8 = vpop.f32.mrf.mxu0 }
 0x1cb   : > { %12534 = vst [vmem:[#allocation120_spill] sm:$0xff] %v10103_v8  ;;  %v10125_v8 = vpop.f32.mrf.mxu1 }
 0x1cc   : > { %v10105_v39 = vpop.f32.mrf.mxu0  ;;  %12543 = vst [vmem:[#allocation129_spill] sm:$0xff] %v10125_v8 }
 0x1cd   : > { %12535 = vst [vmem:[#allocation121_spill] sm:$0xff] %v10105_v39  ;;  %v10139_v60 = vpop.f32.mrf.mxu1 }
 0x1ce   : > { %v10109_v15 = vpop.f32.mrf.mxu0  ;;  %12546 = vst [vmem:[#allocation132_spill] sm:$0xff] %v10139_v60 }
 0x1cf   : > { %12536 = vst [vmem:[#allocation122_spill] sm:$0xff] %v10109_v15  ;;  %v655_v15 = vadd.f32 %v9431_v7, %v9580_v32  ;;  %v705_v32 = vadd.f32 %v9431_v7, %v9665_v3  ;;  %v2333_v3 = vadd.f32 %v9885_v53, %v9879_v19  ;;  %v10161_v8 = vpop.f32.mrf.mxu1  ;;  %v1793_v19 = vadd.f32 %v9727_v14, %v9717_v51 }
 0x1d0   : > { %v10111_v27 = vpop.f32.mrf.mxu0  ;;  %v2335_v53 = vadd.f32 %v9894_v22, %v9888_v48  ;;  %v12553_v48 = vld [vmem:[#allocation59_spill] sm:$0xff] }
 0x1d1   : > { %12537 = vst [vmem:[#allocation123_spill] sm:$0xff] %v10111_v27  ;;  %v10188_v14 = vpop.f32.mrf.mxu1 }
 0x1d2   : > { %v10115_v36 = vpop.f32.mrf.mxu0 }
 0x1d3   : > { %12538 = vst [vmem:[#allocation124_spill] sm:$0xff] %v10115_v36  ;;  %v665_v36 = vadd.f32 %v9431_v7, %v9595_v30  ;;  %v715_v30 = vadd.f32 %v9431_v7, %v9680_v23 }
 0x1d4   : > { %v10117_v57 = vpop.f32.mrf.mxu0 }
 0x1d5   : > { %12539 = vst [vmem:[#allocation125_spill] sm:$0xff] %v10117_v57  ;;  %v675_v57 = vadd.f32 %v9431_v7, %v9610_v55  ;;  %v1134_v60 = vadd.f32 %v9606_v29, %v665_v36 }
 0x1d6   : > { %v10121_v20 = vpop.f32.mrf.mxu0 }
 0x1d7   : > { %12541 = vst [vmem:[#allocation127_spill] sm:$0xff] %v10121_v20  ;;  %v1789_v20 = vadd.f32 %v9700_v1, %v9693_v38  ;;  %v1132_v38 = vadd.f32 %v9591_v46, %v655_v15  ;;  %v1142_v46 = vadd.f32 %v9676_v49, %v705_v32  ;;  %v12556_v32 = vld [vmem:[#allocation45_spill] sm:$0xff] }
 0x1d8   : > { %v10123_v41 = vpop.f32.mrf.mxu0 }
 0x1d9   : > { %12542 = vst [vmem:[#allocation128_spill] sm:$0xff] %v10123_v41  ;;  %v685_v41 = vadd.f32 %v9431_v7, %v9625_v62  ;;  %v2061_v55 = vadd.f32 %v9883_v31, %v1789_v20  ;;  %v1136_v62 = vadd.f32 %v9621_v59, %v675_v57  ;;  %v1144_v31 = vadd.f32 %v9688_v4, %v715_v30 }
 0x1da   : > { %v10127_v39 = vpop.f32.mrf.mxu0  ;;  %v1539_v29 = vadd.f32 %v9807_v33, %v1132_v38  ;;  %v1797_v33 = vadd.f32 %v9753_v40, %v9746_v5  ;;  %v2065_v5 = vadd.f32 %v9906_v16, %v1793_v19  ;;  %v2603_v57 = vadd.f32 %v10046_v0, %v2335_v53  ;;  %v12557_v16 = vld [vmem:[#allocation48_spill] sm:$0xff] }
 0x1db   : > { %12544 = vst [vmem:[#allocation130_spill] sm:$0xff] %v10127_v39  ;;  %v695_v39 = vadd.f32 %v9431_v7, %v9648_v54  ;;  %v1791_v54 = vadd.f32 %v9712_v18, %v9705_v47  ;;  %v1138_v7 = vadd.f32 %v9640_v44, %v685_v41  ;;  %v2332_v59 = vadd.f32 %v9890_v24, %v2061_v55  ;;  %v12550_v41 = vld [vmem:[#allocation28_spill] sm:$0xff] }
 0x1dc   : > { %v10131_v27 = vpop.f32.mrf.mxu0  ;;  %v2601_v18 = vadd.f32 %v10038_v25, %v2333_v3  ;;  %v1795_v44 = vadd.f32 %v9741_v11, %v9734_v13  ;;  %v1543_v49 = vadd.f32 %v9829_v28, %v1136_v62  ;;  %v12547_v13 = vld [vmem:[#allocation25_spill] sm:$0xff]  ;;  %v12548_v11 = vld [vmem:[#allocation26_spill] sm:$0xff]  ;;  %v12549_v28 = vld [vmem:[#allocation27_spill] sm:$0xff]  ;;  %v2875_v53 = vadd.f32 %v10052_v50, %v2603_v57 }
 0x1dd   : > { %12545 = vst [vmem:[#allocation131_spill] sm:$0xff] %v10131_v27  ;;  %v1140_v23 = vadd.f32 %v9660_v2, %v695_v39  ;;  %v2063_v47 = vadd.f32 %v9892_v34, %v1791_v54  ;;  %v1541_v2 = vadd.f32 %v9818_v43, %v1134_v60  ;;  %v1799_v34 = vadd.f32 %v9765_v10, %v9758_v26  ;;  %v12551_v25 = vld [vmem:[#allocation29_spill] sm:$0xff]  ;;  %v12552_v26 = vld [vmem:[#allocation36_spill] sm:$0xff] }
 0x1de   : > { %v10149_v27 = vpop.f32.mrf.mxu0  ;;  %v2600_v51 = vadd.f32 %v10042_v63, %v2332_v59  ;;  %v1801_v43 = vadd.f32 %v12548_v11, %v12547_v13  ;;  %v1803_v24 = vadd.f32 %v12549_v28, %v9784_v9  ;;  %v1805_v20 = vadd.f32 %v12551_v25, %v12550_v41  ;;  %v12554_v63 = vld [vmem:[#allocation40_spill] sm:$0xff]  ;;  %v12558_v62 = vld [vmem:[#allocation57_spill] sm:$0xff]  ;;  %v12559_v59 = vld [vmem:[#allocation51_spill] sm:$0xff] }
 0x1df   : > { %v10200_v10 = vadd.f32 %v12552_v26, %v1539_v29  ;;  %v2334_v22 = vadd.f32 %v12553_v48, %v2063_v47  ;;  %v2873_v60 = vadd.f32 %v10044_v37, %v2601_v18  ;;  %v10206_v39 = vadd.f32 %v12554_v63, %v1541_v2  ;;  %v12555_v9 = vld [vmem:[#allocation44_spill] sm:$0xff]  ;;  %v10217_v29 = vpop.f32.mrf.mxu1  ;;  %v12560_v18 = vld [vmem:[#allocation54_spill] sm:$0xff]  ;;  %v12566_v48 = vld [vmem:[#allocation53_spill] sm:$0xff] }
 0x1e0   : > { %v10153_v1 = vpop.f32.mrf.mxu0  ;;  %v10209_v36 = vadd.f32 %v12555_v9, %v1543_v49  ;;  %v1545_v30 = vadd.f32 %v12556_v32, %v1138_v7  ;;  %v1547_v55 = vadd.f32 %v12557_v16, %v1140_v23  ;;  %v2337_v54 = vadd.f32 %v9910_v17, %v12558_v62  ;;  %v12561_v7 = vld [vmem:[#allocation61_spill] sm:$0xff]  ;;  %v12563_v11 = vld [vmem:[#allocation50_spill] sm:$0xff]  ;;  %v12568_v63 = vld [vmem:[#allocation64_spill] sm:$0xff] }
 0x1e1   : > { %v2872_v3 = vadd.f32 %v10048_v6, %v2600_v51  ;;  %v2602_v37 = vadd.f32 %v10050_v12, %v2334_v22  ;;  %v1549_v47 = vadd.f32 %v12559_v59, %v1142_v46  ;;  %v1551_v19 = vadd.f32 %v12560_v18, %v1144_v31  ;;  %v12562_v51 = vld [vmem:[#allocation47_spill] sm:$0xff]  ;;  %v12564_v46 = vld [vmem:[#allocation60_spill] sm:$0xff]  ;;  %v12565_v41 = vld [vmem:[#allocation62_spill] sm:$0xff] }
 0x1e2   : > { %v10167_v15 = vpop.f32.mrf.mxu0  ;;  %v2336_v2 = vadd.f32 %v9919_v45, %v2065_v5  ;;  %v2067_v49 = vadd.f32 %v12561_v7, %v1795_v44  ;;  %v2605_v17 = vadd.f32 %v10054_v52, %v2337_v54  ;;  %v10226_v12 = vadd.f32 %v12562_v51, %v1545_v30  ;;  %v10236_v5 = vpop.f32.mrf.mxu1  ;;  %v12572_v62 = vld [vmem:[#allocation65_spill] sm:$0xff]  ;;  %v12578_v7 = vld [vmem:[#allocation107_spill] sm:$0xff]  ;;  %v12580_v51 = vld [vmem:[#allocation46_spill] sm:$0xff] }
 0x1e3   : > { %v10229_v28 = vadd.f32 %v12563_v11, %v1547_v55  ;;  %v2339_v31 = vadd.f32 %v12565_v41, %v12564_v46  ;;  %v2069_v45 = vadd.f32 %v9935_v58, %v1797_v33  ;;  %v2874_v44 = vadd.f32 %v10059_v56, %v2602_v37  ;;  %v12569_v56 = vld [vmem:[#allocation104_spill] sm:$0xff]  ;;  %v12581_v11 = vld [vmem:[#allocation55_spill] sm:$0xff] }
 0x1e4   : > { %v10179_v4 = vpop.f32.mrf.mxu0  ;;  %v2604_v50 = vadd.f32 %v10062_v61, %v2336_v2  ;;  %v10240_v22 = vadd.f32 %v12566_v48, %v1549_v47  ;;  %v2338_v9 = vadd.f32 %v12568_v63, %v2067_v49  ;;  %v2071_v58 = vadd.f32 %v9944_v35, %v1799_v34  ;;  %v12570_v61 = vld [vmem:[#allocation103_spill] sm:$0xff]  ;;  %v12575_v47 = vld [vmem:[#allocation105_spill] sm:$0xff]  ;;  %v12576_v35 = vld [vmem:[#allocation66_spill] sm:$0xff] }
 0x1e5   : > { %v2877_v32 = vadd.f32 %v12569_v56, %v2605_v17  ;;  %v2607_v30 = vadd.f32 %v12570_v61, %v2339_v31  ;;  %v12577_v34 = vld [vmem:[#allocation42_spill] sm:$0xff]  ;;  %v2345_v46 = vadd.f32 %v12581_v11, %v12580_v51  ;;  %v12582_v41 = vld [vmem:[#allocation67_spill] sm:$0xff]  ;;  %v12588_v56 = vld [vmem:[#allocation68_spill] sm:$0xff] }
 0x1e6   : > { %v10197_v40 = vpop.f32.mrf.mxu0  ;;  %v2606_v18 = vadd.f32 %v12575_v47, %v2338_v9  ;;  %v2343_v2 = vadd.f32 %v12577_v34, %v12576_v35  ;;  %v2876_v49 = vadd.f32 %v12578_v7, %v2604_v50  ;;  %v2075_v31 = vadd.f32 %v12582_v41, %v1803_v24  ;;  %v12584_v50 = vld [vmem:[#allocation110_spill] sm:$0xff]  ;;  %v12589_v24 = vld [vmem:[#allocation75_spill] sm:$0xff]  ;;  %v12590_v61 = vld [vmem:[#allocation113_spill] sm:$0xff] }
 0x1e7   : > { %v12586_v9 = vld [vmem:[#allocation94_spill] sm:$0xff]  ;;  %v12594_v34 = vld [vmem:[#allocation69_spill] sm:$0xff]  ;;  %v12599_v11 = vld [vmem:[#allocation116_spill] sm:$0xff] }
 0x1e8   : > { %v7817_v38 = vpop.f32.mrf.mxu0 }
 0x1e9   : > { %v3144_v0 = vadd.f32 %v7817_v38, %v2873_v60  ;;  %v12567_v60 = vld [vmem:[#allocation56_spill] sm:$0xff]  ;;  %v12571_v38 = vld [vmem:[#allocation63_spill] sm:$0xff] }
 0x1ea   : > { %v2984_v23 = vpop.f32.mrf.mxu0  ;;  %v10243_v57 = vadd.f32 %v12567_v60, %v1551_v19  ;;  %v2341_v54 = vadd.f32 %v12572_v62, %v12571_v38  ;;  %v12591_v38 = vld [vmem:[#allocation108_spill] sm:$0xff]  ;;  %v12592_v62 = vld [vmem:[#allocation109_spill] sm:$0xff] }
 0x1eb   : > { %v3176_v13 = vmax.f32 %v3144_v0, 0.0  ;;  %v3143_v6 = vadd.f32 %v2984_v23, %v2872_v3  ;;  %v12573_v3 = vld [vmem:[#allocation30_spill] sm:$0xff]  ;;  %v12574_v0 = vld [vmem:[#allocation52_spill] sm:$0xff]  ;;  %v10258_v23 = vpop.f32.mrf.mxu1 }
 0x1ec   : > { %v7820_v25 = vpop.f32.mrf.mxu0  ;;  %v2340_v37 = vadd.f32 %v12573_v3, %v2069_v45  ;;  %v2073_v59 = vadd.f32 %v12574_v0, %v1801_v43  ;;  %v12579_v43 = vld [vmem:[#allocation49_spill] sm:$0xff]  ;;  %v12583_v45 = vld [vmem:[#allocation71_spill] sm:$0xff] }
 0x1ed   : > { %3208 = vst.msk [vmem:[#allocation2 + $0x21] sm:$0xff] %vm225_vm1, %v3176_v13  ;;  %v3175_v52 = vmax.f32 %v3143_v6, 0.0  ;;  %v3146_v26 = vadd.f32 %v7820_v25, %v2875_v53  ;;  %v10264_v13 = vld [vmem:[%s12099_s3 + $0x14] sm:$0xf]  ;;  %v2342_v6 = vadd.f32 %v12579_v43, %v2071_v58  ;;  %v2077_v25 = vadd.f32 %v12583_v45, %v1805_v20  ;;  %v10286_v3 = vpop.f32.mrf.mxu1 }
 0x1ee   : > { %v2994_v33 = vpop.f32.mrf.mxu0  ;;  %8113 = vmatprep.subr.msk.mxu0 %vm494_vm0, %v10264_v13  ;;  %v2344_v58 = vadd.f32 %v12586_v9, %v2073_v59  ;;  %v2079_v20 = vadd.f32 %v12589_v24, %v10200_v10  ;;  %v12595_v10 = vld [vmem:[#allocation72_spill] sm:$0xff] }
 0x1ef   : > { %3207 = vst.msk [vmem:[#allocation2 + $0x19] sm:$0xff] %vm225_vm1, %v3175_v52  ;;  %v3178_v16 = vmax.f32 %v3146_v26, 0.0  ;;  %v3145_v55 = vadd.f32 %v2994_v33, %v2874_v44  ;;  %v2879_v52 = vadd.f32 %v12584_v50, %v2607_v30  ;;  %v12585_v26 = vld [vmem:[#allocation106_spill] sm:$0xff]  ;;  %v2608_v30 = vadd.f32 %v12591_v38, %v2340_v37  ;;  %v12597_v37 = vld [vmem:[#allocation73_spill] sm:$0xff] }
 0x1f0   : > { %v7823_v19 = vpop.f32.mrf.mxu0  ;;  %v2609_v48 = vadd.f32 %v12585_v26, %v2341_v54  ;;  %v12587_v33 = vld [vmem:[#allocation58_spill] sm:$0xff]  ;;  %v2611_v54 = vadd.f32 %v12592_v62, %v2343_v2  ;;  %v10296_v7 = vadd.f32 %v12595_v10, %v12594_v34  ;;  %v12598_v2 = vld [vmem:[#allocation76_spill] sm:$0xff]  ;;  %v12604_v10 = vld [vmem:[#allocation79_spill] sm:$0xff] }
 0x1f1   : > { %3210 = vst.msk [vmem:[#allocation2 + $0x39] sm:$0xff] %vm225_vm1, %v3178_v16  ;;  %v3177_v53 = vmax.f32 %v3145_v55, 0.0  ;;  %v3148_v17 = vadd.f32 %v7823_v19, %v2877_v32  ;;  %v10279_v32 = vadd.f32 %v12588_v56, %v12587_v33  ;;  %v2878_v16 = vadd.f32 %v12590_v61, %v2606_v18  ;;  %v12593_v19 = vld [vmem:[#allocation70_spill] sm:$0xff]  ;;  %v12602_v33 = vld [vmem:[#allocation119_spill] sm:$0xff]  ;;  %v10326_v61 = vpop.f32.mrf.mxu1 }
 0x1f2   : > { %v3004_v44 = vpop.f32.mrf.mxu0  ;;  %v10292_v35 = vadd.f32 %v12593_v19, %v2075_v31  ;;  %v12596_v18 = vld [vmem:[#allocation74_spill] sm:$0xff]  ;;  %v2881_v41 = vadd.f32 %v12599_v11, %v2609_v48  ;;  %v2880_v56 = vadd.f32 %v12602_v33, %v2608_v30  ;;  %v2883_v24 = vadd.f32 %v10107_v42, %v2611_v54 }
 0x1f3   : > { %3209 = vst.msk [vmem:[#allocation2 + $0x31] sm:$0xff] %vm225_vm1, %v3177_v53  ;;  %v3180_v60 = vmax.f32 %v3148_v17, 0.0  ;;  %v3147_v63 = vadd.f32 %v3004_v44, %v2876_v49  ;;  %v10299_v49 = vadd.f32 %v12596_v18, %v2077_v25  ;;  %v10303_v53 = vadd.f32 %v12598_v2, %v12597_v37  ;;  %v12600_v44 = vld [vmem:[#allocation78_spill] sm:$0xff] }
 0x1f4   : > { %v7826_v55 = vpop.f32.mrf.mxu0  ;;  %v10289_v47 = vld [vmem:[#allocation2 + $0x28] sm:$0x3]  ;;  %v10315_v50 = vadd.f32 %v12600_v44, %v2079_v20  ;;  %v2081_v18 = vadd.f32 %v12604_v10, %v10206_v39  ;;  %v12608_v44 = vld [vmem:[#allocation80_spill] sm:$0xff] }
 0x1f5   : > { %3212 = vst.msk [vmem:[#allocation2 + $0x51] sm:$0xff] %vm225_vm1, %v3180_v60  ;;  %v3179_v0 = vmax.f32 %v3147_v63, 0.0  ;;  %v3150_v59 = vadd.f32 %v7826_v55, %v2879_v52  ;;  %v12601_v52 = vld [vmem:[#allocation111_spill] sm:$0xff]  ;;  %v3651_v63 = vrot.slane %v10289_v47, 1  ;;  %v12605_v2 = vld [vmem:[#allocation114_spill] sm:$0xff] }
 0x1f6   : > { %v3014_v17 = vpop.f32.mrf.mxu0  ;;  %v10305_v43 = vld [vmem:[#allocation2 + $0x18] sm:$0xff]  ;;  %v10307_v51 = vld [vmem:[#allocation2 + $0x20] sm:$0xff]  ;;  %v2610_v26 = vadd.f32 %v12601_v52, %v2342_v6 }
 0x1f7   : > { %3211 = vst.msk [vmem:[#allocation2 + $0x49] sm:$0xff] %vm225_vm1, %v3179_v0  ;;  %v3182_v31 = vmax.f32 %v3150_v59, 0.0  ;;  %v3149_v45 = vadd.f32 %v3014_v17, %v2878_v16  ;;  %7868 = vmatprep.mubr.msk.f32.mxu1 %vm225_vm1, %v10305_v43  ;;  %v3648_v25 = vrot.slane %v10305_v43, 1  ;;  %v3649_v48 = vrot.slane %v10307_v51, 1  ;;  %v12603_v16 = vld [vmem:[#allocation112_spill] sm:$0xff] }
 0x1f8   : > { %7869 = vmatmul.mubr.msk.f32.gmra.mxu1 %vm225_vm1, %v10307_v51  ;;  %v10322_v9 = vld [vmem:[#allocation2 + $0x40] sm:$0x3]  ;;  %v2613_v55 = vadd.f32 %v12603_v16, %v2345_v46  ;;  %v2882_v37 = vadd.f32 %v10113_v21, %v2610_v26  ;;  %v2612_v17 = vadd.f32 %v12605_v2, %v2344_v58  ;;  %v12609_v26 = vld [vmem:[#allocation126_spill] sm:$0xff] }
 0x1f9   : > { %v7829_v60 = vpop.f32.mrf.mxu0  ;;  %3214 = vst.msk [vmem:[#allocation2 + $0x69] sm:$0xff] %vm225_vm1, %v3182_v31  ;;  %v3181_v20 = vmax.f32 %v3149_v45, 0.0  ;;  %v10331_v62 = vsel %vm741_vm4, %v3648_v25, %v3649_v48  ;;  %v10336_v59 = vsel %vm741_vm4, %v3649_v48, %v3651_v63  ;;  %v3656_v42 = vrot.slane %v10322_v9, 1  ;;  %v10358_v31 = vpop.f32.mrf.mxu1  ;;  %v12607_v58 = vld [vmem:[#allocation77_spill] sm:$0xff]  ;;  %v12610_v48 = vld [vmem:[#allocation115_spill] sm:$0xff] }
 0x1fa   : > { %v3152_v6 = vadd.f32 %v7829_v60, %v2881_v41  ;;  %v10333_v0 = vld [vmem:[#allocation2 + $0x30] sm:$0xff]  ;;  %v10338_v30 = vld [vmem:[#allocation2 + $0x38] sm:$0xff]  ;;  %7918 = vmatprep.mubr.msk.f32.mxu0 %vm225_vm1, %v10331_v62  ;;  %v10369_v52 = vadd.f32 %v12608_v44, %v12607_v58  ;;  %v2885_v60 = vadd.f32 %v12609_v26, %v2613_v55  ;;  %v2615_v63 = vadd.f32 %v12610_v48, %v10279_v32  ;;  %v12618_v26 = vld [vmem:[#allocation118_spill] sm:$0xff] }
 0x1fb   : > { %v3024_v38 = vpop.f32.mrf.mxu0  ;;  %3213 = vst.msk [vmem:[#allocation2 + $0x61] sm:$0xff] %vm225_vm1, %v3181_v20  ;;  %7871 = vmatprep.mubr.msk.f32.mxu1 %vm225_vm1, %v10333_v0  ;;  %v3653_v46 = vrot.slane %v10333_v0, 1  ;;  %v3654_v34 = vrot.slane %v10338_v30, 1  ;;  %7919 = vmatmul.mubr.msk.f32.gmra.mxu0 %vm225_vm1, %v10336_v59  ;;  %v10398_v2 = vpop.f32.mrf.mxu1  ;;  %v12617_v58 = vld [vmem:[#allocation132_spill] sm:$0xff]  ;;  %v2617_v48 = vadd.f32 %v12618_v26, %v10296_v7 }
 0x1fc   : > { %v3184_v54 = vmax.f32 %v3152_v6, 0.0  ;;  %v3151_v19 = vadd.f32 %v3024_v38, %v2880_v56  ;;  %7872 = vmatmul.mubr.msk.f32.gmra.mxu1 %vm225_vm1, %v10338_v30  ;;  %v10356_v41 = vld [vmem:[#allocation2 + $0x58] sm:$0x3]  ;;  %v12611_v38 = vld [vmem:[#allocation82_spill] sm:$0xff]  ;;  %v2887_v44 = vadd.f32 %v12617_v58, %v2615_v63  ;;  %v12619_v63 = vld [vmem:[#allocation81_spill] sm:$0xff] }
 0x1fd   : > { %v7832_v11 = vpop.f32.mrf.mxu0  ;;  %v10362_v39 = vsel %vm741_vm4, %v3653_v46, %v3654_v34  ;;  %v10365_v21 = vsel %vm741_vm4, %v3654_v34, %v3656_v42  ;;  %v3661_v20 = vrot.slane %v10356_v41, 1  ;;  %v10387_v42 = vadd.f32 %v12611_v38, %v2081_v18  ;;  %v12613_v46 = vld [vmem:[#allocation117_spill] sm:$0xff] }
 0x1fe   : > { %3216 = vst.msk [vmem:[#allocation2 + $0x81] sm:$0xff] %vm225_vm1, %v3184_v54  ;;  %v3183_v45 = vmax.f32 %v3151_v19, 0.0  ;;  %v3154_v25 = vadd.f32 %v7832_v11, %v2883_v24  ;;  %12606 = vst [vmem:[#allocation25_spill] sm:$0xff] %v10365_v21  ;;  %7921 = vmatprep.mubr.msk.f32.mxu0 %vm225_vm1, %v10362_v39  ;;  %v10376_v56 = vld [vmem:[#allocation2 + $0x48] sm:$0xff]  ;;  %v10378_v24 = vld [vmem:[#allocation2 + $0x50] sm:$0xff]  ;;  %v2614_v34 = vadd.f32 %v12613_v46, %v10292_v35 }
 0x1ff   : > { %v3034_v33 = vpop.f32.mrf.mxu0  ;;  %7874 = vmatprep.mubr.msk.f32.mxu1 %vm225_vm1, %v10376_v56  ;;  %v3658_v55 = vrot.slane %v10376_v56, 1  ;;  %v3659_v32 = vrot.slane %v10378_v24, 1  ;;  %v12612_v54 = vld [vmem:[#allocation129_spill] sm:$0xff]  ;;  %7922 = vmatmul.mubr.msk.f32.gmra.mxu0 %vm225_vm1, %v10365_v21  ;;  %v12621_v46 = vld [vmem:[#allocation120_spill] sm:$0xff] }
 0x200   : > { %3215 = vst.msk [vmem:[#allocation2 + $0x79] sm:$0xff] %vm225_vm1, %v3183_v45  ;;  %v3186_v6 = vmax.f32 %v3154_v25, 0.0  ;;  %v3153_v16 = vadd.f32 %v3034_v33, %v2882_v37  ;;  %v2884_v19 = vadd.f32 %v12612_v54, %v2612_v17  ;;  %7875 = vmatmul.mubr.msk.f32.gmra.mxu1 %vm225_vm1, %v10378_v24  ;;  %v10396_v37 = vld [vmem:[#allocation2 + $0x70] sm:$0x3]  ;;  %v2886_v54 = vadd.f32 %v10161_v8, %v2614_v34  ;;  %v12624_v34 = vld [vmem:[#allocation86_spill] sm:$0xff] }
 0x201   : > { %v7835_v10 = vpop.f32.mrf.mxu0  ;;  %v10402_v17 = vsel %vm741_vm4, %v3658_v55, %v3659_v32  ;;  %v10405_v35 = vsel %vm741_vm4, %v3659_v32, %v3661_v20  ;;  %v12616_v45 = vld [vmem:[#allocation83_spill] sm:$0xff]  ;;  %v12620_v32 = vld [vmem:[#allocation84_spill] sm:$0xff] }
 0x202   : > { %3218 = vst.msk [vmem:[#allocation2 + $0x99] sm:$0xff] %vm225_vm1, %v3186_v6  ;;  %v3185_v18 = vmax.f32 %v3153_v16, 0.0  ;;  %v3156_v11 = vadd.f32 %v7835_v10, %v2885_v60  ;;  %12614 = vst [vmem:[#allocation26_spill] sm:$0xff] %v10402_v17  ;;  %v2083_v25 = vadd.f32 %v12616_v45, %v10209_v36  ;;  %7924 = vmatprep.mubr.msk.f32.mxu0 %vm225_vm1, %v10402_v17  ;;  %v10414_v6 = vld [vmem:[#allocation2 + $0x60] sm:$0xff]  ;;  %v10416_v60 = vld [vmem:[#allocation2 + $0x68] sm:$0xff]  ;;  %v3666_v16 = vrot.slane %v10396_v37, 1 }
 0x203   : > { %12615 = vst [vmem:[#allocation27_spill] sm:$0xff] %v10405_v35  ;;  %v3044_v33 = vpop.f32.mrf.mxu0  ;;  %7877 = vmatprep.mubr.msk.f32.mxu1 %vm225_vm1, %v10414_v6  ;;  %v3663_v36 = vrot.slane %v10414_v6, 1  ;;  %v3664_v7 = vrot.slane %v10416_v60, 1  ;;  %v10426_v38 = vadd.f32 %v12620_v32, %v12619_v63  ;;  %v2616_v10 = vadd.f32 %v12621_v46, %v10299_v49  ;;  %7925 = vmatmul.mubr.msk.f32.gmra.mxu0 %vm225_vm1, %v10405_v35  ;;  %v12625_v63 = vld [vmem:[#allocation121_spill] sm:$0xff] }
 0x204   : > { %3217 = vst.msk [vmem:[#allocation2 + $0x91] sm:$0xff] %vm225_vm1, %v3185_v18  ;;  %v3188_v20 = vmax.f32 %v3156_v11, 0.0  ;;  %v3155_v55 = vadd.f32 %v3044_v33, %v2884_v19  ;;  %7878 = vmatmul.mubr.msk.f32.gmra.mxu1 %vm225_vm1, %v10416_v60  ;;  %v10437_v11 = vpop.f32.mrf.mxu1  ;;  %v10447_v26 = vadd.f32 %v12624_v34, %v2083_v25  ;;  %v2889_v33 = vadd.f32 %v10188_v14, %v2617_v48  ;;  %v12626_v48 = vld [vmem:[#allocation87_spill] sm:$0xff] }
 0x205   : > { %v7838_v19 = vpop.f32.mrf.mxu0  ;;  %v10435_v18 = vld [vmem:[#allocation2 + $0x88] sm:$0x3]  ;;  %v10441_v8 = vsel %vm741_vm4, %v3663_v36, %v3664_v7  ;;  %v10444_v49 = vsel %vm741_vm4, %v3664_v7, %v3666_v16  ;;  %v2619_v32 = vadd.f32 %v12625_v63, %v10303_v53  ;;  %v2085_v36 = vadd.f32 %v12626_v48, %v10226_v12 }
 0x206   : > { %3220 = vst.msk [vmem:[#allocation2 + $0xb1] sm:$0xff] %vm225_vm1, %v3188_v20  ;;  %v3187_v45 = vmax.f32 %v3155_v55, 0.0  ;;  %v3158_v58 = vadd.f32 %v7838_v19, %v2887_v44  ;;  %12622 = vst [vmem:[#allocation28_spill] sm:$0xff] %v10441_v8  ;;  %7927 = vmatprep.mubr.msk.f32.mxu0 %vm225_vm1, %v10441_v8  ;;  %v3671_v55 = vrot.slane %v10435_v18, 1  ;;  %v2888_v7 = vadd.f32 %v10217_v29, %v2616_v10  ;;  %v12627_v19 = vld [vmem:[#allocation122_spill] sm:$0xff]  ;;  %v12630_v10 = vld [vmem:[#allocation85_spill] sm:$0xff] }
 0x207   : > { %12623 = vst [vmem:[#allocation29_spill] sm:$0xff] %v10444_v49  ;;  %v3054_v46 = vpop.f32.mrf.mxu0  ;;  %v10454_v20 = vld [vmem:[#allocation2 + $0x78] sm:$0xff]  ;;  %v10456_v44 = vld [vmem:[#allocation2 + $0x80] sm:$0xff]  ;;  %v2618_v34 = vadd.f32 %v12627_v19, %v10315_v50  ;;  %7928 = vmatmul.mubr.msk.f32.gmra.mxu0 %vm225_vm1, %v10444_v49  ;;  %v2891_v19 = vadd.f32 %v10236_v5, %v2619_v32  ;;  %v12632_v49 = vld [vmem:[#allocation123_spill] sm:$0xff] }
 0x208   : > { %3219 = vst.msk [vmem:[#allocation2 + $0xa9] sm:$0xff] %vm225_vm1, %v3187_v45  ;;  %v3190_v16 = vmax.f32 %v3158_v58, 0.0  ;;  %v3157_v25 = vadd.f32 %v3054_v46, %v2886_v54  ;;  %7880 = vmatprep.mubr.msk.f32.mxu1 %vm225_vm1, %v10454_v20  ;;  %v3668_v14 = vrot.slane %v10454_v20, 1  ;;  %v3669_v53 = vrot.slane %v10456_v44, 1  ;;  %v10475_v58 = vpop.f32.mrf.mxu1  ;;  %v12631_v46 = vld [vmem:[#allocation88_spill] sm:$0xff] }
 0x209   : > { %v7841_v45 = vpop.f32.mrf.mxu0  ;;  %7881 = vmatmul.mubr.msk.f32.gmra.mxu1 %vm225_vm1, %v10456_v44  ;;  %v10473_v54 = vld [vmem:[#allocation2 + $0xa0] sm:$0x3]  ;;  %v2357_v48 = vadd.f32 %v12631_v46, %v12630_v10  ;;  %v2621_v8 = vadd.f32 %v12632_v49, %v10369_v52  ;;  %v12633_v49 = vld [vmem:[#allocation90_spill] sm:$0xff] }
 0x20a   : > { %3222 = vst.msk [vmem:[#allocation2 + $0xc9] sm:$0xff] %vm225_vm1, %v3190_v16  ;;  %v3189_v63 = vmax.f32 %v3157_v25, 0.0  ;;  %v3160_v12 = vadd.f32 %v7841_v45, %v2889_v33  ;;  %v10479_v29 = vsel %vm741_vm4, %v3668_v14, %v3669_v53  ;;  %v10482_v50 = vsel %vm741_vm4, %v3669_v53, %v3671_v55  ;;  %v12634_v45 = vld [vmem:[#allocation124_spill] sm:$0xff] }
 0x20b   : > { %12628 = vst [vmem:[#allocation36_spill] sm:$0xff] %v10479_v29  ;;  %12629 = vst [vmem:[#allocation59_spill] sm:$0xff] %v10482_v50  ;;  %v3064_v35 = vpop.f32.mrf.mxu0  ;;  %7930 = vmatprep.mubr.msk.f32.mxu0 %vm225_vm1, %v10479_v29  ;;  %v10491_v16 = vld [vmem:[#allocation2 + $0x90] sm:$0xff]  ;;  %v10493_v33 = vld [vmem:[#allocation2 + $0x98] sm:$0xff]  ;;  %v3676_v25 = vrot.slane %v10473_v54, 1  ;;  %v2356_v32 = vadd.f32 %v12633_v49, %v2085_v36  ;;  %v2890_v53 = vadd.f32 %v10258_v23, %v2618_v34 }
 0x20c   : > { %3221 = vst.msk [vmem:[#allocation2 + $0xc1] sm:$0xff] %vm225_vm1, %v3189_v63  ;;  %v3192_v55 = vmax.f32 %v3160_v12, 0.0  ;;  %v3159_v14 = vadd.f32 %v3064_v35, %v2888_v7  ;;  %7883 = vmatprep.mubr.msk.f32.mxu1 %vm225_vm1, %v10491_v16  ;;  %v3673_v5 = vrot.slane %v10491_v16, 1  ;;  %v3674_v52 = vrot.slane %v10493_v33, 1  ;;  %7931 = vmatmul.mubr.msk.f32.gmra.mxu0 %vm225_vm1, %v10482_v50  ;;  %v10511_v7 = vpop.f32.mrf.mxu1  ;;  %v12637_v34 = vld [vmem:[#allocation91_spill] sm:$0xff] }
 0x20d   : > { %v2620_v10 = vadd.f32 %v12634_v45, %v10387_v42  ;;  %v7844_v63 = vpop.f32.mrf.mxu0  ;;  %7884 = vmatmul.mubr.msk.f32.gmra.mxu1 %vm225_vm1, %v10493_v33  ;;  %v10509_v35 = vld [vmem:[#allocation2 + $0xb8] sm:$0x3]  ;;  %v2087_v46 = vadd.f32 %v12637_v34, %v10229_v28  ;;  %v2893_v49 = vadd.f32 %v10286_v3, %v2621_v8  ;;  %v12638_v45 = vld [vmem:[#allocation125_spill] sm:$0xff]  ;;  %v12641_v34 = vld [vmem:[#allocation127_spill] sm:$0xff] }
 0x20e   : > { %3224 = vst.msk [vmem:[#allocation2 + $0xe1] sm:$0xff] %vm225_vm1, %v3192_v55  ;;  %v3191_v12 = vmax.f32 %v3159_v14, 0.0  ;;  %v3162_v36 = vadd.f32 %v7844_v63, %v2891_v19  ;;  %v10515_v23 = vsel %vm741_vm4, %v3673_v5, %v3674_v52  ;;  %v10518_v42 = vsel %vm741_vm4, %v3674_v52, %v3676_v25  ;;  %v12640_v8 = vld [vmem:[#allocation92_spill] sm:$0xff] }
 0x20f   : > { %12635 = vst [vmem:[#allocation40_spill] sm:$0xff] %v10515_v23  ;;  %12636 = vst [vmem:[#allocation44_spill] sm:$0xff] %v10518_v42  ;;  %v2623_v50 = vadd.f32 %v12638_v45, %v10426_v38  ;;  %v3074_v29 = vpop.f32.mrf.mxu0  ;;  %7933 = vmatprep.mubr.msk.f32.mxu0 %vm225_vm1, %v10515_v23  ;;  %v10527_v55 = vld [vmem:[#allocation2 + $0xa8] sm:$0xff]  ;;  %v10529_v19 = vld [vmem:[#allocation2 + $0xb0] sm:$0xff]  ;;  %v3681_v14 = vrot.slane %v10509_v35, 1  ;;  %v2892_v63 = vadd.f32 %v10326_v61, %v2620_v10 }
 0x210   : > { %3223 = vst.msk [vmem:[#allocation2 + $0xd9] sm:$0xff] %vm225_vm1, %v3191_v12  ;;  %v3194_v25 = vmax.f32 %v3162_v36, 0.0  ;;  %v3161_v5 = vadd.f32 %v3074_v29, %v2890_v53  ;;  %7886 = vmatprep.mubr.msk.f32.mxu1 %vm225_vm1, %v10527_v55  ;;  %v3678_v28 = vrot.slane %v10527_v55, 1  ;;  %v3679_v3 = vrot.slane %v10529_v19, 1  ;;  %v12639_v38 = vld [vmem:[#allocation89_spill] sm:$0xff]  ;;  %7934 = vmatmul.mubr.msk.f32.gmra.mxu0 %vm225_vm1, %v10518_v42  ;;  %v10548_v53 = vpop.f32.mrf.mxu1  ;;  %v12644_v10 = vld [vmem:[#allocation95_spill] sm:$0xff] }
 0x211   : > { %v2359_v52 = vadd.f32 %v12640_v8, %v12639_v38  ;;  %v2622_v45 = vadd.f32 %v12641_v34, %v10447_v26  ;;  %v7847_v12 = vpop.f32.mrf.mxu0  ;;  %7887 = vmatmul.mubr.msk.f32.gmra.mxu1 %vm225_vm1, %v10529_v19  ;;  %v10546_v29 = vld [vmem:[#allocation2 + $0xd0] sm:$0x3]  ;;  %v2358_v8 = vadd.f32 %v12644_v10, %v2087_v46  ;;  %v2895_v34 = vadd.f32 %v10358_v31, %v2623_v50  ;;  %v12645_v42 = vld [vmem:[#allocation128_spill] sm:$0xff] }
 0x212   : > { %3226 = vst.msk [vmem:[#allocation2 + $0xf9] sm:$0xff] %vm225_vm1, %v3194_v25  ;;  %v3193_v36 = vmax.f32 %v3161_v5, 0.0  ;;  %v3164_v38 = vadd.f32 %v7847_v12, %v2893_v49  ;;  %v10552_v61 = vsel %vm741_vm4, %v3678_v28, %v3679_v3  ;;  %v10555_v26 = vsel %vm741_vm4, %v3679_v3, %v3681_v14  ;;  %v12647_v28 = vld [vmem:[#allocation130_spill] sm:$0xff] }
 0x213   : > { %12642 = vst [vmem:[#allocation45_spill] sm:$0xff] %v10552_v61  ;;  %12643 = vst [vmem:[#allocation48_spill] sm:$0xff] %v10555_v26  ;;  %v2625_v23 = vadd.f32 %v12645_v42, %v2357_v48  ;;  %v3084_v17 = vpop.f32.mrf.mxu0  ;;  %7936 = vmatprep.mubr.msk.f32.mxu0 %vm225_vm1, %v10552_v61  ;;  %v10562_v21 = vld [vmem:[#allocation2 + $0xc0] sm:$0xff]  ;;  %v10564_v25 = vld [vmem:[#allocation2 + $0xc8] sm:$0xff]  ;;  %v3686_v49 = vrot.slane %v10546_v29, 1  ;;  %v2894_v46 = vadd.f32 %v10398_v2, %v2622_v45 }
 0x214   : > { %3225 = vst.msk [vmem:[#allocation2 + $0xf1] sm:$0xff] %vm225_vm1, %v3193_v36  ;;  %v3196_v14 = vmax.f32 %v3164_v38, 0.0  ;;  %v3163_v5 = vadd.f32 %v3084_v17, %v2892_v63  ;;  %7889 = vmatprep.mubr.msk.f32.mxu1 %vm225_vm1, %v10562_v21  ;;  %v3683_v31 = vrot.slane %v10562_v21, 1  ;;  %v3684_v50 = vrot.slane %v10564_v25, 1  ;;  %v12646_v48 = vld [vmem:[#allocation96_spill] sm:$0xff]  ;;  %7937 = vmatmul.mubr.msk.f32.gmra.mxu0 %vm225_vm1, %v10555_v26  ;;  %v7809_v63 = vpop.f32.mrf.mxu1  ;;  %v12649_v45 = vld [vmem:[#allocation97_spill] sm:$0xff] }
 0x215   : > { %v2089_v42 = vadd.f32 %v12646_v48, %v10240_v22  ;;  %v2624_v3 = vadd.f32 %v12647_v28, %v2356_v32  ;;  %v7850_v12 = vpop.f32.mrf.mxu0  ;;  %7890 = vmatmul.mubr.msk.f32.gmra.mxu1 %vm225_vm1, %v10564_v25  ;;  %v10580_v17 = vld [vmem:[#allocation2 + $0xe8] sm:$0x3]  ;;  %v12648_v32 = vld [vmem:[#allocation93_spill] sm:$0xff]  ;;  %v2897_v48 = vadd.f32 %v10437_v11, %v2625_v23  ;;  %v12650_v28 = vld [vmem:[#allocation131_spill] sm:$0xff] }
 0x216   : > { %3228 = vst.msk [vmem:[#allocation2 + $0x111] sm:$0xff] %vm225_vm1, %v3196_v14  ;;  %v3195_v36 = vmax.f32 %v3163_v5, 0.0  ;;  %v3166_v38 = vadd.f32 %v7850_v12, %v2895_v34  ;;  %v10584_v22 = vsel %vm741_vm4, %v3683_v31, %v3684_v50  ;;  %v10587_v2 = vsel %vm741_vm4, %v3684_v50, %v3686_v49 }
 0x217   : > { %v2361_v10 = vadd.f32 %v12649_v45, %v12648_v32  ;;  %v2627_v26 = vadd.f32 %v12650_v28, %v2359_v52  ;;  %v3094_v61 = vpop.f32.mrf.mxu0  ;;  %7939 = vmatprep.mubr.msk.f32.mxu0 %vm225_vm1, %v10584_v22  ;;  %v10595_v14 = vld [vmem:[#allocation2 + $0xd8] sm:$0xff]  ;;  %v10597_v34 = vld [vmem:[#allocation2 + $0xe0] sm:$0xff]  ;;  %v3691_v5 = vrot.slane %v10580_v17, 1  ;;  %v12651_v52 = vld [vmem:[#allocation99_spill] sm:$0xff]  ;;  %v2896_v12 = vadd.f32 %v10475_v58, %v2624_v3 }
 0x218   : > { %3227 = vst.msk [vmem:[#allocation2 + $0x109] sm:$0xff] %vm225_vm1, %v3195_v36  ;;  %v3198_v49 = vmax.f32 %v3166_v38, 0.0  ;;  %v3165_v31 = vadd.f32 %v3094_v61, %v2894_v46  ;;  %7892 = vmatprep.mubr.msk.f32.mxu1 %vm225_vm1, %v10595_v14  ;;  %v3688_v11 = vrot.slane %v10595_v14, 1  ;;  %v3689_v23 = vrot.slane %v10597_v34, 1  ;;  %7940 = vmatmul.mubr.msk.f32.gmra.mxu0 %vm225_vm1, %v10587_v2  ;;  %v2853_v46 = vpop.f32.mrf.mxu1 }
 0x219   : > { %v2360_v50 = vadd.f32 %v12651_v52, %v2089_v42  ;;  %v2626_v32 = vadd.f32 %v10149_v27, %v2358_v8  ;;  %v7853_v45 = vpop.f32.mrf.mxu0  ;;  %7893 = vmatmul.mubr.msk.f32.gmra.mxu1 %vm225_vm1, %v10597_v34  ;;  %v10612_v61 = vld [vmem:[#allocation2 + $0x100] sm:$0x3]  ;;  %v12654_v27 = vld [vmem:[#allocation100_spill] sm:$0xff]  ;;  %v2899_v3 = vadd.f32 %v10511_v7, %v2627_v26  ;;  %v2629_v28 = vadd.f32 %v10153_v1, %v2361_v10  ;;  %v12655_v7 = vld [vmem:[#allocation98_spill] sm:$0xff] }
 0x21a   : > { %3230 = vst.msk [vmem:[#allocation2 + $0x129] sm:$0xff] %vm225_vm1, %v3198_v49  ;;  %v3197_v36 = vmax.f32 %v3165_v31, 0.0  ;;  %v3168_v38 = vadd.f32 %v7853_v45, %v2897_v48  ;;  %v10616_v42 = vsel %vm741_vm4, %v3688_v11, %v3689_v23  ;;  %v10619_v58 = vsel %vm741_vm4, %v3689_v23, %v3691_v5  ;;  %v12656_v26 = vld [vmem:[#allocation101_spill] sm:$0xff] }
 0x21b   : > { %12652 = vst [vmem:[#allocation57_spill] sm:$0xff] %v10616_v42  ;;  %12653 = vst [vmem:[#allocation51_spill] sm:$0xff] %v10619_v58  ;;  %v2091_v8 = vadd.f32 %v12654_v27, %v10243_v57  ;;  %v3104_v52 = vpop.f32.mrf.mxu0  ;;  %7942 = vmatprep.mubr.msk.f32.mxu0 %vm225_vm1, %v10616_v42  ;;  %v10627_v49 = vld [vmem:[#allocation2 + $0xf0] sm:$0xff]  ;;  %v10629_v48 = vld [vmem:[#allocation2 + $0xf8] sm:$0xff]  ;;  %v3696_v31 = vrot.slane %v10612_v61, 1  ;;  %v2363_v10 = vadd.f32 %v12656_v26, %v12655_v7 }
 0x21c   : > { %3229 = vst.msk [vmem:[#allocation2 + $0x121] sm:$0xff] %vm225_vm1, %v3197_v36  ;;  %v3200_v5 = vmax.f32 %v3168_v38, 0.0  ;;  %v3167_v11 = vadd.f32 %v3104_v52, %v2896_v12  ;;  %7895 = vmatprep.mubr.msk.f32.mxu1 %vm225_vm1, %v10627_v49  ;;  %v3693_v57 = vrot.slane %v10627_v49, 1  ;;  %v3694_v1 = vrot.slane %v10629_v48, 1  ;;  %7943 = vmatmul.mubr.msk.f32.gmra.mxu0 %vm225_vm1, %v10619_v58  ;;  %v7812_v38 = vpop.f32.mrf.mxu1 }
 0x21d   : > { %v2898_v23 = vadd.f32 %v10548_v53, %v2626_v32  ;;  %v2628_v45 = vadd.f32 %v10167_v15, %v2360_v50  ;;  %v7856_v36 = vpop.f32.mrf.mxu0  ;;  %7896 = vmatmul.mubr.msk.f32.gmra.mxu1 %vm225_vm1, %v10629_v48  ;;  %v10645_v12 = vld [vmem:[#allocation2 + $0x118] sm:$0x3]  ;;  %v12659_v15 = vld [vmem:[#allocation102_spill] sm:$0xff]  ;;  %v2901_v32 = vadd.f32 %v7809_v63, %v2629_v28  ;;  %v2631_v26 = vadd.f32 %v10179_v4, %v2363_v10 }
 0x21e   : > { %3232 = vst.msk [vmem:[#allocation2 + $0x141] sm:$0xff] %vm225_vm1, %v3200_v5  ;;  %v3199_v27 = vmax.f32 %v3167_v11, 0.0  ;;  %v3170_v52 = vadd.f32 %v7856_v36, %v2899_v3  ;;  %v10649_v7 = vsel %vm741_vm4, %v3693_v57, %v3694_v1  ;;  %v10652_v53 = vsel %vm741_vm4, %v3694_v1, %v3696_v31 }
 0x21f   : > { %12657 = vst [vmem:[#allocation54_spill] sm:$0xff] %v10649_v7  ;;  %12658 = vst [vmem:[#allocation61_spill] sm:$0xff] %v10652_v53  ;;  %v2362_v50 = vadd.f32 %v12659_v15, %v2091_v8  ;;  %v3114_v58 = vpop.f32.mrf.mxu0  ;;  %7945 = vmatprep.mubr.msk.f32.mxu0 %vm225_vm1, %v10649_v7  ;;  %v10658_v42 = vld [vmem:[#allocation2 + $0x108] sm:$0xff]  ;;  %v10660_v5 = vld [vmem:[#allocation2 + $0x110] sm:$0xff]  ;;  %v3701_v3 = vrot.slane %v10645_v12, 1  ;;  %v2900_v8 = vadd.f32 %v2853_v46, %v2628_v45 }
 0x220   : > { %3231 = vst.msk [vmem:[#allocation2 + $0x139] sm:$0xff] %vm225_vm1, %v3199_v27  ;;  %v3202_v11 = vmax.f32 %v3170_v52, 0.0  ;;  %v3169_v31 = vadd.f32 %v3114_v58, %v2898_v23  ;;  %7898 = vmatprep.mubr.msk.f32.mxu1 %vm225_vm1, %v10658_v42  ;;  %v3698_v63 = vrot.slane %v10658_v42, 1  ;;  %v3699_v4 = vrot.slane %v10660_v5, 1  ;;  %7946 = vmatmul.mubr.msk.f32.gmra.mxu0 %vm225_vm1, %v10652_v53  ;;  %v2863_v58 = vpop.f32.mrf.mxu1 }
 0x221   : > { %v2630_v28 = vadd.f32 %v10197_v40, %v2362_v50  ;;  %v7859_v57 = vpop.f32.mrf.mxu0  ;;  %7899 = vmatmul.mubr.msk.f32.gmra.mxu1 %vm225_vm1, %v10660_v5  ;;  %v10673_v1 = vld [vmem:[#allocation2 + $0x130] sm:$0x3]  ;;  %v2903_v40 = vadd.f32 %v7812_v38, %v2631_v26  ;;  %v4055_v53 = vrot.slane %v10307_v51, 2 }
 0x222   : > { %3234 = vst.msk [vmem:[#allocation2 + $0x159] sm:$0xff] %vm225_vm1, %v3202_v11  ;;  %v3201_v10 = vmax.f32 %v3169_v31, 0.0  ;;  %v3172_v23 = vadd.f32 %v7859_v57, %v2901_v32  ;;  %v10677_v36 = vsel %vm741_vm4, %v3698_v63, %v3699_v4  ;;  %v10680_v46 = vsel %vm741_vm4, %v3699_v4, %v3701_v3 }
 0x223   : > { %12660 = vst [vmem:[#allocation47_spill] sm:$0xff] %v10677_v36  ;;  %12661 = vst [vmem:[#allocation50_spill] sm:$0xff] %v10680_v46  ;;  %v3124_v45 = vpop.f32.mrf.mxu0  ;;  %7948 = vmatprep.mubr.msk.f32.mxu0 %vm225_vm1, %v10677_v36  ;;  %v10684_v27 = vld [vmem:[#allocation2 + $0x120] sm:$0xff]  ;;  %v10686_v52 = vld [vmem:[#allocation2 + $0x128] sm:$0xff]  ;;  %v3706_v15 = vrot.slane %v10673_v1, 1  ;;  %v2902_v26 = vadd.f32 %v2863_v58, %v2630_v28 }
 0x224   : > { %12662 = vst [vmem:[#allocation60_spill] sm:$0xff] %v10684_v27  ;;  %3233 = vst.msk [vmem:[#allocation2 + $0x151] sm:$0xff] %vm225_vm1, %v3201_v10  ;;  %v3204_v50 = vmax.f32 %v3172_v23, 0.0  ;;  %v3171_v32 = vadd.f32 %v3124_v45, %v2900_v8  ;;  %7901 = vmatprep.mubr.msk.f32.mxu1 %vm225_vm1, %v10684_v27  ;;  %v3703_v3 = vrot.slane %v10684_v27, 1  ;;  %v3704_v38 = vrot.slane %v10686_v52, 1  ;;  %7949 = vmatmul.mubr.msk.f32.gmra.mxu0 %vm225_vm1, %v10680_v46 }
 0x225   : > { %v7862_v11 = vpop.f32.mrf.mxu0  ;;  %7902 = vmatmul.mubr.msk.f32.gmra.mxu1 %vm225_vm1, %v10686_v52  ;;  %v10698_v31 = vld [vmem:[#allocation2 + $0x148] sm:$0x3] }
 0x226   : > { %3236 = vst.msk [vmem:[#allocation2 + $0x171] sm:$0xff] %vm225_vm1, %v3204_v50  ;;  %v3203_v63 = vmax.f32 %v3171_v32, 0.0  ;;  %v3174_v4 = vadd.f32 %v7862_v11, %v2903_v40  ;;  %v10702_v8 = vsel %vm741_vm4, %v3703_v3, %v3704_v38  ;;  %v10705_v57 = vsel %vm741_vm4, %v3704_v38, %v3706_v15  ;;  %v8322_v11 = vld [vmem:[#allocation2] sm:$0xff] }
 0x227   : > { %12663 = vst [vmem:[#allocation62_spill] sm:$0xff] %v10702_v8  ;;  %12664 = vst [vmem:[#allocation53_spill] sm:$0xff] %v10705_v57  ;;  %v3134_v28 = vpop.f32.mrf.mxu0  ;;  %7951 = vmatprep.mubr.msk.f32.mxu0 %vm225_vm1, %v10702_v8  ;;  %v10709_v58 = vld [vmem:[#allocation2 + $0x138] sm:$0xff]  ;;  %v10711_v10 = vld [vmem:[#allocation2 + $0x140] sm:$0xff]  ;;  %v3711_v23 = vrot.slane %v10698_v31, 1 }
 0x228   : > { %12665 = vst [vmem:[#allocation56_spill] sm:$0xff] %v10709_v58  ;;  %3235 = vst.msk [vmem:[#allocation2 + $0x169] sm:$0xff] %vm225_vm1, %v3203_v63  ;;  %v3206_v45 = vmax.f32 %v3174_v4, 0.0  ;;  %v3173_v40 = vadd.f32 %v3134_v28, %v2902_v26  ;;  %7904 = vmatprep.mubr.msk.f32.mxu1 %vm225_vm1, %v10709_v58  ;;  %v3708_v15 = vrot.slane %v10709_v58, 1  ;;  %v3709_v50 = vrot.slane %v10711_v10, 1  ;;  %7952 = vmatmul.mubr.msk.f32.gmra.mxu0 %vm225_vm1, %v10705_v57  ;;  %v8323_v57 = vld [vmem:[#allocation2 + $0x8] sm:$0xff] }
 0x229   : > { %7905 = vmatmul.mubr.msk.f32.gmra.mxu1 %vm225_vm1, %v10711_v10  ;;  %v10723_v32 = vld [vmem:[#allocation2 + $0x160] sm:$0x3]  ;;  %v4049_v63 = vrot.slane %v8322_v11, 2  ;;  %v4050_v8 = vrot.slane %v8323_v57, 2  ;;  %v8324_v57 = vld [vmem:[#allocation2 + $0x10] sm:$0x3] }
 0x22a   : > { %3238 = vst.msk [vmem:[#allocation2 + $0x189] sm:$0xff] %vm225_vm1, %v3206_v45  ;;  %v3205_v3 = vmax.f32 %v3173_v40, 0.0  ;;  %v10727_v38 = vsel %vm741_vm4, %v3708_v15, %v3709_v50  ;;  %v10730_v26 = vsel %vm741_vm4, %v3709_v50, %v3711_v23  ;;  %v3716_v40 = vrot.slane %v10723_v32, 1 }
 0x22b   : > { %12666 = vst [vmem:[#allocation64_spill] sm:$0xff] %v10727_v38  ;;  %12667 = vst [vmem:[#allocation104_spill] sm:$0xff] %v10730_v26  ;;  %7954 = vmatprep.mubr.msk.f32.mxu0 %vm225_vm1, %v10727_v38  ;;  %v10734_v4 = vld [vmem:[#allocation2 + $0x150] sm:$0xff]  ;;  %v10736_v28 = vld [vmem:[#allocation2 + $0x158] sm:$0xff]  ;;  %v4052_v50 = vrot.slane %v8324_v57, 2 }
 0x22c   : > { %3237 = vst.msk [vmem:[#allocation2 + $0x181] sm:$0xff] %vm225_vm1, %v3205_v3  ;;  %7907 = vmatprep.mubr.msk.f32.mxu1 %vm225_vm1, %v10734_v4  ;;  %v3713_v45 = vrot.slane %v10734_v4, 1  ;;  %v3714_v23 = vrot.slane %v10736_v28, 1  ;;  %7955 = vmatmul.mubr.msk.f32.gmra.mxu0 %vm225_vm1, %v10730_v26  ;;  %v4051_v26 = vsel %vm1148_vm5, %v4049_v63, %v4050_v8 }
 0x22d   : > { %7908 = vmatmul.mubr.msk.f32.gmra.mxu1 %vm225_vm1, %v10736_v28  ;;  %v10748_v15 = vld [vmem:[#allocation2 + $0x178] sm:$0x3] }
 0x22e   : > { %v10751_v3 = vsel %vm741_vm4, %v3713_v45, %v3714_v23  ;;  %v10754_v11 = vsel %vm741_vm4, %v3714_v23, %v3716_v40  ;;  %v3721_v36 = vrot.slane %v10748_v15, 1  ;;  %v4053_v23 = vsel %vm1148_vm5, %v4050_v8, %v4052_v50  ;;  %v7867_v7 = vpop.f32.mrf.mxu1 }
 0x22f   : > { %12668 = vst [vmem:[#allocation103_spill] sm:$0xff] %v10751_v3  ;;  %12669 = vst [vmem:[#allocation63_spill] sm:$0xff] %v10754_v11  ;;  %7957 = vmatprep.mubr.msk.f32.mxu0 %vm225_vm1, %v10751_v3  ;;  %v10758_v38 = vld [vmem:[#allocation2 + $0x168] sm:$0xff]  ;;  %v10760_v46 = vld [vmem:[#allocation2 + $0x170] sm:$0xff]  ;;  %v4054_v40 = vrot.slane %v10305_v43, 2  ;;  %v4060_v50 = vrot.slane %v10338_v30, 2 }
 0x230   : > { %7910 = vmatprep.mubr.msk.f32.mxu1 %vm225_vm1, %v10758_v38  ;;  %v3718_v57 = vrot.slane %v10758_v38, 1  ;;  %v3719_v45 = vrot.slane %v10760_v46, 1  ;;  %7958 = vmatmul.mubr.msk.f32.gmra.mxu0 %vm225_vm1, %v10754_v11  ;;  %v10785_v11 = vld [vmem:[%s12100_s4] ss:$0 sm:$0xff] }
 0x231   : > { %7911 = vmatmul.mubr.msk.f32.gmra.mxu1 %vm225_vm1, %v10760_v46  ;;  %12670 = vst [vmem:[#allocation65_spill] sm:$0xff] %v10785_v11  ;;  %v3472_v8 = vadd.f32 %v7867_v7, %v10785_v11  ;;  %v8325_v7 = vld [vmem:[%s12099_s3 + $0x10] sm:$0xf] }
 0x232   : > { %v10775_v63 = vsel %vm741_vm4, %v3718_v57, %v3719_v45  ;;  %v10778_v3 = vsel %vm741_vm4, %v3719_v45, %v3721_v36  ;;  %7965 = vmatprep.mubr.msk.f32.mxu1 %vm225_vm1, %v4051_v26  ;;  %v10793_v36 = vld [vmem:[%s12099_s3 + $0x18] sm:$0xf]  ;;  %v4059_v26 = vrot.slane %v10333_v0, 2  ;;  %v10807_v57 = vsel %vm1148_vm5, %v4054_v40, %v4055_v53  ;;  %v7917_v11 = vpop.f32.mrf.mxu0 }
 0x233   : > { %7960 = vmatprep.mubr.msk.f32.mxu0 %vm225_vm1, %v10775_v63  ;;  %v4057_v45 = vrot.slane %v10289_v47, 2  ;;  %v4064_v40 = vrot.slane %v10376_v56, 2 }
 0x234   : > { %7961 = vmatmul.mubr.msk.f32.gmra.mxu0 %vm225_vm1, %v10778_v3  ;;  %v10824_v47 = vsel %vm1148_vm5, %v4059_v26, %v4060_v50 }
 0x235   : > { %7966 = vmatmul.mubr.msk.f32.vlgmr.msra.gmra.mxu1 %vm225_vm1, %v4053_v23  ;;  %8015 = vmatprep.mubr.msk.f32.mxu0 %vm225_vm1, %v10305_v43  ;;  %v10814_v23 = vadd.f32 %v7917_v11, %v3472_v8  ;;  %v10817_v43 = vsel %vm1148_vm5, %v4055_v53, %v4057_v45  ;;  %v10831_v11 = vld [vmem:[%s12099_s3 + $0x1c] sm:$0xf]  ;;  %v4070_v8 = vrot.slane %v10416_v60, 2 }
 0x236   : > { %8064 = vmatpush3.msk.msra.mxu1 %vm494_vm0, %v8325_v7  ;;  %7968 = vmatprep.mubr.msk.f32.mxu1 %vm225_vm1, %v10807_v57  ;;  %v4065_v7 = vrot.slane %v10378_v24, 2 }
 0x237   : > { %8163 = vmatprep.subr.msk.mxu1 %vm494_vm0, %v10793_v36  ;;  %12671 = vst [vmem:[#allocation30_spill] sm:$0xff] %v10814_v23  ;;  %v4115_v23 = vrot.slane %v10711_v10, 2 }
 0x238   : > { %8016 = vmatmul.mubr.msk.f32.vlgmr.msra.gmra.mxu0 %vm225_vm1, %v10307_v51  ;;  %v4062_v51 = vrot.slane %v10322_v9, 2  ;;  %v4069_v9 = vrot.slane %v10414_v6, 2 }
 0x239   : > { %7969 = vmatmul.mubr.msk.f32.gmra.mxu1 %vm225_vm1, %v10817_v43  ;;  %8018 = vmatprep.mubr.msk.f32.mxu0 %vm225_vm1, %v10333_v0  ;;  %v10850_v0 = vsel %vm1148_vm5, %v4064_v40, %v4065_v7  ;;  %v4079_v40 = vrot.slane %v10491_v16, 2 }
 0x23a   : > { %7971 = vmatprep.mubr.msk.f32.mxu1 %vm225_vm1, %v10824_v47  ;;  %8114 = vmatpush3.msk.msra.mxu0 %vm494_vm0, %v10264_v13  ;;  %v10841_v53 = vsel %vm1148_vm5, %v4060_v50, %v4062_v51  ;;  %12672 = vst [vmem:[#allocation52_spill] sm:$0xff] %v10850_v0  ;;  %v4067_v13 = vrot.slane %v10356_v41, 2  ;;  %v10867_v26 = vsel %vm1148_vm5, %v4069_v9, %v4070_v8  ;;  %v4074_v50 = vrot.slane %v10454_v20, 2 }
 0x23b   : > { %8213 = vmatprep.subr.msk.mxu0 %vm494_vm0, %v10831_v11  ;;  %12674 = vst [vmem:[#allocation66_spill] sm:$0xff] %v10867_v26  ;;  %v4072_v41 = vrot.slane %v10396_v37, 2  ;;  %v4077_v37 = vrot.slane %v10435_v18, 2  ;;  %v4084_v51 = vrot.slane %v10527_v55, 2  ;;  %v4085_v9 = vrot.slane %v10529_v19, 2 }
 0x23c   : > { %8019 = vmatmul.mubr.msk.f32.gmra.mxu0 %vm225_vm1, %v10338_v30  ;;  %v10860_v30 = vsel %vm1148_vm5, %v4065_v7, %v4067_v13  ;;  %v4082_v18 = vrot.slane %v10473_v54, 2  ;;  %v4089_v13 = vrot.slane %v10562_v21, 2  ;;  %v4087_v54 = vrot.slane %v10509_v35, 2 }
 0x23d   : > { %7972 = vmatmul.mubr.msk.f32.gmra.mxu1 %vm225_vm1, %v10841_v53  ;;  %8021 = vmatprep.mubr.msk.f32.mxu0 %vm225_vm1, %v10376_v56  ;;  %12673 = vst [vmem:[#allocation105_spill] sm:$0xff] %v10860_v30  ;;  %v4075_v56 = vrot.slane %v10456_v44, 2  ;;  %v4092_v35 = vrot.slane %v10546_v29, 2  ;;  %v4097_v29 = vrot.slane %v10580_v17, 2  ;;  %v4102_v17 = vrot.slane %v10612_v61, 2 }
 0x23e   : > { %7974 = vmatprep.mubr.msk.f32.mxu1 %vm225_vm1, %v10850_v0  ;;  %v4107_v61 = vrot.slane %v10645_v12, 2  ;;  %v4112_v12 = vrot.slane %v10673_v1, 2  ;;  %v4117_v1 = vrot.slane %v10698_v31, 2  ;;  %v4122_v31 = vrot.slane %v10723_v32, 2 }
 0x23f   : > { %v10884_v45 = vsel %vm1148_vm5, %v4074_v50, %v4075_v56  ;;  %v4090_v50 = vrot.slane %v10564_v25, 2  ;;  %v4127_v32 = vrot.slane %v10748_v15, 2  ;;  %v12700_v15 = vld [vmem:[#allocation27_spill] sm:$0xff] }
 0x240   : > { %8022 = vmatmul.mubr.msk.f32.gmra.mxu0 %vm225_vm1, %v10378_v24  ;;  %v10877_v24 = vsel %vm1148_vm5, %v4070_v8, %v4072_v41  ;;  %12676 = vst [vmem:[#allocation107_spill] sm:$0xff] %v10884_v45  ;;  %v10918_v8 = vsel %vm1148_vm5, %v4084_v51, %v4085_v9 }
 0x241   : > { %7975 = vmatmul.mubr.msk.f32.gmra.mxu1 %vm225_vm1, %v10860_v30  ;;  %8024 = vmatprep.mubr.msk.f32.mxu0 %vm225_vm1, %v10414_v6  ;;  %12675 = vst [vmem:[#allocation42_spill] sm:$0xff] %v10877_v24  ;;  %v4080_v6 = vrot.slane %v10493_v33, 2  ;;  %12680 = vst [vmem:[#allocation67_spill] sm:$0xff] %v10918_v8  ;;  %v10935_v41 = vsel %vm1148_vm5, %v4089_v13, %v4090_v50 }
 0x242   : > { %7977 = vmatprep.mubr.msk.f32.mxu1 %vm225_vm1, %v10867_v26  ;;  %12682 = vst [vmem:[#allocation110_spill] sm:$0xff] %v10935_v41 }
 0x243   : > { %v10901_v7 = vsel %vm1148_vm5, %v4079_v40, %v4080_v6  ;;  %v4094_v40 = vrot.slane %v10595_v14, 2 }
 0x244   : > { %8025 = vmatmul.mubr.msk.f32.gmra.mxu0 %vm225_vm1, %v10416_v60  ;;  %v10894_v60 = vsel %vm1148_vm5, %v4075_v56, %v4077_v37  ;;  %12678 = vst [vmem:[#allocation46_spill] sm:$0xff] %v10901_v7  ;;  %v10928_v56 = vsel %vm1148_vm5, %v4085_v9, %v4087_v54  ;;  %v10945_v37 = vsel %vm1148_vm5, %v4090_v50, %v4092_v35  ;;  %v4099_v9 = vrot.slane %v10627_v49, 2 }
 0x245   : > { %7978 = vmatmul.mubr.msk.f32.gmra.mxu1 %vm225_vm1, %v10877_v24  ;;  %8027 = vmatprep.mubr.msk.f32.mxu0 %vm225_vm1, %v10454_v20  ;;  %12677 = vst [vmem:[#allocation49_spill] sm:$0xff] %v10894_v60  ;;  %12681 = vst [vmem:[#allocation71_spill] sm:$0xff] %v10928_v56  ;;  %v4104_v54 = vrot.slane %v10658_v42, 2 }
 0x246   : > { %7980 = vmatprep.mubr.msk.f32.mxu1 %vm225_vm1, %v10884_v45  ;;  %12683 = vst [vmem:[#allocation106_spill] sm:$0xff] %v10945_v37 }
 0x248   : > { %8028 = vmatmul.mubr.msk.f32.gmra.mxu0 %vm225_vm1, %v10456_v44  ;;  %v10911_v44 = vsel %vm1148_vm5, %v4080_v6, %v4082_v18  ;;  %v4095_v6 = vrot.slane %v10597_v34, 2  ;;  %v4100_v18 = vrot.slane %v10629_v48, 2 }
 0x249   : > { %7981 = vmatmul.mubr.msk.f32.gmra.mxu1 %vm225_vm1, %v10894_v60  ;;  %8030 = vmatprep.mubr.msk.f32.mxu0 %vm225_vm1, %v10491_v16  ;;  %12679 = vst [vmem:[#allocation55_spill] sm:$0xff] %v10911_v44 }
 0x24a   : > { %7983 = vmatprep.mubr.msk.f32.mxu1 %vm225_vm1, %v10901_v7  ;;  %v10952_v51 = vsel %vm1148_vm5, %v4094_v40, %v4095_v6  ;;  %v10962_v13 = vsel %vm1148_vm5, %v4095_v6, %v4097_v29  ;;  %v10969_v50 = vsel %vm1148_vm5, %v4099_v9, %v4100_v18  ;;  %v4105_v40 = vrot.slane %v10660_v5, 2 }
 0x24b   : > { %12684 = vst [vmem:[#allocation94_spill] sm:$0xff] %v10952_v51  ;;  %12685 = vst [vmem:[#allocation58_spill] sm:$0xff] %v10962_v13  ;;  %v10979_v6 = vsel %vm1148_vm5, %v4100_v18, %v4102_v17  ;;  %v4109_v9 = vrot.slane %v10684_v27, 2  ;;  %v4110_v29 = vrot.slane %v10686_v52, 2  ;;  %v4114_v17 = vrot.slane %v10709_v58, 2 }
 0x24c   : > { %8031 = vmatmul.mubr.msk.f32.gmra.mxu0 %vm225_vm1, %v10493_v33  ;;  %12686 = vst [vmem:[#allocation68_spill] sm:$0xff] %v10969_v50  ;;  %12687 = vst [vmem:[#allocation75_spill] sm:$0xff] %v10979_v6  ;;  %v10986_v35 = vsel %vm1148_vm5, %v4104_v54, %v4105_v40  ;;  %v10996_v18 = vsel %vm1148_vm5, %v4105_v40, %v4107_v61  ;;  %v4119_v61 = vrot.slane %v10734_v4, 2 }
 0x24d   : > { %7984 = vmatmul.mubr.msk.f32.gmra.mxu1 %vm225_vm1, %v10911_v44  ;;  %8033 = vmatprep.mubr.msk.f32.mxu0 %vm225_vm1, %v10527_v55  ;;  %12688 = vst [vmem:[#allocation113_spill] sm:$0xff] %v10986_v35  ;;  %12689 = vst [vmem:[#allocation108_spill] sm:$0xff] %v10996_v18  ;;  %v11003_v54 = vsel %vm1148_vm5, %v4109_v9, %v4110_v29  ;;  %v11013_v40 = vsel %vm1148_vm5, %v4110_v29, %v4112_v12  ;;  %v4124_v12 = vrot.slane %v10758_v38, 2 }
 0x24e   : > { %7986 = vmatprep.mubr.msk.f32.mxu1 %vm225_vm1, %v10918_v8  ;;  %12690 = vst [vmem:[#allocation109_spill] sm:$0xff] %v11003_v54  ;;  %12691 = vst [vmem:[#allocation70_spill] sm:$0xff] %v11013_v40  ;;  %v11020_v9 = vsel %vm1148_vm5, %v4114_v17, %v4115_v23  ;;  %v11030_v29 = vsel %vm1148_vm5, %v4115_v23, %v4117_v1  ;;  %v11068_v1 = vld [vmem:[#allocation2 + $0x180] sm:$0xff] }
 0x24f   : > { %12692 = vst [vmem:[#allocation69_spill] sm:$0xff] %v11020_v9  ;;  %12693 = vst [vmem:[#allocation72_spill] sm:$0xff] %v11030_v29 }
 0x250   : > { %8034 = vmatmul.mubr.msk.f32.gmra.mxu0 %vm225_vm1, %v10529_v19 }
 0x251   : > { %7987 = vmatmul.mubr.msk.f32.gmra.mxu1 %vm225_vm1, %v10928_v56  ;;  %8036 = vmatprep.mubr.msk.f32.mxu0 %vm225_vm1, %v10562_v21 }
 0x252   : > { %7989 = vmatprep.mubr.msk.f32.mxu1 %vm225_vm1, %v10935_v41 }
 0x254   : > { %8037 = vmatmul.mubr.msk.f32.gmra.mxu0 %vm225_vm1, %v10564_v25 }
 0x255   : > { %7990 = vmatmul.mubr.msk.f32.gmra.mxu1 %vm225_vm1, %v10945_v37  ;;  %8039 = vmatprep.mubr.msk.f32.mxu0 %vm225_vm1, %v10595_v14 }
 0x256   : > { %7992 = vmatprep.mubr.msk.f32.mxu1 %vm225_vm1, %v10952_v51 }
 0x258   : > { %8040 = vmatmul.mubr.msk.f32.gmra.mxu0 %vm225_vm1, %v10597_v34 }
 0x259   : > { %7993 = vmatmul.mubr.msk.f32.gmra.mxu1 %vm225_vm1, %v10962_v13  ;;  %8042 = vmatprep.mubr.msk.f32.mxu0 %vm225_vm1, %v10627_v49 }
 0x25a   : > { %7995 = vmatprep.mubr.msk.f32.mxu1 %vm225_vm1, %v10969_v50 }
 0x25c   : > { %8043 = vmatmul.mubr.msk.f32.gmra.mxu0 %vm225_vm1, %v10629_v48 }
 0x25d   : > { %7996 = vmatmul.mubr.msk.f32.gmra.mxu1 %vm225_vm1, %v10979_v6  ;;  %8045 = vmatprep.mubr.msk.f32.mxu0 %vm225_vm1, %v10658_v42 }
 0x25e   : > { %7998 = vmatprep.mubr.msk.f32.mxu1 %vm225_vm1, %v10986_v35 }
 0x260   : > { %8046 = vmatmul.mubr.msk.f32.gmra.mxu0 %vm225_vm1, %v10660_v5 }
 0x261   : > { %7999 = vmatmul.mubr.msk.f32.gmra.mxu1 %vm225_vm1, %v10996_v18  ;;  %8048 = vmatprep.mubr.msk.f32.mxu0 %vm225_vm1, %v10684_v27  ;;  %v4120_v27 = vrot.slane %v10736_v28, 2 }
 0x262   : > { %8001 = vmatprep.mubr.msk.f32.mxu1 %vm225_vm1, %v11003_v54 }
 0x263   : > { %v11037_v17 = vsel %vm1148_vm5, %v4119_v61, %v4120_v27  ;;  %v11047_v23 = vsel %vm1148_vm5, %v4120_v27, %v4122_v31  ;;  %v12705_v31 = vld [vmem:[#allocation40_spill] sm:$0xff] }
 0x264   : > { %8049 = vmatmul.mubr.msk.f32.gmra.mxu0 %vm225_vm1, %v10686_v52  ;;  %12694 = vst [vmem:[#allocation74_spill] sm:$0xff] %v11037_v17  ;;  %12695 = vst [vmem:[#allocation73_spill] sm:$0xff] %v11047_v23 }
 0x265   : > { %8002 = vmatmul.mubr.msk.f32.gmra.mxu1 %vm225_vm1, %v11013_v40  ;;  %8051 = vmatprep.mubr.msk.f32.mxu0 %vm225_vm1, %v10709_v58  ;;  %v4125_v58 = vrot.slane %v10760_v46, 2 }
 0x266   : > { %8004 = vmatprep.mubr.msk.f32.mxu1 %vm225_vm1, %v11020_v9 }
 0x267   : > { %v11054_v61 = vsel %vm1148_vm5, %v4124_v12, %v4125_v58  ;;  %v11062_v27 = vsel %vm1148_vm5, %v4125_v58, %v4127_v32  ;;  %v11074_v12 = vld [vmem:[#allocation2 + $0x188] sm:$0xff]  ;;  %v11079_v58 = vld [vmem:[%s12099_s3 + $0x20] sm:$0xf]  ;;  %v12706_v32 = vld [vmem:[#allocation44_spill] sm:$0xff] }
 0x268   : > { %8052 = vmatmul.mubr.msk.f32.gmra.mxu0 %vm225_vm1, %v10711_v10  ;;  %12696 = vst [vmem:[#allocation76_spill] sm:$0xff] %v11054_v61  ;;  %12697 = vst [vmem:[#allocation116_spill] sm:$0xff] %v11062_v27 }
 0x269   : > { %8005 = vmatmul.mubr.msk.f32.gmra.mxu1 %vm225_vm1, %v11030_v29  ;;  %8054 = vmatprep.mubr.msk.f32.mxu0 %vm225_vm1, %v10734_v4 }
 0x26a   : > { %8007 = vmatprep.mubr.msk.f32.mxu1 %vm225_vm1, %v11037_v17 }
 0x26c   : > { %8055 = vmatmul.mubr.msk.f32.gmra.mxu0 %vm225_vm1, %v10736_v28 }
 0x26d   : > { %8008 = vmatmul.mubr.msk.f32.gmra.mxu1 %vm225_vm1, %v11047_v23  ;;  %8057 = vmatprep.mubr.msk.f32.mxu0 %vm225_vm1, %v10758_v38 }
 0x26e   : > { %8010 = vmatprep.mubr.msk.f32.mxu1 %vm225_vm1, %v11054_v61 }
 0x270   : > { %8058 = vmatmul.mubr.msk.f32.gmra.mxu0 %vm225_vm1, %v10760_v46 }
 0x271   : > { %8011 = vmatmul.mubr.msk.f32.gmra.mxu1 %vm225_vm1, %v11062_v27  ;;  %8060 = vmatprep.mubr.msk.f32.mxu0 %vm225_vm1, %v11068_v1 }
 0x272   : > { %8065 = vmatprep.mubr.msk.f32.mxu1 %vm225_vm1, %v10331_v62  ;;  %v12698_v62 = vld [vmem:[#allocation25_spill] sm:$0xff] }
 0x274   : > { %8061 = vmatmul.mubr.msk.f32.gmra.mxu0 %vm225_vm1, %v11074_v12 }
 0x275   : > { %8066 = vmatmul.mubr.msk.f32.vlgmr.msra.gmra.mxu1 %vm225_vm1, %v10336_v59  ;;  %8115 = vmatprep.mubr.msk.f32.mxu0 %vm225_vm1, %v10807_v57  ;;  %v12699_v59 = vld [vmem:[#allocation26_spill] sm:$0xff]  ;;  %v12702_v57 = vld [vmem:[#allocation29_spill] sm:$0xff] }
 0x276   : > { %8164 = vmatpush3.msk.msra.mxu1 %vm494_vm0, %v10793_v36  ;;  %8068 = vmatprep.mubr.msk.f32.mxu1 %vm225_vm1, %v10362_v39  ;;  %v12701_v36 = vld [vmem:[#allocation28_spill] sm:$0xff] }
 0x277   : > { %8263 = vmatprep.subr.msk.mxu1 %vm494_vm0, %v11079_v58 }
 0x278   : > { %8116 = vmatmul.mubr.msk.f32.vlgmr.msra.gmra.mxu0 %vm225_vm1, %v10817_v43  ;;  %v12703_v43 = vld [vmem:[#allocation36_spill] sm:$0xff] }
 0x279   : > { %8069 = vmatmul.mubr.msk.f32.gmra.mxu1 %vm225_vm1, %v12698_v62  ;;  %8118 = vmatprep.mubr.msk.f32.mxu0 %vm225_vm1, %v10824_v47 }
 0x27a   : > { %8071 = vmatprep.mubr.msk.f32.mxu1 %vm225_vm1, %v12699_v59  ;;  %8214 = vmatpush3.msk.msra.mxu0 %vm494_vm0, %v10831_v11  ;;  %v12704_v11 = vld [vmem:[#allocation59_spill] sm:$0xff] }
 0x27c   : > { %8119 = vmatmul.mubr.msk.f32.gmra.mxu0 %vm225_vm1, %v10841_v53 }
 0x27d   : > { %8072 = vmatmul.mubr.msk.f32.gmra.mxu1 %vm225_vm1, %v12700_v15  ;;  %8121 = vmatprep.mubr.msk.f32.mxu0 %vm225_vm1, %v10850_v0 }
 0x27e   : > { %8074 = vmatprep.mubr.msk.f32.mxu1 %vm225_vm1, %v12701_v36 }
 0x280   : > { %8122 = vmatmul.mubr.msk.f32.gmra.mxu0 %vm225_vm1, %v10860_v30 }
 0x281   : > { %8075 = vmatmul.mubr.msk.f32.gmra.mxu1 %vm225_vm1, %v12702_v57  ;;  %8124 = vmatprep.mubr.msk.f32.mxu0 %vm225_vm1, %v10867_v26  ;;  %v12707_v26 = vld [vmem:[#allocation45_spill] sm:$0xff] }
 0x282   : > { %8077 = vmatprep.mubr.msk.f32.mxu1 %vm225_vm1, %v12703_v43 }
 0x284   : > { %8125 = vmatmul.mubr.msk.f32.gmra.mxu0 %vm225_vm1, %v10877_v24  ;;  %v12708_v24 = vld [vmem:[#allocation48_spill] sm:$0xff] }
 0x285   : > { %8078 = vmatmul.mubr.msk.f32.gmra.mxu1 %vm225_vm1, %v12704_v11  ;;  %8127 = vmatprep.mubr.msk.f32.mxu0 %vm225_vm1, %v10884_v45  ;;  %v4996_v45 = vrot.slane %v11074_v12, 2 }
 0x286   : > { %8080 = vmatprep.mubr.msk.f32.mxu1 %vm225_vm1, %v12705_v31 }
 0x288   : > { %8128 = vmatmul.mubr.msk.f32.gmra.mxu0 %vm225_vm1, %v10894_v60  ;;  %v4725_v60 = vrot.slane %v11074_v12, 1 }
 0x289   : > { %8081 = vmatmul.mubr.msk.f32.gmra.mxu1 %vm225_vm1, %v12706_v32  ;;  %8130 = vmatprep.mubr.msk.f32.mxu0 %vm225_vm1, %v10901_v7  ;;  %v12709_v7 = vld [vmem:[#allocation57_spill] sm:$0xff] }
 0x28a   : > { %8083 = vmatprep.mubr.msk.f32.mxu1 %vm225_vm1, %v12707_v26 }
 0x28c   : > { %8131 = vmatmul.mubr.msk.f32.gmra.mxu0 %vm225_vm1, %v10911_v44  ;;  %v12710_v44 = vld [vmem:[#allocation51_spill] sm:$0xff] }
 0x28d   : > { %8084 = vmatmul.mubr.msk.f32.gmra.mxu1 %vm225_vm1, %v12708_v24  ;;  %8133 = vmatprep.mubr.msk.f32.mxu0 %vm225_vm1, %v10918_v8  ;;  %v12711_v8 = vld [vmem:[#allocation54_spill] sm:$0xff] }
 0x28e   : > { %8086 = vmatprep.mubr.msk.f32.mxu1 %vm225_vm1, %v10584_v22 }
 0x290   : > { %8134 = vmatmul.mubr.msk.f32.gmra.mxu0 %vm225_vm1, %v10928_v56  ;;  %v12712_v56 = vld [vmem:[#allocation61_spill] sm:$0xff] }
 0x291   : > { %8087 = vmatmul.mubr.msk.f32.gmra.mxu1 %vm225_vm1, %v10587_v2  ;;  %8136 = vmatprep.mubr.msk.f32.mxu0 %vm225_vm1, %v10935_v41  ;;  %v12713_v41 = vld [vmem:[#allocation47_spill] sm:$0xff] }
 0x292   : > { %8089 = vmatprep.mubr.msk.f32.mxu1 %vm225_vm1, %v12709_v7 }
 0x294   : > { %8137 = vmatmul.mubr.msk.f32.gmra.mxu0 %vm225_vm1, %v10945_v37  ;;  %v12714_v37 = vld [vmem:[#allocation50_spill] sm:$0xff] }
 0x295   : > { %8090 = vmatmul.mubr.msk.f32.gmra.mxu1 %vm225_vm1, %v12710_v44  ;;  %8139 = vmatprep.mubr.msk.f32.mxu0 %vm225_vm1, %v10952_v51  ;;  %v12715_v51 = vld [vmem:[#allocation62_spill] sm:$0xff] }
 0x296   : > { %8092 = vmatprep.mubr.msk.f32.mxu1 %vm225_vm1, %v12711_v8 }
 0x298   : > { %8140 = vmatmul.mubr.msk.f32.gmra.mxu0 %vm225_vm1, %v10962_v13  ;;  %v12716_v13 = vld [vmem:[#allocation53_spill] sm:$0xff] }
 0x299   : > { %8093 = vmatmul.mubr.msk.f32.gmra.mxu1 %vm225_vm1, %v12712_v56  ;;  %8142 = vmatprep.mubr.msk.f32.mxu0 %vm225_vm1, %v10969_v50  ;;  %v12717_v50 = vld [vmem:[#allocation64_spill] sm:$0xff] }
 0x29a   : > { %8095 = vmatprep.mubr.msk.f32.mxu1 %vm225_vm1, %v12713_v41 }
 0x29c   : > { %8143 = vmatmul.mubr.msk.f32.gmra.mxu0 %vm225_vm1, %v10979_v6  ;;  %v12718_v6 = vld [vmem:[#allocation104_spill] sm:$0xff] }
 0x29d   : > { %8096 = vmatmul.mubr.msk.f32.gmra.mxu1 %vm225_vm1, %v12714_v37  ;;  %8145 = vmatprep.mubr.msk.f32.mxu0 %vm225_vm1, %v10986_v35  ;;  %v12719_v35 = vld [vmem:[#allocation103_spill] sm:$0xff] }
 0x29e   : > { %8098 = vmatprep.mubr.msk.f32.mxu1 %vm225_vm1, %v12715_v51 }
 0x2a0   : > { %8146 = vmatmul.mubr.msk.f32.gmra.mxu0 %vm225_vm1, %v10996_v18  ;;  %v4724_v18 = vrot.slane %v11068_v1, 1 }
 0x2a1   : > { %8099 = vmatmul.mubr.msk.f32.gmra.mxu1 %vm225_vm1, %v12716_v13  ;;  %8148 = vmatprep.mubr.msk.f32.mxu0 %vm225_vm1, %v11003_v54  ;;  %v12720_v54 = vld [vmem:[#allocation63_spill] sm:$0xff] }
 0x2a2   : > { %8101 = vmatprep.mubr.msk.f32.mxu1 %vm225_vm1, %v12717_v50 }
 0x2a4   : > { %8149 = vmatmul.mubr.msk.f32.gmra.mxu0 %vm225_vm1, %v11013_v40  ;;  %v4995_v40 = vrot.slane %v11068_v1, 2 }
 0x2a5   : > { %8102 = vmatmul.mubr.msk.f32.gmra.mxu1 %vm225_vm1, %v12718_v6  ;;  %8151 = vmatprep.mubr.msk.f32.mxu0 %vm225_vm1, %v11020_v9  ;;  %v3290_v9 = vld [vmem:[#allocation2 + $0x190] sm:$0x3] }
 0x2a6   : > { %8104 = vmatprep.mubr.msk.f32.mxu1 %vm225_vm1, %v12719_v35 }
 0x2a8   : > { %8152 = vmatmul.mubr.msk.f32.gmra.mxu0 %vm225_vm1, %v11030_v29  ;;  %v11207_v29 = vsel %vm741_vm4, %v4724_v18, %v4725_v60  ;;  %v11222_v18 = vsel %vm1148_vm5, %v4995_v40, %v4996_v45  ;;  %v11237_v40 = vpop.f32.mrf.mxu1 }
 0x2a9   : > { %8105 = vmatmul.mubr.msk.f32.gmra.mxu1 %vm225_vm1, %v12720_v54  ;;  %8154 = vmatprep.mubr.msk.f32.mxu0 %vm225_vm1, %v11037_v17  ;;  %v4727_v17 = vrot.slane %v3290_v9, 1  ;;  %12721 = vst [vmem:[#allocation78_spill] sm:$0xff] %v11222_v18 }
 0x2aa   : > { %8107 = vmatprep.mubr.msk.f32.mxu1 %vm225_vm1, %v10775_v63 }
 0x2ab   : > { %v11215_v30 = vsel %vm741_vm4, %v4725_v60, %v4727_v17  ;;  %v8327_v60 = vld [vmem:[#allocation2 + $0x38] sm:$0xff]  ;;  %v8328_v17 = vld [vmem:[#allocation2 + $0x48] sm:$0xff] }
 0x2ac   : > { %8155 = vmatmul.mubr.msk.f32.gmra.mxu0 %vm225_vm1, %v11047_v23  ;;  %v4998_v23 = vrot.slane %v3290_v9, 2  ;;  %v8329_v9 = vld [vmem:[#allocation2 + $0x50] sm:$0xff] }
 0x2ad   : > { %8108 = vmatmul.mubr.msk.f32.gmra.mxu1 %vm225_vm1, %v10778_v3  ;;  %8157 = vmatprep.mubr.msk.f32.mxu0 %vm225_vm1, %v11054_v61  ;;  %v8326_v61 = vld [vmem:[#allocation2 + $0x30] sm:$0xff] }
 0x2ae   : > { %8110 = vmatprep.mubr.msk.f32.mxu1 %vm225_vm1, %v11207_v29  ;;  %v11228_v0 = vsel %vm1148_vm5, %v4996_v45, %v4998_v23  ;;  %v12723_v23 = vld [vmem:[#allocation65_spill] sm:$0xff] }
 0x2af   : > { %12722 = vst [vmem:[#allocation111_spill] sm:$0xff] %v11228_v0 }
 0x2b0   : > { %8158 = vmatmul.mubr.msk.f32.gmra.mxu0 %vm225_vm1, %v11062_v27 }
 0x2b1   : > { %8111 = vmatmul.mubr.msk.f32.gmra.mxu1 %vm225_vm1, %v11215_v30  ;;  %8160 = vmatprep.mubr.msk.f32.mxu0 %vm225_vm1, %v11222_v18  ;;  %v8331_v18 = vld [vmem:[#allocation2 + $0x68] sm:$0xff] }
 0x2b2   : > { %8165 = vmatprep.mubr.msk.f32.mxu1 %vm225_vm1, %v8326_v61 }
 0x2b4   : > { %8161 = vmatmul.mubr.msk.f32.gmra.mxu0 %vm225_vm1, %v11228_v0 }
 0x2b5   : > { %8166 = vmatmul.mubr.msk.f32.vlgmr.msra.gmra.mxu1 %vm225_vm1, %v8327_v60  ;;  %8215 = vmatprep.mubr.msk.f32.mxu0 %vm225_vm1, %v10362_v39  ;;  %v8330_v39 = vld [vmem:[#allocation2 + $0x60] sm:$0xff] }
 0x2b6   : > { %8264 = vmatpush3.msk.msra.mxu1 %vm494_vm0, %v11079_v58  ;;  %8168 = vmatprep.mubr.msk.f32.mxu1 %vm225_vm1, %v8328_v17  ;;  %v11247_v58 = vpop.f32.mrf.mxu0 }
 0x2b8   : > { %8216 = vmatmul.mubr.msk.f32.vlgmr.msra.gmra.mxu0 %vm225_vm1, %v12698_v62  ;;  %v7870_v45 = vpop.f32.mrf.mxu1 }
 0x2b9   : > { %8169 = vmatmul.mubr.msk.f32.gmra.mxu1 %vm225_vm1, %v8329_v9  ;;  %v3482_v61 = vadd.f32 %v7870_v45, %v12723_v23  ;;  %8218 = vmatprep.mubr.msk.f32.mxu0 %vm225_vm1, %v12699_v59 }
 0x2ba   : > { %8171 = vmatprep.mubr.msk.f32.mxu1 %vm225_vm1, %v8330_v39  ;;  %v3476_v60 = vpop.f32.mrf.mxu1 }
 0x2bb   : > { %v3477_v17 = vadd.f32 %v12723_v23, %v3476_v60  ;;  %v7920_v0 = vpop.f32.mrf.mxu0 }
 0x2bc   : > { %8219 = vmatmul.mubr.msk.f32.gmra.mxu0 %vm225_vm1, %v12700_v15  ;;  %v7873_v62 = vpop.f32.mrf.mxu1  ;;  %v11253_v45 = vadd.f32 %v7920_v0, %v3482_v61 }
 0x2bd   : > { %8172 = vmatmul.mubr.msk.f32.gmra.mxu1 %vm225_vm1, %v8331_v18  ;;  %v3492_v59 = vadd.f32 %v7873_v62, %v12723_v23  ;;  %8221 = vmatprep.mubr.msk.f32.mxu0 %vm225_vm1, %v12701_v36  ;;  %v3866_v9 = vpop.f32.mrf.mxu0  ;;  %v8332_v18 = vld [vmem:[#allocation2 + $0x80] sm:$0xff] }
 0x2be   : > { %8174 = vmatprep.mubr.msk.f32.mxu1 %vm225_vm1, %v10454_v20  ;;  %v3486_v39 = vpop.f32.mrf.mxu1  ;;  %v11260_v60 = vadd.f32 %v3866_v9, %v3477_v17 }
 0x2bf   : > { %v3487_v15 = vadd.f32 %v12723_v23, %v3486_v39  ;;  %v7923_v27 = vpop.f32.mrf.mxu0 }
 0x2c0   : > { %8222 = vmatmul.mubr.msk.f32.gmra.mxu0 %vm225_vm1, %v12702_v57  ;;  %v7876_v0 = vpop.f32.mrf.mxu1  ;;  %v11266_v61 = vadd.f32 %v7923_v27, %v3492_v59 }
 0x2c1   : > { %8175 = vmatmul.mubr.msk.f32.gmra.mxu1 %vm225_vm1, %v8332_v18  ;;  %v3502_v36 = vadd.f32 %v7876_v0, %v12723_v23  ;;  %8224 = vmatprep.mubr.msk.f32.mxu0 %vm225_vm1, %v12703_v43  ;;  %v3876_v20 = vpop.f32.mrf.mxu0 }
 0x2c2   : > { %8177 = vmatprep.mubr.msk.f32.mxu1 %vm225_vm1, %v10491_v16  ;;  %v3496_v17 = vpop.f32.mrf.mxu1  ;;  %v11273_v62 = vadd.f32 %v3876_v20, %v3487_v15 }
 0x2c3   : > { %v3497_v57 = vadd.f32 %v12723_v23, %v3496_v17  ;;  %v7926_v9 = vpop.f32.mrf.mxu0 }
 0x2c4   : > { %8225 = vmatmul.mubr.msk.f32.gmra.mxu0 %vm225_vm1, %v12704_v11  ;;  %v7879_v27 = vpop.f32.mrf.mxu1  ;;  %v11280_v59 = vadd.f32 %v7926_v9, %v3502_v36 }
 0x2c5   : > { %8178 = vmatmul.mubr.msk.f32.gmra.mxu1 %vm225_vm1, %v10493_v33  ;;  %v3512_v43 = vadd.f32 %v7879_v27, %v12723_v23  ;;  %8227 = vmatprep.mubr.msk.f32.mxu0 %vm225_vm1, %v12705_v31  ;;  %v3886_v16 = vpop.f32.mrf.mxu0 }
 0x2c6   : > { %8180 = vmatprep.mubr.msk.f32.mxu1 %vm225_vm1, %v10527_v55  ;;  %v3506_v39 = vpop.f32.mrf.mxu1  ;;  %v11287_v15 = vadd.f32 %v3886_v16, %v3497_v57 }
 0x2c7   : > { %v3507_v11 = vadd.f32 %v12723_v23, %v3506_v39  ;;  %v7929_v0 = vpop.f32.mrf.mxu0 }
 0x2c8   : > { %8228 = vmatmul.mubr.msk.f32.gmra.mxu0 %vm225_vm1, %v12706_v32  ;;  %v11294_v18 = vadd.f32 %v7929_v0, %v3512_v43 }
 0x2c9   : > { %v7882_v33 = vpop.f32.mrf.mxu1  ;;  %8181 = vmatmul.mubr.msk.f32.gmra.mxu1 %vm225_vm1, %v10529_v19  ;;  %8230 = vmatprep.mubr.msk.f32.mxu0 %vm225_vm1, %v12707_v26  ;;  %v3896_v55 = vpop.f32.mrf.mxu0 }
 0x2ca   : > { %v3522_v31 = vadd.f32 %v7882_v33, %v12723_v23  ;;  %8183 = vmatprep.mubr.msk.f32.mxu1 %vm225_vm1, %v10562_v21  ;;  %v11301_v20 = vadd.f32 %v3896_v55, %v3507_v11 }
 0x2cb   : > { %v3516_v36 = vpop.f32.mrf.mxu1 }
 0x2cc   : > { %v3517_v32 = vadd.f32 %v12723_v23, %v3516_v36  ;;  %v7932_v17 = vpop.f32.mrf.mxu0  ;;  %8231 = vmatmul.mubr.msk.f32.gmra.mxu0 %vm225_vm1, %v12708_v24 }
 0x2cd   : > { %v7885_v19 = vpop.f32.mrf.mxu1  ;;  %8184 = vmatmul.mubr.msk.f32.gmra.mxu1 %vm225_vm1, %v10564_v25  ;;  %v11308_v57 = vadd.f32 %v7932_v17, %v3522_v31  ;;  %8233 = vmatprep.mubr.msk.f32.mxu0 %vm225_vm1, %v10584_v22 }
 0x2ce   : > { %v3532_v26 = vadd.f32 %v7885_v19, %v12723_v23  ;;  %8186 = vmatprep.mubr.msk.f32.mxu1 %vm225_vm1, %v10595_v14  ;;  %v3906_v21 = vpop.f32.mrf.mxu0 }
 0x2cf   : > { %v3526_v9 = vpop.f32.mrf.mxu1  ;;  %v11315_v27 = vadd.f32 %v3906_v21, %v3517_v32 }
 0x2d0   : > { %v3527_v24 = vadd.f32 %v12723_v23, %v3526_v9  ;;  %v7935_v43 = vpop.f32.mrf.mxu0  ;;  %8234 = vmatmul.mubr.msk.f32.gmra.mxu0 %vm225_vm1, %v10587_v2 }
 0x2d1   : > { %v7888_v25 = vpop.f32.mrf.mxu1  ;;  %8187 = vmatmul.mubr.msk.f32.gmra.mxu1 %vm225_vm1, %v10597_v34  ;;  %v11322_v16 = vadd.f32 %v7935_v43, %v3532_v26  ;;  %8236 = vmatprep.mubr.msk.f32.mxu0 %vm225_vm1, %v12709_v7 }
 0x2d2   : > { %v3542_v22 = vadd.f32 %v7888_v25, %v12723_v23  ;;  %8189 = vmatprep.mubr.msk.f32.mxu1 %vm225_vm1, %v10627_v49  ;;  %v3916_v14 = vpop.f32.mrf.mxu0 }
 0x2d3   : > { %v3536_v39 = vpop.f32.mrf.mxu1  ;;  %v11329_v11 = vadd.f32 %v3916_v14, %v3527_v24  ;;  %v12725_v24 = vld [vmem:[#allocation56_spill] sm:$0xff] }
 0x2d4   : > { %v3537_v2 = vadd.f32 %v12723_v23, %v3536_v39  ;;  %v7938_v0 = vpop.f32.mrf.mxu0  ;;  %8237 = vmatmul.mubr.msk.f32.gmra.mxu0 %vm225_vm1, %v12710_v44 }
 0x2d5   : > { %v7891_v34 = vpop.f32.mrf.mxu1  ;;  %8190 = vmatmul.mubr.msk.f32.gmra.mxu1 %vm225_vm1, %v10629_v48  ;;  %v11336_v33 = vadd.f32 %v7938_v0, %v3542_v22  ;;  %8239 = vmatprep.mubr.msk.f32.mxu0 %vm225_vm1, %v12711_v8 }
 0x2d6   : > { %v3552_v7 = vadd.f32 %v7891_v34, %v12723_v23  ;;  %8192 = vmatprep.mubr.msk.f32.mxu1 %vm225_vm1, %v10658_v42  ;;  %v3926_v49 = vpop.f32.mrf.mxu0  ;;  %v12724_v42 = vld [vmem:[#allocation60_spill] sm:$0xff] }
 0x2d7   : > { %v3546_v31 = vpop.f32.mrf.mxu1  ;;  %v11343_v55 = vadd.f32 %v3926_v49, %v3537_v2 }
 0x2d8   : > { %v3547_v44 = vadd.f32 %v12723_v23, %v3546_v31  ;;  %v7941_v36 = vpop.f32.mrf.mxu0  ;;  %8240 = vmatmul.mubr.msk.f32.gmra.mxu0 %vm225_vm1, %v12712_v56 }
 0x2d9   : > { %v7894_v48 = vpop.f32.mrf.mxu1  ;;  %8193 = vmatmul.mubr.msk.f32.gmra.mxu1 %vm225_vm1, %v10660_v5  ;;  %v11350_v32 = vadd.f32 %v7941_v36, %v3552_v7  ;;  %8242 = vmatprep.mubr.msk.f32.mxu0 %vm225_vm1, %v12713_v41  ;;  %v11402_v36 = vld [vmem:[#allocation2 + $0x198] sm:$0xff] }
 0x2da   : > { %v3562_v8 = vadd.f32 %v7894_v48, %v12723_v23  ;;  %8195 = vmatprep.mubr.msk.f32.mxu1 %vm225_vm1, %v12724_v42  ;;  %v3936_v17 = vpop.f32.mrf.mxu0  ;;  %v11404_v48 = vld [vmem:[#allocation2 + $0x1a0] sm:$0xff] }
 0x2db   : > { %v3556_v19 = vpop.f32.mrf.mxu1  ;;  %v11357_v26 = vadd.f32 %v3936_v17, %v3547_v44 }
 0x2dc   : > { %v3557_v56 = vadd.f32 %v12723_v23, %v3556_v19  ;;  %v7944_v21 = vpop.f32.mrf.mxu0  ;;  %8243 = vmatmul.mubr.msk.f32.gmra.mxu0 %vm225_vm1, %v12714_v37  ;;  %v5535_v19 = vrot.slane %v11402_v36, 1 }
 0x2dd   : > { %v7897_v5 = vpop.f32.mrf.mxu1  ;;  %8196 = vmatmul.mubr.msk.f32.gmra.mxu1 %vm225_vm1, %v10686_v52  ;;  %v11364_v9 = vadd.f32 %v7944_v21, %v3562_v8  ;;  %8245 = vmatprep.mubr.msk.f32.mxu0 %vm225_vm1, %v12715_v51 }
 0x2de   : > { %v3572_v41 = vadd.f32 %v7897_v5, %v12723_v23  ;;  %8198 = vmatprep.mubr.msk.f32.mxu1 %vm225_vm1, %v12725_v24  ;;  %v3946_v43 = vpop.f32.mrf.mxu0 }
 0x2df   : > { %v3566_v25 = vpop.f32.mrf.mxu1  ;;  %v11371_v22 = vadd.f32 %v3946_v43, %v3557_v56  ;;  %v11419_v56 = vld [vmem:[#allocation2 + $0x1a8] sm:$0x3] }
 0x2e0   : > { %v3567_v37 = vadd.f32 %v12723_v23, %v3566_v25  ;;  %v7947_v14 = vpop.f32.mrf.mxu0  ;;  %8246 = vmatmul.mubr.msk.f32.gmra.mxu0 %vm225_vm1, %v12716_v13  ;;  %v5538_v24 = vrot.slane %v11419_v56, 1 }
 0x2e1   : > { %v7900_v52 = vpop.f32.mrf.mxu1  ;;  %8199 = vmatmul.mubr.msk.f32.gmra.mxu1 %vm225_vm1, %v10711_v10  ;;  %v11378_v39 = vadd.f32 %v7947_v14, %v3572_v41  ;;  %8248 = vmatprep.mubr.msk.f32.mxu0 %vm225_vm1, %v12717_v50  ;;  %v3467_v14 = vadd.f32 %v12723_v23, %v11237_v40 }
 0x2e2   : > { %v3582_v51 = vadd.f32 %v7900_v52, %v12723_v23  ;;  %8201 = vmatprep.mubr.msk.f32.mxu1 %vm225_vm1, %v10734_v4  ;;  %v3956_v2 = vpop.f32.mrf.mxu0 }
 0x2e3   : > { %v3576_v0 = vpop.f32.mrf.mxu1  ;;  %v11385_v34 = vadd.f32 %v3956_v2, %v3567_v37 }
 0x2e4   : > { %v3577_v13 = vadd.f32 %v12723_v23, %v3576_v0  ;;  %v7950_v7 = vpop.f32.mrf.mxu0  ;;  %8249 = vmatmul.mubr.msk.f32.gmra.mxu0 %vm225_vm1, %v12718_v6 }
 0x2e5   : > { %v7903_v10 = vpop.f32.mrf.mxu1  ;;  %8202 = vmatmul.mubr.msk.f32.gmra.mxu1 %vm225_vm1, %v10736_v28  ;;  %v11392_v49 = vadd.f32 %v7950_v7, %v3582_v51  ;;  %8251 = vmatprep.mubr.msk.f32.mxu0 %vm225_vm1, %v12719_v35 }
 0x2e6   : > { %v3592_v50 = vadd.f32 %v7903_v10, %v12723_v23  ;;  %8204 = vmatprep.mubr.msk.f32.mxu1 %vm225_vm1, %v10758_v38  ;;  %v3966_v4 = vpop.f32.mrf.mxu0 }
 0x2e7   : > { %v3586_v31 = vpop.f32.mrf.mxu1  ;;  %v11399_v44 = vadd.f32 %v3966_v4, %v3577_v13  ;;  %v4015_v4 = vadd.f32 %v11247_v58, %v3467_v14 }
 0x2e8   : > { %v3587_v6 = vadd.f32 %v12723_v23, %v3586_v31  ;;  %v7953_v28 = vpop.f32.mrf.mxu0  ;;  %8252 = vmatmul.mubr.msk.f32.gmra.mxu0 %vm225_vm1, %v12720_v54  ;;  %v5536_v54 = vrot.slane %v11404_v48, 1  ;;  %v12726_v31 = vld [vmem:[#allocation30_spill] sm:$0xff] }
 0x2e9   : > { %v7906_v8 = vpop.f32.mrf.mxu1  ;;  %8205 = vmatmul.mubr.msk.f32.gmra.mxu1 %vm225_vm1, %v10760_v46  ;;  %v11410_v35 = vadd.f32 %v7953_v28, %v3592_v50  ;;  %8254 = vmatprep.mubr.msk.f32.mxu0 %vm225_vm1, %v10775_v63  ;;  %v12727_v28 = vld [vmem:[#allocation52_spill] sm:$0xff] }
 0x2ea   : > { %v3602_v38 = vadd.f32 %v7906_v8, %v12723_v23  ;;  %8207 = vmatprep.mubr.msk.f32.mxu1 %vm225_vm1, %v11068_v1  ;;  %v3976_v42 = vpop.f32.mrf.mxu0  ;;  %v5539_v0 = vsel %vm741_vm4, %v5536_v54, %v5538_v24 }
 0x2eb   : > { %v3596_v17 = vpop.f32.mrf.mxu1  ;;  %v11421_v21 = vadd.f32 %v3976_v42, %v3587_v6 }
 0x2ec   : > { %v3597_v46 = vadd.f32 %v12723_v23, %v3596_v17  ;;  %v7956_v5 = vpop.f32.mrf.mxu0  ;;  %8255 = vmatmul.mubr.msk.f32.gmra.mxu0 %vm225_vm1, %v10778_v3  ;;  %v5537_v3 = vsel %vm741_vm4, %v5535_v19, %v5536_v54  ;;  %v12728_v54 = vld [vmem:[#allocation105_spill] sm:$0xff] }
 0x2ed   : > { %v7909_v63 = vpop.f32.mrf.mxu1  ;;  %8208 = vmatmul.mubr.msk.f32.gmra.mxu1 %vm225_vm1, %v11074_v12  ;;  %v11428_v1 = vadd.f32 %v7956_v5, %v3602_v38  ;;  %8257 = vmatprep.mubr.msk.f32.mxu0 %vm225_vm1, %v11207_v29 }
 0x2ee   : > { %v3612_v41 = vadd.f32 %v7909_v63, %v12723_v23  ;;  %8210 = vmatprep.mubr.msk.f32.mxu1 %vm225_vm1, %v11402_v36  ;;  %v3986_v43 = vpop.f32.mrf.mxu0 }
 0x2ef   : > { %v3606_v25 = vpop.f32.mrf.mxu1  ;;  %v11437_v37 = vadd.f32 %v3986_v43, %v3597_v46  ;;  %v12729_v46 = vld [vmem:[#allocation66_spill] sm:$0xff] }
 0x2f0   : > { %v3607_v12 = vadd.f32 %v12723_v23, %v3606_v25  ;;  %v7959_v52 = vpop.f32.mrf.mxu0  ;;  %8258 = vmatmul.mubr.msk.f32.gmra.mxu0 %vm225_vm1, %v11215_v30 }
 0x2f1   : > { %v7912_v29 = vpop.f32.mrf.mxu1  ;;  %8211 = vmatmul.mubr.msk.f32.gmra.mxu1 %vm225_vm1, %v11404_v48  ;;  %v11446_v51 = vadd.f32 %v7959_v52, %v3612_v41  ;;  %8260 = vmatprep.mubr.msk.f32.mxu0 %vm225_vm1, %v5537_v3  ;;  %v12730_v3 = vld [vmem:[#allocation42_spill] sm:$0xff]  ;;  %v12731_v52 = vld [vmem:[#allocation107_spill] sm:$0xff] }
 0x2f2   : > { %v3622_v2 = vadd.f32 %v7912_v29, %v12723_v23  ;;  %8265 = vmatprep.mubr.msk.f32.mxu1 %vm225_vm1, %v10824_v47  ;;  %v3996_v40 = vpop.f32.mrf.mxu0 }
 0x2f3   : > { %v3616_v13 = vpop.f32.mrf.mxu1  ;;  %v11453_v7 = vadd.f32 %v3996_v40, %v3607_v12 }
 0x2f4   : > { %v3617_v30 = vadd.f32 %v12723_v23, %v3616_v13  ;;  %v7962_v10 = vpop.f32.mrf.mxu0  ;;  %8261 = vmatmul.mubr.msk.f32.gmra.mxu0 %vm225_vm1, %v5539_v0  ;;  %v12732_v13 = vld [vmem:[#allocation49_spill] sm:$0xff] }
 0x2f5   : > { %v7967_v50 = vpop.f32.mrf.mxu1  ;;  %8266 = vmatmul.mubr.msk.f32.vlgmr.msra.gmra.mxu1 %vm225_vm1, %v10841_v53  ;;  %v11460_v47 = vadd.f32 %v7962_v10, %v3622_v2 }
 0x2f6   : > { %v4422_v6 = vadd.f32 %v7967_v50, %v12726_v31  ;;  %8268 = vmatprep.mubr.msk.f32.mxu1 %vm225_vm1, %v12727_v28  ;;  %v4006_v8 = vpop.f32.mrf.mxu0  ;;  %v12733_v50 = vld [vmem:[#allocation46_spill] sm:$0xff] }
 0x2f7   : > { %v4262_v38 = vpop.f32.mrf.mxu1  ;;  %v11465_v42 = vadd.f32 %v4006_v8, %v3617_v30  ;;  %v12734_v8 = vld [vmem:[#allocation55_spill] sm:$0xff] }
 0x2f8   : > { %v4421_v23 = vadd.f32 %v4262_v38, %v4015_v4  ;;  %v8017_v17 = vpop.f32.mrf.mxu0 }
 0x2f9   : > { %v7970_v19 = vpop.f32.mrf.mxu1  ;;  %8269 = vmatmul.mubr.msk.f32.gmra.mxu1 %vm225_vm1, %v12728_v54  ;;  %v11469_v53 = vadd.f32 %v8017_v17, %v4422_v6  ;;  %v12735_v17 = vld [vmem:[#allocation67_spill] sm:$0xff] }
 0x2fa   : > { %v4424_v58 = vadd.f32 %v7970_v19, %v11253_v45  ;;  %8271 = vmatprep.mubr.msk.f32.mxu1 %vm225_vm1, %v12729_v46  ;;  %v4530_v5 = vpop.f32.mrf.mxu0 }
 0x2fb   : > { %v4272_v63 = vpop.f32.mrf.mxu1  ;;  %v11474_v41 = vadd.f32 %v4530_v5, %v4421_v23  ;;  %v12736_v5 = vld [vmem:[#allocation71_spill] sm:$0xff] }
 0x2fc   : > { %v4423_v24 = vadd.f32 %v4272_v63, %v11260_v60  ;;  %v8020_v43 = vpop.f32.mrf.mxu0 }
 0x2fd   : > { %v7973_v25 = vpop.f32.mrf.mxu1  ;;  %8272 = vmatmul.mubr.msk.f32.gmra.mxu1 %vm225_vm1, %v12730_v3  ;;  %v11479_v12 = vadd.f32 %v8020_v43, %v4424_v58  ;;  %v12737_v43 = vld [vmem:[#allocation110_spill] sm:$0xff] }
 0x2fe   : > { %v4426_v14 = vadd.f32 %v7973_v25, %v11266_v61  ;;  %8274 = vmatprep.mubr.msk.f32.mxu1 %vm225_vm1, %v12731_v52  ;;  %v4540_v45 = vpop.f32.mrf.mxu0 }
 0x2ff   : > { %v4282_v29 = vpop.f32.mrf.mxu1  ;;  %v11484_v2 = vadd.f32 %v4540_v45, %v4423_v24  ;;  %v12738_v45 = vld [vmem:[#allocation106_spill] sm:$0xff] }
 0x300   : > { %v4425_v0 = vadd.f32 %v4282_v29, %v11273_v62  ;;  %v8023_v40 = vpop.f32.mrf.mxu0 }
 0x301   : > { %v7976_v60 = vpop.f32.mrf.mxu1  ;;  %8275 = vmatmul.mubr.msk.f32.gmra.mxu1 %vm225_vm1, %v12732_v13  ;;  %v11489_v30 = vadd.f32 %v8023_v40, %v4426_v14  ;;  %v12739_v40 = vld [vmem:[#allocation94_spill] sm:$0xff] }
 0x302   : > { %v4428_v10 = vadd.f32 %v7976_v60, %v11280_v59  ;;  %8277 = vmatprep.mubr.msk.f32.mxu1 %vm225_vm1, %v12733_v50  ;;  %v4550_v61 = vpop.f32.mrf.mxu0 }
 0x303   : > { %v4292_v4 = vpop.f32.mrf.mxu1  ;;  %v11494_v31 = vadd.f32 %v4550_v61, %v4425_v0  ;;  %v12740_v61 = vld [vmem:[#allocation58_spill] sm:$0xff] }
 0x304   : > { %v4427_v6 = vadd.f32 %v4292_v4, %v11287_v15  ;;  %v8026_v28 = vpop.f32.mrf.mxu0 }
 0x305   : > { %v7979_v62 = vpop.f32.mrf.mxu1  ;;  %8278 = vmatmul.mubr.msk.f32.gmra.mxu1 %vm225_vm1, %v12734_v8  ;;  %v11499_v38 = vadd.f32 %v8026_v28, %v4428_v10  ;;  %v12741_v28 = vld [vmem:[#allocation68_spill] sm:$0xff] }
 0x306   : > { %v4430_v23 = vadd.f32 %v7979_v62, %v11294_v18  ;;  %8280 = vmatprep.mubr.msk.f32.mxu1 %vm225_vm1, %v12735_v17  ;;  %v4560_v59 = vpop.f32.mrf.mxu0 }
 0x307   : > { %v4302_v19 = vpop.f32.mrf.mxu1  ;;  %v11504_v54 = vadd.f32 %v4560_v59, %v4427_v6  ;;  %v12742_v59 = vld [vmem:[#allocation75_spill] sm:$0xff] }
 0x308   : > { %v4429_v58 = vadd.f32 %v4302_v19, %v11301_v20  ;;  %v8029_v46 = vpop.f32.mrf.mxu0 }
 0x309   : > { %v7982_v15 = vpop.f32.mrf.mxu1  ;;  %8281 = vmatmul.mubr.msk.f32.gmra.mxu1 %vm225_vm1, %v12736_v5  ;;  %v11509_v63 = vadd.f32 %v8029_v46, %v4430_v23  ;;  %v12743_v46 = vld [vmem:[#allocation113_spill] sm:$0xff] }
 0x30a   : > { %v4432_v24 = vadd.f32 %v7982_v15, %v11308_v57  ;;  %8283 = vmatprep.mubr.msk.f32.mxu1 %vm225_vm1, %v12737_v43  ;;  %v4570_v18 = vpop.f32.mrf.mxu0 }
 0x30b   : > { %v4312_v25 = vpop.f32.mrf.mxu1  ;;  %v11514_v3 = vadd.f32 %v4570_v18, %v4429_v58  ;;  %v12744_v18 = vld [vmem:[#allocation108_spill] sm:$0xff] }
 0x30c   : > { %v4431_v14 = vadd.f32 %v4312_v25, %v11315_v27  ;;  %v8032_v52 = vpop.f32.mrf.mxu0 }
 0x30d   : > { %v7985_v20 = vpop.f32.mrf.mxu1  ;;  %8284 = vmatmul.mubr.msk.f32.gmra.mxu1 %vm225_vm1, %v12738_v45  ;;  %v11519_v29 = vadd.f32 %v8032_v52, %v4432_v24  ;;  %v12745_v52 = vld [vmem:[#allocation109_spill] sm:$0xff] }
 0x30e   : > { %v4434_v0 = vadd.f32 %v7985_v20, %v11322_v16  ;;  %8286 = vmatprep.mubr.msk.f32.mxu1 %vm225_vm1, %v12739_v40  ;;  %v4580_v57 = vpop.f32.mrf.mxu0 }
 0x30f   : > { %v4322_v60 = vpop.f32.mrf.mxu1  ;;  %v11524_v13 = vadd.f32 %v4580_v57, %v4431_v14  ;;  %v12746_v57 = vld [vmem:[#allocation70_spill] sm:$0xff] }
 0x310   : > { %v4433_v10 = vadd.f32 %v4322_v60, %v11329_v11  ;;  %v8035_v50 = vpop.f32.mrf.mxu0 }
 0x311   : > { %v7988_v27 = vpop.f32.mrf.mxu1  ;;  %8287 = vmatmul.mubr.msk.f32.gmra.mxu1 %vm225_vm1, %v12740_v61  ;;  %v11529_v4 = vadd.f32 %v8035_v50, %v4434_v0  ;;  %v12747_v50 = vld [vmem:[#allocation69_spill] sm:$0xff] }
 0x312   : > { %v4436_v6 = vadd.f32 %v7988_v27, %v11336_v33  ;;  %8289 = vmatprep.mubr.msk.f32.mxu1 %vm225_vm1, %v12741_v28  ;;  %v4590_v16 = vpop.f32.mrf.mxu0 }
 0x313   : > { %v4332_v62 = vpop.f32.mrf.mxu1  ;;  %v11534_v8 = vadd.f32 %v4590_v16, %v4433_v10  ;;  %v12748_v16 = vld [vmem:[#allocation72_spill] sm:$0xff] }
 0x314   : > { %v4435_v23 = vadd.f32 %v4332_v62, %v11343_v55  ;;  %v8038_v17 = vpop.f32.mrf.mxu0 }
 0x315   : > { %v7991_v11 = vpop.f32.mrf.mxu1  ;;  %8290 = vmatmul.mubr.msk.f32.gmra.mxu1 %vm225_vm1, %v12742_v59  ;;  %v11539_v19 = vadd.f32 %v8038_v17, %v4436_v6  ;;  %v12749_v17 = vld [vmem:[#allocation74_spill] sm:$0xff] }
 0x316   : > { %v4438_v58 = vadd.f32 %v7991_v11, %v11350_v32  ;;  %8292 = vmatprep.mubr.msk.f32.mxu1 %vm225_vm1, %v12743_v46  ;;  %v4600_v33 = vpop.f32.mrf.mxu0 }
 0x317   : > { %v4342_v15 = vpop.f32.mrf.mxu1  ;;  %v11544_v5 = vadd.f32 %v4600_v33, %v4435_v23  ;;  %v12750_v33 = vld [vmem:[#allocation73_spill] sm:$0xff] }
 0x318   : > { %v4437_v24 = vadd.f32 %v4342_v15, %v11357_v26  ;;  %v8041_v43 = vpop.f32.mrf.mxu0 }
 0x319   : > { %v7994_v55 = vpop.f32.mrf.mxu1  ;;  %8293 = vmatmul.mubr.msk.f32.gmra.mxu1 %vm225_vm1, %v12744_v18  ;;  %v11549_v25 = vadd.f32 %v8041_v43, %v4438_v58  ;;  %v12751_v43 = vld [vmem:[#allocation76_spill] sm:$0xff] }
 0x31a   : > { %v4440_v14 = vadd.f32 %v7994_v55, %v11364_v9  ;;  %8295 = vmatprep.mubr.msk.f32.mxu1 %vm225_vm1, %v12745_v52  ;;  %v4610_v32 = vpop.f32.mrf.mxu0 }
 0x31b   : > { %v4352_v20 = vpop.f32.mrf.mxu1  ;;  %v11554_v45 = vadd.f32 %v4610_v32, %v4437_v24 }
 0x31c   : > { %v4439_v0 = vadd.f32 %v4352_v20, %v11371_v22  ;;  %v8044_v40 = vpop.f32.mrf.mxu0 }
 0x31d   : > { %v7997_v26 = vpop.f32.mrf.mxu1  ;;  %8296 = vmatmul.mubr.msk.f32.gmra.mxu1 %vm225_vm1, %v12746_v57  ;;  %v11559_v60 = vadd.f32 %v8044_v40, %v4440_v14  ;;  %v5807_v14 = vrot.slane %v11404_v48, 2 }
 0x31e   : > { %v4442_v10 = vadd.f32 %v7997_v26, %v11378_v39  ;;  %8298 = vmatprep.mubr.msk.f32.mxu1 %vm225_vm1, %v12747_v50  ;;  %v4620_v9 = vpop.f32.mrf.mxu0  ;;  %v12753_v26 = vld [vmem:[#allocation78_spill] sm:$0xff] }
 0x31f   : > { %v4362_v27 = vpop.f32.mrf.mxu1  ;;  %v11564_v61 = vadd.f32 %v4620_v9, %v4439_v0  ;;  %v12752_v0 = vld [vmem:[#allocation116_spill] sm:$0xff] }
 0x320   : > { %v4441_v6 = vadd.f32 %v4362_v27, %v11385_v34  ;;  %v8047_v28 = vpop.f32.mrf.mxu0 }
 0x321   : > { %v8000_v22 = vpop.f32.mrf.mxu1  ;;  %8299 = vmatmul.mubr.msk.f32.gmra.mxu1 %vm225_vm1, %v12748_v16  ;;  %v11569_v62 = vadd.f32 %v8047_v28, %v4442_v10 }
 0x322   : > { %v4444_v23 = vadd.f32 %v8000_v22, %v11392_v49  ;;  %8301 = vmatprep.mubr.msk.f32.mxu1 %vm225_vm1, %v12749_v17  ;;  %v4630_v39 = vpop.f32.mrf.mxu0  ;;  %v5806_v49 = vrot.slane %v11402_v36, 2  ;;  %v5809_v36 = vrot.slane %v11419_v56, 2 }
 0x323   : > { %v4372_v11 = vpop.f32.mrf.mxu1  ;;  %v11574_v59 = vadd.f32 %v4630_v39, %v4441_v6  ;;  %v12754_v6 = vld [vmem:[#allocation111_spill] sm:$0xff] }
 0x324   : > { %v4443_v58 = vadd.f32 %v4372_v11, %v11399_v44  ;;  %v8050_v46 = vpop.f32.mrf.mxu0  ;;  %v5808_v10 = vsel %vm1148_vm5, %v5806_v49, %v5807_v14  ;;  %v5810_v56 = vsel %vm1148_vm5, %v5807_v14, %v5809_v36 }
 0x325   : > { %v8003_v34 = vpop.f32.mrf.mxu1  ;;  %8302 = vmatmul.mubr.msk.f32.gmra.mxu1 %vm225_vm1, %v12750_v33  ;;  %v11579_v15 = vadd.f32 %v8050_v46, %v4444_v23 }
 0x326   : > { %v4446_v24 = vadd.f32 %v8003_v34, %v11410_v35  ;;  %8304 = vmatprep.mubr.msk.f32.mxu1 %vm225_vm1, %v12751_v43  ;;  %v4640_v55 = vpop.f32.mrf.mxu0 }
 0x327   : > { %v4382_v18 = vpop.f32.mrf.mxu1  ;;  %v11586_v52 = vadd.f32 %v4640_v55, %v4443_v58 }
 0x328   : > { %v4445_v44 = vadd.f32 %v4382_v18, %v11421_v21  ;;  %v8053_v32 = vpop.f32.mrf.mxu0 }
 0x329   : > { %v8006_v20 = vpop.f32.mrf.mxu1  ;;  %8305 = vmatmul.mubr.msk.f32.gmra.mxu1 %vm225_vm1, %v12752_v0  ;;  %v11591_v40 = vadd.f32 %v8053_v32, %v4446_v24 }
 0x32a   : > { %v4448_v35 = vadd.f32 %v8006_v20, %v11428_v1  ;;  %8307 = vmatprep.mubr.msk.f32.mxu1 %vm225_vm1, %v12753_v26  ;;  %v4650_v57 = vpop.f32.mrf.mxu0 }
 0x32b   : > { %v4392_v48 = vpop.f32.mrf.mxu1  ;;  %v11598_v50 = vadd.f32 %v4650_v57, %v4445_v44 }
 0x32c   : > { %v4447_v21 = vadd.f32 %v4392_v48, %v11437_v37  ;;  %v8056_v9 = vpop.f32.mrf.mxu0 }
 0x32d   : > { %v8009_v27 = vpop.f32.mrf.mxu1  ;;  %8308 = vmatmul.mubr.msk.f32.gmra.mxu1 %vm225_vm1, %v12754_v6  ;;  %v11603_v28 = vadd.f32 %v8056_v9, %v4448_v35 }
 0x32e   : > { %v4450_v1 = vadd.f32 %v8009_v27, %v11446_v51  ;;  %8310 = vmatprep.mubr.msk.f32.mxu1 %vm225_vm1, %v5808_v10  ;;  %v4660_v22 = vpop.f32.mrf.mxu0 }
 0x32f   : > { %v4402_v16 = vpop.f32.mrf.mxu1  ;;  %v11608_v23 = vadd.f32 %v4660_v22, %v4447_v21 }
 0x330   : > { %v4449_v17 = vadd.f32 %v4402_v16, %v11453_v7  ;;  %v8059_v37 = vpop.f32.mrf.mxu0 }
 0x331   : > { %v8012_v39 = vpop.f32.mrf.mxu1  ;;  %8311 = vmatmul.mubr.msk.f32.gmra.mxu1 %vm225_vm1, %v5810_v56  ;;  %v11612_v11 = vadd.f32 %v8059_v37, %v4450_v1 }
 0x332   : > { %v4452_v58 = vadd.f32 %v8012_v39, %v11460_v47  ;;  %v4670_v46 = vpop.f32.mrf.mxu0 }
 0x333   : > { %v4412_v51 = vpop.f32.mrf.mxu1  ;;  %v11615_v34 = vadd.f32 %v4670_v46, %v4449_v17 }
 0x334   : > { %v4451_v33 = vadd.f32 %v4412_v51, %v11465_v42  ;;  %v8062_v24 = vpop.f32.mrf.mxu0 }
 0x335   : > { %v8067_v43 = vpop.f32.mrf.mxu1  ;;  %v11618_v49 = vadd.f32 %v8062_v24, %v4452_v58 }
 0x336   : > { %v11621_v7 = vadd.f32 %v8067_v43, %v11469_v53  ;;  %v4680_v55 = vpop.f32.mrf.mxu0 }
 0x337   : > { %v4802_v18 = vpop.f32.mrf.mxu1  ;;  %v11623_v14 = vadd.f32 %v4680_v55, %v4451_v33 }
 0x338   : > { %v11626_v44 = vadd.f32 %v4802_v18, %v11474_v41  ;;  %v11628_v47 = vpop.f32.mrf.mxu0 }
 0x339   : > { %v8070_v32 = vpop.f32.mrf.mxu1 }
 0x33a   : > { %v11631_v20 = vadd.f32 %v8070_v32, %v11479_v12  ;;  %v11633_v42 = vpop.f32.mrf.mxu0 }
 0x33b   : > { %v4812_v0 = vpop.f32.mrf.mxu1 }
 0x33c   : > { %v11636_v35 = vadd.f32 %v4812_v0, %v11484_v2  ;;  %v11638_v53 = vpop.f32.mrf.mxu0 }
 0x33d   : > { %v8073_v26 = vpop.f32.mrf.mxu1 }
 0x33e   : > { %v11641_v36 = vadd.f32 %v8073_v26, %v11489_v30  ;;  %v11643_v41 = vpop.f32.mrf.mxu0 }
 0x33f   : > { %v4822_v57 = vpop.f32.mrf.mxu1 }
 0x340   : > { %v11646_v48 = vadd.f32 %v4822_v57, %v11494_v31  ;;  %v11648_v12 = vpop.f32.mrf.mxu0 }
 0x341   : > { %v8076_v10 = vpop.f32.mrf.mxu1 }
 0x342   : > { %v11651_v21 = vadd.f32 %v8076_v10, %v11499_v38  ;;  %v11653_v2 = vpop.f32.mrf.mxu0 }
 0x343   : > { %v4832_v9 = vpop.f32.mrf.mxu1 }
 0x344   : > { %v11656_v27 = vadd.f32 %v4832_v9, %v11504_v54  ;;  %v11658_v30 = vpop.f32.mrf.mxu0 }
 0x345   : > { %v8079_v6 = vpop.f32.mrf.mxu1 }
 0x346   : > { %v11661_v1 = vadd.f32 %v8079_v6, %v11509_v63  ;;  %v11663_v31 = vpop.f32.mrf.mxu0 }
 0x347   : > { %v4842_v56 = vpop.f32.mrf.mxu1 }
 0x348   : > { %v11666_v22 = vadd.f32 %v4842_v56, %v11514_v3  ;;  %v11668_v38 = vpop.f32.mrf.mxu0 }
 0x349   : > { %v8082_v16 = vpop.f32.mrf.mxu1 }
 0x34a   : > { %v11671_v17 = vadd.f32 %v8082_v16, %v11519_v29  ;;  %v11673_v54 = vpop.f32.mrf.mxu0 }
 0x34b   : > { %v4852_v37 = vpop.f32.mrf.mxu1 }
 0x34c   : > { %v11676_v39 = vadd.f32 %v4852_v37, %v11524_v13  ;;  %v11678_v63 = vpop.f32.mrf.mxu0 }
 0x34d   : > { %v8085_v58 = vpop.f32.mrf.mxu1 }
 0x34e   : > { %v11681_v46 = vadd.f32 %v8085_v58, %v11529_v4  ;;  %v11683_v3 = vpop.f32.mrf.mxu0 }
 0x34f   : > { %v4862_v51 = vpop.f32.mrf.mxu1 }
 0x350   : > { %v11686_v33 = vadd.f32 %v4862_v51, %v11534_v8  ;;  %v11688_v29 = vpop.f32.mrf.mxu0 }
 0x351   : > { %v8088_v24 = vpop.f32.mrf.mxu1 }
 0x352   : > { %v11691_v43 = vadd.f32 %v8088_v24, %v11539_v19  ;;  %v11693_v13 = vpop.f32.mrf.mxu0 }
 0x353   : > { %v4872_v55 = vpop.f32.mrf.mxu1 }
 0x354   : > { %v11696_v18 = vadd.f32 %v4872_v55, %v11544_v5  ;;  %v11698_v4 = vpop.f32.mrf.mxu0 }
 0x355   : > { %12756 = vst [vmem:[#allocation112_spill] sm:$0xff] %v11698_v4  ;;  %v8091_v32 = vpop.f32.mrf.mxu1 }
 0x356   : > { %12755 = vst [vmem:[#allocation119_spill] sm:$0xff] %v11696_v18  ;;  %v11701_v0 = vadd.f32 %v8091_v32, %v11549_v25  ;;  %v11703_v8 = vpop.f32.mrf.mxu0 }
 0x357   : > { %12758 = vst [vmem:[#allocation114_spill] sm:$0xff] %v11703_v8  ;;  %v4882_v26 = vpop.f32.mrf.mxu1 }
 0x358   : > { %12757 = vst [vmem:[#allocation79_spill] sm:$0xff] %v11701_v0  ;;  %v11706_v57 = vadd.f32 %v4882_v26, %v11554_v45  ;;  %v11708_v19 = vpop.f32.mrf.mxu0 }
 0x359   : > { %12760 = vst [vmem:[#allocation80_spill] sm:$0xff] %v11708_v19  ;;  %v8094_v10 = vpop.f32.mrf.mxu1 }
 0x35a   : > { %12759 = vst [vmem:[#allocation77_spill] sm:$0xff] %v11706_v57  ;;  %v11711_v9 = vadd.f32 %v8094_v10, %v11559_v60  ;;  %v11713_v5 = vpop.f32.mrf.mxu0 }
 0x35b   : > { %12762 = vst [vmem:[#allocation115_spill] sm:$0xff] %v11713_v5  ;;  %v4892_v6 = vpop.f32.mrf.mxu1 }
 0x35c   : > { %12761 = vst [vmem:[#allocation126_spill] sm:$0xff] %v11711_v9  ;;  %v11716_v56 = vadd.f32 %v4892_v6, %v11564_v61  ;;  %v11718_v25 = vpop.f32.mrf.mxu0 }
 0x35d   : > { %12764 = vst [vmem:[#allocation129_spill] sm:$0xff] %v11718_v25  ;;  %v8097_v16 = vpop.f32.mrf.mxu1 }
 0x35e   : > { %12763 = vst [vmem:[#allocation82_spill] sm:$0xff] %v11716_v56  ;;  %v11721_v37 = vadd.f32 %v8097_v16, %v11569_v62  ;;  %v11723_v45 = vpop.f32.mrf.mxu0 }
 0x35f   : > { %12766 = vst [vmem:[#allocation83_spill] sm:$0xff] %v11723_v45  ;;  %v4902_v58 = vpop.f32.mrf.mxu1 }
 0x360   : > { %12765 = vst [vmem:[#allocation117_spill] sm:$0xff] %v11721_v37  ;;  %v11726_v51 = vadd.f32 %v4902_v58, %v11574_v59  ;;  %v11728_v60 = vpop.f32.mrf.mxu0 }
 0x361   : > { %12768 = vst [vmem:[#allocation118_spill] sm:$0xff] %v11728_v60  ;;  %v8100_v24 = vpop.f32.mrf.mxu1 }
 0x362   : > { %12767 = vst [vmem:[#allocation132_spill] sm:$0xff] %v11726_v51  ;;  %v11731_v55 = vadd.f32 %v8100_v24, %v11579_v15  ;;  %v11733_v61 = vpop.f32.mrf.mxu0 }
 0x363   : > { %12770 = vst [vmem:[#allocation84_spill] sm:$0xff] %v11733_v61  ;;  %v4912_v32 = vpop.f32.mrf.mxu1 }
 0x364   : > { %12769 = vst [vmem:[#allocation81_spill] sm:$0xff] %v11731_v55  ;;  %v11736_v26 = vadd.f32 %v4912_v32, %v11586_v52  ;;  %v11738_v62 = vpop.f32.mrf.mxu0 }
 0x365   : > { %12772 = vst [vmem:[#allocation86_spill] sm:$0xff] %v11738_v62  ;;  %v8103_v10 = vpop.f32.mrf.mxu1 }
 0x366   : > { %12771 = vst [vmem:[#allocation120_spill] sm:$0xff] %v11736_v26  ;;  %v11741_v6 = vadd.f32 %v8103_v10, %v11591_v40  ;;  %v11743_v59 = vpop.f32.mrf.mxu0 }
 0x367   : > { %12774 = vst [vmem:[#allocation87_spill] sm:$0xff] %v11743_v59  ;;  %v4922_v16 = vpop.f32.mrf.mxu1 }
 0x368   : > { %12773 = vst [vmem:[#allocation121_spill] sm:$0xff] %v11741_v6  ;;  %v11746_v58 = vadd.f32 %v4922_v16, %v11598_v50  ;;  %v11748_v15 = vpop.f32.mrf.mxu0 }
 0x369   : > { %12776 = vst [vmem:[#allocation85_spill] sm:$0xff] %v11748_v15  ;;  %v8106_v24 = vpop.f32.mrf.mxu1 }
 0x36a   : > { %12775 = vst [vmem:[#allocation122_spill] sm:$0xff] %v11746_v58  ;;  %v11751_v55 = vadd.f32 %v8106_v24, %v11603_v28  ;;  %v11753_v52 = vpop.f32.mrf.mxu0 }
 0x36b   : > { %12778 = vst [vmem:[#allocation123_spill] sm:$0xff] %v11753_v52  ;;  %v4932_v32 = vpop.f32.mrf.mxu1 }
 0x36c   : > { %12777 = vst [vmem:[#allocation88_spill] sm:$0xff] %v11751_v55  ;;  %v11756_v26 = vadd.f32 %v4932_v32, %v11608_v23  ;;  %v11758_v40 = vpop.f32.mrf.mxu0 }
 0x36d   : > { %12780 = vst [vmem:[#allocation124_spill] sm:$0xff] %v11758_v40  ;;  %v8109_v10 = vpop.f32.mrf.mxu1 }
 0x36e   : > { %12779 = vst [vmem:[#allocation90_spill] sm:$0xff] %v11756_v26  ;;  %v11761_v6 = vadd.f32 %v8109_v10, %v11612_v11  ;;  %v11763_v50 = vpop.f32.mrf.mxu0 }
 0x36f   : > { %12782 = vst [vmem:[#allocation125_spill] sm:$0xff] %v11763_v50  ;;  %v4942_v16 = vpop.f32.mrf.mxu1 }
 0x370   : > { %12781 = vst [vmem:[#allocation91_spill] sm:$0xff] %v11761_v6  ;;  %v11766_v58 = vadd.f32 %v4942_v16, %v11615_v34  ;;  %v11768_v28 = vpop.f32.mrf.mxu0 }
 0x371   : > { %12784 = vst [vmem:[#allocation92_spill] sm:$0xff] %v11768_v28  ;;  %v8112_v24 = vpop.f32.mrf.mxu1 }
 0x372   : > { %12783 = vst [vmem:[#allocation89_spill] sm:$0xff] %v11766_v58  ;;  %v11771_v55 = vadd.f32 %v8112_v24, %v11618_v49  ;;  %v11773_v23 = vpop.f32.mrf.mxu0 }
 0x373   : > { %12786 = vst [vmem:[#allocation95_spill] sm:$0xff] %v11773_v23  ;;  %v4952_v32 = vpop.f32.mrf.mxu1 }
 0x374   : > { %12785 = vst [vmem:[#allocation127_spill] sm:$0xff] %v11771_v55  ;;  %v11776_v26 = vadd.f32 %v4952_v32, %v11623_v14  ;;  %v11778_v11 = vpop.f32.mrf.mxu0 }
 0x375   : > { %12788 = vst [vmem:[#allocation96_spill] sm:$0xff] %v11778_v11  ;;  %v8167_v10 = vpop.f32.mrf.mxu1 }
 0x376   : > { %12787 = vst [vmem:[#allocation128_spill] sm:$0xff] %v11776_v26  ;;  %v11780_v6 = vpop.f32.mrf.mxu0 }
 0x377   : > { %12789 = vst [vmem:[#allocation130_spill] sm:$0xff] %v11780_v6  ;;  %v5341_v50 = vpop.f32.mrf.mxu1 }
 0x378   : > { %v8217_v34 = vpop.f32.mrf.mxu0 }
 0x379   : > { %v8170_v16 = vpop.f32.mrf.mxu1 }
 0x37a   : > { %v5613_v58 = vpop.f32.mrf.mxu0 }
 0x37b   : > { %v5351_v28 = vpop.f32.mrf.mxu1 }
 0x37c   : > { %v8220_v40 = vpop.f32.mrf.mxu0 }
 0x37d   : > { %v8173_v52 = vpop.f32.mrf.mxu1 }
 0x37e   : > { %v11782_v49 = vpop.f32.mrf.mxu0 }
 0x37f   : > { %v11784_v24 = vpop.f32.mrf.mxu1 }
 0x380   : > { %v11788_v14 = vpop.f32.mrf.mxu0 }
 0x381   : > { %v11786_v55 = vpop.f32.mrf.mxu1 }
 0x382   : > { %v11794_v6 = vpop.f32.mrf.mxu0 }
 0x383   : > { %v11790_v32 = vpop.f32.mrf.mxu1 }
 0x384   : > { %v11800_v15 = vpop.f32.mrf.mxu0 }
 0x385   : > { %v11792_v26 = vpop.f32.mrf.mxu1 }
 0x386   : > { %v11806_v61 = vpop.f32.mrf.mxu0 }
 0x387   : > { %v11796_v11 = vpop.f32.mrf.mxu1 }
 0x388   : > { %v11812_v37 = vpop.f32.mrf.mxu0 }
 0x389   : > { %v11798_v23 = vpop.f32.mrf.mxu1 }
 0x38a   : > { %v11818_v25 = vpop.f32.mrf.mxu0 }
 0x38b   : > { %v11802_v59 = vpop.f32.mrf.mxu1 }
 0x38c   : > { %v11824_v57 = vpop.f32.mrf.mxu0 }
 0x38d   : > { %v11804_v62 = vpop.f32.mrf.mxu1 }
 0x38e   : > { %v11830_v8 = vpop.f32.mrf.mxu0 }
 0x38f   : > { %v11808_v51 = vpop.f32.mrf.mxu1  ;;  %12798 = vst [vmem:[#allocation25_spill] sm:$0xff] %v11830_v8 }
 0x390   : > { %12790 = vst [vmem:[#allocation93_spill] sm:$0xff] %v11808_v51 }
 0x391   : > { %v11810_v60 = vpop.f32.mrf.mxu1 }
 0x392   : > { %12791 = vst [vmem:[#allocation97_spill] sm:$0xff] %v11810_v60 }
 0x393   : > { %v11814_v45 = vpop.f32.mrf.mxu1 }
 0x394   : > { %12792 = vst [vmem:[#allocation131_spill] sm:$0xff] %v11814_v45  ;;  %v11836_v45 = vpop.f32.mrf.mxu0 }
 0x395   : > { %v11816_v56 = vpop.f32.mrf.mxu1 }
 0x396   : > { %12793 = vst [vmem:[#allocation99_spill] sm:$0xff] %v11816_v56 }
 0x397   : > { %v11820_v9 = vpop.f32.mrf.mxu1 }
 0x398   : > { %12794 = vst [vmem:[#allocation100_spill] sm:$0xff] %v11820_v9  ;;  %v11842_v9 = vpop.f32.mrf.mxu0 }
 0x399   : > { %v11822_v5 = vpop.f32.mrf.mxu1  ;;  %12803 = vst [vmem:[#allocation36_spill] sm:$0xff] %v11842_v9 }
 0x39a   : > { %12795 = vst [vmem:[#allocation98_spill] sm:$0xff] %v11822_v5 }
 0x39b   : > { %v11826_v19 = vpop.f32.mrf.mxu1 }
 0x39c   : > { %12796 = vst [vmem:[#allocation101_spill] sm:$0xff] %v11826_v19  ;;  %v11848_v19 = vpop.f32.mrf.mxu0 }
 0x39d   : > { %v11828_v0 = vpop.f32.mrf.mxu1  ;;  %12806 = vst [vmem:[#allocation44_spill] sm:$0xff] %v11848_v19 }
 0x39e   : > { %12797 = vst [vmem:[#allocation102_spill] sm:$0xff] %v11828_v0 }
 0x39f   : > { %v11832_v60 = vpop.f32.mrf.mxu1 }
 0x3a0   : > { %12799 = vst [vmem:[#allocation26_spill] sm:$0xff] %v11832_v60  ;;  %v11856_v60 = vpop.f32.mrf.mxu0 }
 0x3a1   : > { %v11834_v18 = vpop.f32.mrf.mxu1  ;;  %12809 = vst [vmem:[#allocation57_spill] sm:$0xff] %v11856_v60 }
 0x3a2   : > { %12800 = vst [vmem:[#allocation27_spill] sm:$0xff] %v11834_v18  ;;  %v5233_v18 = vadd.f32 %v11628_v47, %v11621_v7  ;;  %v11866_v19 = vpop.f32.mrf.mxu0  ;;  %v5234_v7 = vadd.f32 %v11643_v41, %v11636_v35 }
 0x3a3   : > { %v11838_v56 = vpop.f32.mrf.mxu1 }
 0x3a4   : > { %12801 = vst [vmem:[#allocation28_spill] sm:$0xff] %v11838_v56  ;;  %v5501_v9 = vadd.f32 %v8167_v10, %v5233_v18  ;;  %v5502_v18 = vadd.f32 %v5351_v28, %v5234_v7 }
 0x3a5   : > { %v11840_v51 = vpop.f32.mrf.mxu1 }
 0x3a6   : > { %12802 = vst [vmem:[#allocation29_spill] sm:$0xff] %v11840_v51  ;;  %v5232_v51 = vadd.f32 %v11633_v42, %v11626_v44  ;;  %v5773_v47 = vadd.f32 %v8217_v34, %v5501_v9  ;;  %v5237_v44 = vadd.f32 %v11648_v12, %v11641_v36  ;;  %v12811_v36 = vld [vmem:[#allocation4_spill] sm:$0xff]  ;;  %v5239_v9 = vadd.f32 %v11658_v30, %v11651_v21  ;;  %v12813_v30 = vld [vmem:[#allocation6_spill] sm:$0xff] }
 0x3a7   : > { %v11844_v5 = vpop.f32.mrf.mxu1 }
 0x3a8   : > { %12804 = vst [vmem:[#allocation59_spill] sm:$0xff] %v11844_v5  ;;  %v5507_v21 = vadd.f32 %v11786_v55, %v5239_v9 }
 0x3a9   : > { %v11846_v4 = vpop.f32.mrf.mxu1 }
 0x3aa   : > { %12805 = vst [vmem:[#allocation40_spill] sm:$0xff] %v11846_v4  ;;  %v5235_v4 = vadd.f32 %v11638_v53, %v11631_v20  ;;  %v5236_v20 = vadd.f32 %v11653_v2, %v11646_v48  ;;  %v11876_v53 = vpop.f32.mrf.mxu0  ;;  %v5774_v2 = vadd.f32 %v11782_v49, %v5502_v18  ;;  %v5241_v49 = vadd.f32 %v11668_v38, %v11661_v1  ;;  %v12815_v38 = vld [vmem:[#allocation8_spill] sm:$0xff] }
 0x3ab   : > { %v11850_v0 = vpop.f32.mrf.mxu1  ;;  %v5779_v18 = vadd.f32 %v11800_v15, %v5507_v21 }
 0x3ac   : > { %12807 = vst [vmem:[#allocation45_spill] sm:$0xff] %v11850_v0  ;;  %v5500_v0 = vadd.f32 %v5341_v50, %v5232_v51  ;;  %v5504_v51 = vadd.f32 %v11784_v24, %v5236_v20  ;;  %v5509_v1 = vadd.f32 %v11792_v26, %v5241_v49 }
 0x3ad   : > { %v11852_v8 = vpop.f32.mrf.mxu1 }
 0x3ae   : > { %12808 = vst [vmem:[#allocation48_spill] sm:$0xff] %v11852_v8  ;;  %v5772_v42 = vadd.f32 %v5613_v58, %v5500_v0  ;;  %v5776_v7 = vadd.f32 %v11794_v6, %v5504_v51 }
 0x3af   : > { %v11858_v56 = vpop.f32.mrf.mxu1 }
 0x3b0   : > { %12810 = vst [vmem:[#allocation51_spill] sm:$0xff] %v11858_v56  ;;  %v5503_v56 = vadd.f32 %v8170_v16, %v5235_v4  ;;  %v5505_v4 = vadd.f32 %v8173_v52, %v5237_v44  ;;  %v11895_v52 = vpop.f32.mrf.mxu0 }
 0x3b1   : > { %v11862_v5 = vpop.f32.mrf.mxu1 }
 0x3b2   : > { %v5775_v41 = vadd.f32 %v8220_v40, %v5503_v56  ;;  %v5238_v56 = vadd.f32 %v11663_v31, %v11656_v27  ;;  %v5777_v28 = vadd.f32 %v11788_v14, %v5505_v4  ;;  %v12814_v31 = vld [vmem:[#allocation5_spill] sm:$0xff]  ;;  %v11911_v44 = vpop.f32.mrf.mxu0 }
 0x3b3   : > { %v11868_v8 = vpop.f32.mrf.mxu1 }
 0x3b4   : > { %v5506_v27 = vadd.f32 %v11790_v32, %v5238_v56  ;;  %v11927_v4 = vpop.f32.mrf.mxu0 }
 0x3b5   : > { %v8267_v60 = vpop.f32.mrf.mxu1 }
 0x3b6   : > { %v6044_v10 = vadd.f32 %v8267_v60, %v5773_v47  ;;  %v12812_v60 = vld [vmem:[#allocation3_spill] sm:$0xff]  ;;  %v5240_v47 = vadd.f32 %v11673_v54, %v11666_v22  ;;  %v11943_v51 = vpop.f32.mrf.mxu0 }
 0x3b7   : > { %v5884_v35 = vpop.f32.mrf.mxu1  ;;  %v12816_v54 = vld [vmem:[#allocation7_spill] sm:$0xff] }
 0x3b8   : > { %v6076_v12 = vadd.f32 %v6044_v10, %v12811_v36  ;;  %v6043_v0 = vadd.f32 %v5884_v35, %v5772_v42  ;;  %v5243_v10 = vadd.f32 %v11678_v63, %v11671_v17  ;;  %v5778_v35 = vadd.f32 %v11806_v61, %v5506_v27  ;;  %v12817_v63 = vld [vmem:[#allocation10_spill] sm:$0xff] }
 0x3b9   : > { %v8270_v48 = vpop.f32.mrf.mxu1  ;;  %v5508_v22 = vadd.f32 %v11796_v11, %v5240_v47 }
 0x3ba   : > { %6108 = vst.msk [vmem:[%s11883_s23 + $0x8] sm:$0xff] %vm225_vm1, %v6076_v12  ;;  %v6075_v58 = vadd.f32 %v6043_v0, %v12812_v60  ;;  %v6046_v50 = vadd.f32 %v8270_v48, %v5775_v41  ;;  %v5242_v41 = vadd.f32 %v11683_v3, %v11676_v39  ;;  %v5781_v12 = vadd.f32 %v11812_v37, %v5509_v1  ;;  %v12818_v3 = vld [vmem:[#allocation9_spill] sm:$0xff] }
 0x3bb   : > { %v5894_v40 = vpop.f32.mrf.mxu1  ;;  %v5511_v17 = vadd.f32 %v11798_v23, %v5243_v10  ;;  %v5245_v0 = vadd.f32 %v11688_v29, %v11681_v46  ;;  %v5780_v48 = vadd.f32 %v11818_v25, %v5508_v22  ;;  %v12819_v29 = vld [vmem:[#allocation12_spill] sm:$0xff]  ;;  %v12831_v10 = vld [vmem:[#allocation131_spill] sm:$0xff] }
 0x3bc   : > { %6107 = vst.msk [vmem:[%s11883_s23] sm:$0xff] %vm225_vm1, %v6075_v58  ;;  %v6078_v34 = vadd.f32 %v6046_v50, %v12813_v30  ;;  %v6045_v16 = vadd.f32 %v5894_v40, %v5774_v2  ;;  %v5510_v39 = vadd.f32 %v11802_v59, %v5242_v41  ;;  %v5244_v2 = vadd.f32 %v11693_v13, %v11686_v33  ;;  %v12820_v50 = vld [vmem:[#allocation112_spill] sm:$0xff]  ;;  %v12822_v33 = vld [vmem:[#allocation93_spill] sm:$0xff] }
 0x3bd   : > { %v8273_v24 = vpop.f32.mrf.mxu1  ;;  %v5783_v58 = vadd.f32 %v11824_v57, %v5511_v17  ;;  %v5513_v46 = vadd.f32 %v11804_v62, %v5245_v0  ;;  %v5247_v56 = vadd.f32 %v12820_v50, %v11691_v43  ;;  %v12823_v57 = vld [vmem:[#allocation11_spill] sm:$0xff]  ;;  %v12826_v43 = vld [vmem:[#allocation97_spill] sm:$0xff] }
 0x3be   : > { %6110 = vst.msk [vmem:[%s11883_s23 + $0x18] sm:$0xff] %vm225_vm1, %v6078_v34  ;;  %v6077_v14 = vadd.f32 %v6045_v16, %v12814_v31  ;;  %v6048_v55 = vadd.f32 %v8273_v24, %v5777_v28  ;;  %v12821_v28 = vld [vmem:[#allocation25_spill] sm:$0xff]  ;;  %v5512_v13 = vadd.f32 %v12822_v33, %v5244_v2  ;;  %v12824_v34 = vld [vmem:[#allocation119_spill] sm:$0xff]  ;;  %v12825_v16 = vld [vmem:[#allocation114_spill] sm:$0xff]  ;;  %v11959_v24 = vpop.f32.mrf.mxu0 }
 0x3bf   : > { %v5904_v42 = vpop.f32.mrf.mxu1  ;;  %v5782_v21 = vadd.f32 %v12821_v28, %v5510_v39  ;;  %v5246_v49 = vadd.f32 %v12825_v16, %v12824_v34  ;;  %v5785_v27 = vadd.f32 %v11836_v45, %v5513_v46  ;;  %v5515_v31 = vadd.f32 %v12826_v43, %v5247_v56  ;;  %v12832_v45 = vld [vmem:[#allocation13_spill] sm:$0xff]  ;;  %v12842_v46 = vld [vmem:[#allocation15_spill] sm:$0xff]  ;;  %v12845_v33 = vld [vmem:[#allocation98_spill] sm:$0xff] }
 0x3c0   : > { %6109 = vst.msk [vmem:[%s11883_s23 + $0x10] sm:$0xff] %vm225_vm1, %v6077_v14  ;;  %v6080_v6 = vadd.f32 %v6048_v55, %v12815_v38  ;;  %v6047_v32 = vadd.f32 %v5904_v42, %v5776_v7  ;;  %v12827_v14 = vld [vmem:[#allocation14_spill] sm:$0xff]  ;;  %v12828_v42 = vld [vmem:[#allocation79_spill] sm:$0xff]  ;;  %v11975_v41 = vpop.f32.mrf.mxu0  ;;  %v12839_v39 = vld [vmem:[#allocation129_spill] sm:$0xff] }
 0x3c1   : > { %v8276_v20 = vpop.f32.mrf.mxu1  ;;  %v12844_v50 = vld [vmem:[#allocation83_spill] sm:$0xff]  ;;  %v12847_v34 = vld [vmem:[#allocation117_spill] sm:$0xff]  ;;  %v12848_v16 = vld [vmem:[#allocation118_spill] sm:$0xff] }
 0x3c2   : > { %6112 = vst.msk [vmem:[%s11883_s23 + $0x28] sm:$0xff] %vm225_vm1, %v6080_v6  ;;  %v6079_v15 = vadd.f32 %v6047_v32, %v12816_v54  ;;  %v6050_v26 = vadd.f32 %v8276_v20, %v5779_v18  ;;  %v12829_v18 = vld [vmem:[#allocation80_spill] sm:$0xff]  ;;  %v5514_v20 = vadd.f32 %v12831_v10, %v5246_v49  ;;  %v12833_v54 = vld [vmem:[#allocation77_spill] sm:$0xff]  ;;  %v5253_v49 = vadd.f32 %v12848_v16, %v12847_v34 }
 0x3c3   : > { %v5914_v36 = vpop.f32.mrf.mxu1  ;;  %v5249_v1 = vadd.f32 %v12829_v18, %v12828_v42  ;;  %v12830_v6 = vld [vmem:[#allocation36_spill] sm:$0xff]  ;;  %v12849_v43 = vld [vmem:[#allocation101_spill] sm:$0xff] }
 0x3c4   : > { %6111 = vst.msk [vmem:[%s11883_s23 + $0x20] sm:$0xff] %vm225_vm1, %v6079_v15  ;;  %v6082_v61 = vadd.f32 %v6050_v26, %v12817_v63  ;;  %v6049_v11 = vadd.f32 %v5914_v36, %v5778_v35  ;;  %v5784_v32 = vadd.f32 %v12830_v6, %v5512_v13  ;;  %v12834_v15 = vld [vmem:[#allocation115_spill] sm:$0xff]  ;;  %v12852_v42 = vld [vmem:[#allocation84_spill] sm:$0xff]  ;;  %v12869_v34 = vld [vmem:[#allocation29_spill] sm:$0xff] }
 0x3c5   : > { %v8279_v9 = vpop.f32.mrf.mxu1  ;;  %v5248_v26 = vadd.f32 %v12834_v15, %v12833_v54  ;;  %v12836_v63 = vld [vmem:[#allocation99_spill] sm:$0xff] }
 0x3c6   : > { %6114 = vst.msk [vmem:[%s11883_s23 + $0x38] sm:$0xff] %vm225_vm1, %v6082_v61  ;;  %v6081_v37 = vadd.f32 %v6049_v11, %v12818_v3  ;;  %v6052_v23 = vadd.f32 %v8279_v9, %v5781_v12  ;;  %v12835_v12 = vld [vmem:[#allocation44_spill] sm:$0xff]  ;;  %v5517_v61 = vadd.f32 %v12836_v63, %v5249_v1 }
 0x3c7   : > { %v5924_v60 = vpop.f32.mrf.mxu1  ;;  %v5787_v17 = vadd.f32 %v12835_v12, %v5515_v31  ;;  %v12837_v11 = vld [vmem:[#allocation16_spill] sm:$0xff] }
 0x3c8   : > { %6113 = vst.msk [vmem:[%s11883_s23 + $0x30] sm:$0xff] %vm225_vm1, %v6081_v37  ;;  %v6084_v25 = vadd.f32 %v6052_v23, %v12819_v29  ;;  %v6051_v59 = vadd.f32 %v5924_v60, %v5780_v48  ;;  %v12838_v48 = vld [vmem:[#allocation126_spill] sm:$0xff]  ;;  %v12840_v23 = vld [vmem:[#allocation57_spill] sm:$0xff]  ;;  %v12841_v60 = vld [vmem:[#allocation100_spill] sm:$0xff] }
 0x3c9   : > { %v8282_v40 = vpop.f32.mrf.mxu1  ;;  %v5251_v3 = vadd.f32 %v12839_v39, %v12838_v48  ;;  %v5786_v2 = vadd.f32 %v12840_v23, %v5514_v20 }
 0x3ca   : > { %6116 = vst.msk [vmem:[%s11883_s23 + $0x48] sm:$0xff] %vm225_vm1, %v6084_v25  ;;  %v6083_v30 = vadd.f32 %v6051_v59, %v12823_v57  ;;  %v6054_v62 = vadd.f32 %v8282_v40, %v5783_v58  ;;  %v5516_v58 = vadd.f32 %v12841_v60, %v5248_v26  ;;  %v12843_v59 = vld [vmem:[#allocation82_spill] sm:$0xff]  ;;  %v8253_v40 = vpop.f32.mrf.mxu0  ;;  %v12863_v60 = vld [vmem:[#allocation121_spill] sm:$0xff] }
 0x3cb   : > { %v5934_v7 = vpop.f32.mrf.mxu1  ;;  %v5250_v56 = vadd.f32 %v12844_v50, %v12843_v59  ;;  %v5519_v13 = vadd.f32 %v12845_v33, %v5251_v3  ;;  %v12846_v57 = vld [vmem:[#allocation18_spill] sm:$0xff]  ;;  %v12861_v3 = vld [vmem:[#allocation27_spill] sm:$0xff]  ;;  %v12865_v59 = vld [vmem:[#allocation28_spill] sm:$0xff] }
 0x3cc   : > { %6115 = vst.msk [vmem:[%s11883_s23 + $0x40] sm:$0xff] %vm225_vm1, %v6083_v30  ;;  %v6086_v55 = vadd.f32 %v6054_v62, %v12827_v14  ;;  %v6053_v47 = vadd.f32 %v5934_v7, %v5782_v21  ;;  %v5789_v21 = vadd.f32 %v11866_v19, %v5517_v61  ;;  %v12850_v19 = vld [vmem:[#allocation17_spill] sm:$0xff]  ;;  %v5733_v1 = vpop.f32.mrf.mxu0  ;;  %v12859_v61 = vld [vmem:[#allocation120_spill] sm:$0xff]  ;;  %v12868_v33 = vld [vmem:[#allocation123_spill] sm:$0xff] }
 0x3cd   : > { %v8285_v38 = vpop.f32.mrf.mxu1  ;;  %v5518_v31 = vadd.f32 %v12849_v43, %v5250_v56  ;;  %v5791_v6 = vadd.f32 %v11895_v52, %v5519_v13  ;;  %v12858_v52 = vld [vmem:[#allocation19_spill] sm:$0xff]  ;;  %v12872_v43 = vld [vmem:[#allocation124_spill] sm:$0xff] }
 0x3ce   : > { %6118 = vst.msk [vmem:[%s11883_s23 + $0x58] sm:$0xff] %vm225_vm1, %v6086_v55  ;;  %v6085_v35 = vadd.f32 %v6053_v47, %v12832_v45  ;;  %v6056_v22 = vadd.f32 %v8285_v38, %v5785_v27  ;;  %v5788_v27 = vadd.f32 %v11876_v53, %v5516_v58  ;;  %v12851_v47 = vld [vmem:[#allocation132_spill] sm:$0xff]  ;;  %v12864_v58 = vld [vmem:[#allocation85_spill] sm:$0xff] }
 0x3cf   : > { %v5944_v36 = vpop.f32.mrf.mxu1  ;;  %v5252_v18 = vadd.f32 %v12852_v42, %v12851_v47  ;;  %v12854_v53 = vld [vmem:[#allocation20_spill] sm:$0xff]  ;;  %v5790_v26 = vadd.f32 %v11911_v44, %v5518_v31  ;;  %v12862_v44 = vld [vmem:[#allocation22_spill] sm:$0xff] }
 0x3d0   : > { %6117 = vst.msk [vmem:[%s11883_s23 + $0x50] sm:$0xff] %vm225_vm1, %v6085_v35  ;;  %v6088_v0 = vadd.f32 %v6056_v22, %v12837_v11  ;;  %v6055_v9 = vadd.f32 %v5944_v36, %v5784_v32  ;;  %v12853_v32 = vld [vmem:[#allocation102_spill] sm:$0xff]  ;;  %v12855_v35 = vld [vmem:[#allocation81_spill] sm:$0xff]  ;;  %v12860_v11 = vld [vmem:[#allocation87_spill] sm:$0xff] }
 0x3d1   : > { %v8288_v37 = vpop.f32.mrf.mxu1  ;;  %v5521_v10 = vadd.f32 %v12853_v32, %v5253_v49  ;;  %v12856_v22 = vld [vmem:[#allocation86_spill] sm:$0xff] }
 0x3d2   : > { %6120 = vst.msk [vmem:[%s11883_s23 + $0x68] sm:$0xff] %vm225_vm1, %v6088_v0  ;;  %v6087_v29 = vadd.f32 %v6055_v9, %v12842_v46  ;;  %v6058_v25 = vadd.f32 %v8288_v37, %v5787_v17  ;;  %v5255_v54 = vadd.f32 %v12856_v22, %v12855_v35  ;;  %v12857_v36 = vld [vmem:[#allocation26_spill] sm:$0xff]  ;;  %v5254_v0 = vadd.f32 %v12860_v11, %v12859_v61  ;;  %v8256_v9 = vpop.f32.mrf.mxu0  ;;  %v12882_v61 = vld [vmem:[#allocation31_spill] sm:$0xff] }
 0x3d3   : > { %v5954_v28 = vpop.f32.mrf.mxu1  ;;  %v5520_v12 = vadd.f32 %v12857_v36, %v5252_v18  ;;  %v5793_v39 = vadd.f32 %v11927_v4, %v5521_v10  ;;  %v5257_v46 = vadd.f32 %v12864_v58, %v12863_v60  ;;  %v12866_v4 = vld [vmem:[#allocation21_spill] sm:$0xff] }
 0x3d4   : > { %6119 = vst.msk [vmem:[%s11883_s23 + $0x60] sm:$0xff] %vm225_vm1, %v6087_v29  ;;  %v6090_v30 = vadd.f32 %v6058_v25, %v12846_v57  ;;  %v6057_v62 = vadd.f32 %v5954_v28, %v5786_v2  ;;  %v5523_v37 = vadd.f32 %v12861_v3, %v5255_v54  ;;  %v5522_v50 = vadd.f32 %v12865_v59, %v5254_v0  ;;  %v5743_v57 = vpop.f32.mrf.mxu0  ;;  %v12883_v0 = vld [vmem:[#allocation89_spill] sm:$0xff] }
 0x3d5   : > { %v8291_v7 = vpop.f32.mrf.mxu1  ;;  %v5792_v25 = vadd.f32 %v11943_v51, %v5520_v12  ;;  %v5525_v16 = vadd.f32 %v12869_v34, %v5257_v46  ;;  %v12870_v51 = vld [vmem:[#allocation24_spill] sm:$0xff]  ;;  %v12887_v46 = vld [vmem:[#allocation127_spill] sm:$0xff] }
 0x3d6   : > { %6122 = vst.msk [vmem:[%s11883_s23 + $0x78] sm:$0xff] %vm225_vm1, %v6090_v30  ;;  %v6089_v14 = vadd.f32 %v6057_v62, %v12850_v19  ;;  %v6060_v55 = vadd.f32 %v8291_v7, %v5789_v21  ;;  %v12867_v21 = vld [vmem:[#allocation122_spill] sm:$0xff]  ;;  %v5795_v62 = vadd.f32 %v11959_v24, %v5523_v37  ;;  %v12874_v24 = vld [vmem:[#allocation23_spill] sm:$0xff]  ;;  %v8259_v10 = vpop.f32.mrf.mxu0 }
 0x3d7   : > { %v5964_v38 = vpop.f32.mrf.mxu1  ;;  %v5256_v13 = vadd.f32 %v12868_v33, %v12867_v21  ;;  %v12891_v33 = vld [vmem:[#allocation128_spill] sm:$0xff] }
 0x3d8   : > { %6121 = vst.msk [vmem:[%s11883_s23 + $0x70] sm:$0xff] %vm225_vm1, %v6089_v14  ;;  %v6092_v20 = vadd.f32 %v6060_v55, %v12854_v53  ;;  %v6059_v45 = vadd.f32 %v5964_v38, %v5788_v27  ;;  %v12871_v27 = vld [vmem:[#allocation88_spill] sm:$0xff]  ;;  %v5794_v14 = vadd.f32 %v11975_v41, %v5522_v50  ;;  %v12873_v55 = vld [vmem:[#allocation59_spill] sm:$0xff]  ;;  %v12875_v38 = vld [vmem:[#allocation90_spill] sm:$0xff]  ;;  %v5753_v3 = vpop.f32.mrf.mxu0 }
 0x3d9   : > { %v8294_v15 = vpop.f32.mrf.mxu1  ;;  %v5259_v31 = vadd.f32 %v12872_v43, %v12871_v27  ;;  %v5524_v47 = vadd.f32 %v12873_v55, %v5256_v13  ;;  %v12878_v41 = vld [vmem:[#allocation32_spill] sm:$0xff]  ;;  %v12892_v13 = vld [vmem:[#allocation130_spill] sm:$0xff] }
 0x3da   : > { %6124 = vst.msk [vmem:[%s11883_s23 + $0x88] sm:$0xff] %vm225_vm1, %v6092_v20  ;;  %v6091_v17 = vadd.f32 %v6059_v45, %v12858_v52  ;;  %v6062_v63 = vadd.f32 %v8294_v15, %v5791_v6  ;;  %v12876_v6 = vld [vmem:[#allocation125_spill] sm:$0xff]  ;;  %v5797_v20 = vadd.f32 %v8253_v40, %v5525_v16  ;;  %v12877_v45 = vld [vmem:[#allocation40_spill] sm:$0xff]  ;;  %v12879_v15 = vld [vmem:[#allocation91_spill] sm:$0xff] }
 0x3db   : > { %v5974_v48 = vpop.f32.mrf.mxu1  ;;  %v5258_v32 = vadd.f32 %v12876_v6, %v12875_v38  ;;  %v5527_v35 = vadd.f32 %v12877_v45, %v5259_v31  ;;  %v5796_v52 = vadd.f32 %v5733_v1, %v5524_v47  ;;  %v12886_v1 = vld [vmem:[#allocation34_spill] sm:$0xff]  ;;  %v12897_v45 = vld [vmem:[#allocation43_spill] sm:$0xff] }
 0x3dc   : > { %6123 = vst.msk [vmem:[%s11883_s23 + $0x80] sm:$0xff] %vm225_vm1, %v6091_v17  ;;  %v6094_v23 = vadd.f32 %v6062_v63, %v12862_v44  ;;  %v6061_v2 = vadd.f32 %v5974_v48, %v5790_v26  ;;  %v12880_v26 = vld [vmem:[#allocation92_spill] sm:$0xff]  ;;  %v12881_v17 = vld [vmem:[#allocation45_spill] sm:$0xff]  ;;  %v12884_v48 = vld [vmem:[#allocation95_spill] sm:$0xff] }
 0x3dd   : > { %v8297_v29 = vpop.f32.mrf.mxu1  ;;  %v5261_v36 = vadd.f32 %v12880_v26, %v12879_v15  ;;  %v5526_v63 = vadd.f32 %v12881_v17, %v5258_v32  ;;  %v5799_v44 = vadd.f32 %v8256_v9, %v5527_v35 }
 0x3de   : > { %6126 = vst.msk [vmem:[%s11883_s23 + $0x98] sm:$0xff] %vm225_vm1, %v6094_v23  ;;  %v6093_v56 = vadd.f32 %v6061_v2, %v12866_v4  ;;  %v6064_v28 = vadd.f32 %v8297_v29, %v5793_v39  ;;  %v5260_v39 = vadd.f32 %v12884_v48, %v12883_v0  ;;  %v12885_v23 = vld [vmem:[#allocation48_spill] sm:$0xff]  ;;  %v12889_v4 = vld [vmem:[#allocation51_spill] sm:$0xff] }
 0x3df   : > { %v5984_v30 = vpop.f32.mrf.mxu1  ;;  %v5529_v2 = vadd.f32 %v12885_v23, %v5261_v36  ;;  %v12888_v29 = vld [vmem:[#allocation96_spill] sm:$0xff]  ;;  %v5798_v50 = vadd.f32 %v5743_v57, %v5526_v63  ;;  %v12893_v57 = vld [vmem:[#allocation37_spill] sm:$0xff] }
 0x3e0   : > { %6125 = vst.msk [vmem:[%s11883_s23 + $0x90] sm:$0xff] %vm225_vm1, %v6093_v56  ;;  %v6096_v49 = vadd.f32 %v6064_v28, %v12870_v51  ;;  %v6063_v7 = vadd.f32 %v5984_v30, %v5792_v25  ;;  %v5263_v25 = vadd.f32 %v12888_v29, %v12887_v46  ;;  %v5528_v56 = vadd.f32 %v12889_v4, %v5260_v39  ;;  %v12890_v28 = vld [vmem:[#allocation33_spill] sm:$0xff] }
 0x3e1   : > { %v8300_v19 = vpop.f32.mrf.mxu1  ;;  %v5262_v30 = vadd.f32 %v12892_v13, %v12891_v33  ;;  %v5801_v16 = vadd.f32 %v8259_v10, %v5529_v2 }
 0x3e2   : > { %6128 = vst.msk [vmem:[%s11883_s23 + $0xa8] sm:$0xff] %vm225_vm1, %v6096_v49  ;;  %v6095_v42 = vadd.f32 %v6063_v7, %v12874_v24  ;;  %v6066_v18 = vadd.f32 %v8300_v19, %v5795_v62  ;;  %v8262_v62 = vpop.f32.mrf.mxu0  ;;  %v5531_v51 = vadd.f32 %v11862_v5, %v5263_v25  ;;  %v5800_v43 = vadd.f32 %v5753_v3, %v5528_v56  ;;  %v12894_v19 = vld [vmem:[#allocation35_spill] sm:$0xff] }
 0x3e3   : > { %v5994_v53 = vpop.f32.mrf.mxu1  ;;  %v5530_v31 = vadd.f32 %v11868_v8, %v5262_v30  ;;  %v12896_v8 = vld [vmem:[#allocation38_spill] sm:$0xff] }
 0x3e4   : > { %6127 = vst.msk [vmem:[%s11883_s23 + $0xa0] sm:$0xff] %vm225_vm1, %v6095_v42  ;;  %v6098_v22 = vadd.f32 %v6066_v18, %v12878_v41  ;;  %v6065_v54 = vadd.f32 %v5994_v53, %v5794_v14  ;;  %v5763_v47 = vpop.f32.mrf.mxu0  ;;  %v5803_v5 = vadd.f32 %v8262_v62, %v5531_v51  ;;  %v12895_v42 = vld [vmem:[#allocation39_spill] sm:$0xff] }
 0x3e5   : > { %v8303_v12 = vpop.f32.mrf.mxu1  ;;  %v5802_v32 = vadd.f32 %v5763_v47, %v5530_v31 }
 0x3e6   : > { %6130 = vst.msk [vmem:[%s11883_s23 + $0xb8] sm:$0xff] %vm225_vm1, %v6098_v22  ;;  %v6097_v40 = vadd.f32 %v6065_v54, %v12882_v61  ;;  %v6068_v11 = vadd.f32 %v8303_v12, %v5797_v20  ;;  %v12898_v22 = vld [vmem:[#allocation41_spill] sm:$0xff] }
 0x3e7   : > { %v6004_v37 = vpop.f32.mrf.mxu1 }
 0x3e8   : > { %6129 = vst.msk [vmem:[%s11883_s23 + $0xb0] sm:$0xff] %vm225_vm1, %v6097_v40  ;;  %v6100_v60 = vadd.f32 %v6068_v11, %v12886_v1  ;;  %v6067_v58 = vadd.f32 %v6004_v37, %v5796_v52 }
 0x3e9   : > { %v8306_v59 = vpop.f32.mrf.mxu1 }
 0x3ea   : > { %6132 = vst.msk [vmem:[%s11883_s23 + $0xc8] sm:$0xff] %vm225_vm1, %v6100_v60  ;;  %v6099_v9 = vadd.f32 %v6067_v58, %v12890_v28  ;;  %v6070_v21 = vadd.f32 %v8306_v59, %v5799_v44 }
 0x3eb   : > { %v6014_v34 = vpop.f32.mrf.mxu1 }
 0x3ec   : > { %6131 = vst.msk [vmem:[%s11883_s23 + $0xc0] sm:$0xff] %vm225_vm1, %v6099_v9  ;;  %v6102_v49 = vadd.f32 %v6070_v21, %v12893_v57  ;;  %v6069_v7 = vadd.f32 %v6014_v34, %v5798_v50 }
 0x3ed   : > { %v8309_v27 = vpop.f32.mrf.mxu1 }
 0x3ee   : > { %6134 = vst.msk [vmem:[%s11883_s23 + $0xd8] sm:$0xff] %vm225_vm1, %v6102_v49  ;;  %v6101_v14 = vadd.f32 %v6069_v7, %v12894_v19  ;;  %v6072_v55 = vadd.f32 %v8309_v27, %v5801_v16 }
 0x3ef   : > { %v6024_v24 = vpop.f32.mrf.mxu1 }
 0x3f0   : > { %6133 = vst.msk [vmem:[%s11883_s23 + $0xd0] sm:$0xff] %vm225_vm1, %v6101_v14  ;;  %v6104_v18 = vadd.f32 %v6072_v55, %v12895_v42  ;;  %v6071_v38 = vadd.f32 %v6024_v24, %v5800_v43 }
 0x3f1   : > { %v8312_v6 = vpop.f32.mrf.mxu1 }
 0x3f2   : > { %6136 = vst.msk [vmem:[%s11883_s23 + $0xe8] sm:$0xff] %vm225_vm1, %v6104_v18  ;;  %v6103_v10 = vadd.f32 %v6071_v38, %v12896_v8  ;;  %v6074_v53 = vadd.f32 %v8312_v6, %v5803_v5 }
 0x3f3   : > { %v6034_v20 = vpop.f32.mrf.mxu1 }
 0x3f4   : > { %6135 = vst.msk [vmem:[%s11883_s23 + $0xe0] sm:$0xff] %vm225_vm1, %v6103_v10  ;;  %v6106_v35 = vadd.f32 %v6074_v53, %v12897_v45  ;;  %v6073_v41 = vadd.f32 %v6034_v20, %v5802_v32 }
 0x3f6   : > { %6138 = vst.msk [vmem:[%s11883_s23 + $0xf8] sm:$0xff] %vm225_vm1, %v6106_v35  ;;  %v6105_v54 = vadd.f32 %v6073_v41, %v12898_v22 }
 0x3f8   : > { %6137 = vst.msk [vmem:[%s11883_s23 + $0xf0] sm:$0xff] %vm225_vm1, %v6105_v54 }
 0x3f9 PF: > { %s15_s18 = sadd.s32 1, %s8339_s18  }
 0x3fa   : > { %p12_p4 = scmp.ge.s32.totalorder %s15_s18, 4  }
 0x3fc   :  { %14 = sbr.rel (!%p12_p4) target bundleno = 1 (0x1), region = 88 }

</bundles_post_ra>
